<compile_context>
chip_gen: v7x
topology: tpu7x:2x2x1
jax: 0.10.0
libtpu: 0.0.40
codegen_flags: <defaults>
</compile_context>

<pallas_src>
import jax
import jax.numpy as jnp
from jax import lax
from jax.experimental import pallas as pl
from jax.experimental.pallas import tpu as pltpu


def _dead_block_kernel(x_pad_ref, w1_ref, wcat_ref, bias_ref, o_ref, pad_scratch):
    """One batch element per grid step.

    conv1 and (conv2 + 1x1 shortcut) are each a single im2col MXU matmul; all
    BN scales and the (1 - death_rate) factor are pre-folded into the weight
    columns, so only two bias adds and two relus remain on the VPU.
    """
    Hp, Wp, Cin = x_pad_ref.shape
    H, W = Hp - 2, Wp - 2
    Cout = pad_scratch.shape[-1]
    M = H * W

    # ---- conv1 (3x3, stride 1, pad 1): im2col (M, 9*Cin) + one K=9*Cin dot ----
    cols = []
    for kh in range(3):
        for kw in range(3):
            cols.append(x_pad_ref[kh:kh + H, kw:kw + W, :].reshape(M, Cin))
    patches1 = jnp.concatenate(cols, axis=1)                       # (M, 9*Cin)
    acc1 = jnp.dot(patches1, w1_ref[...], preferred_element_type=jnp.float32)
    out1 = jnp.maximum(acc1 + bias_ref[0:1, :], 0.0)               # bn1 bias + relu

    # ---- re-pad out1 into VMEM scratch for conv2 ----
    # Zero every step (scratch is per-core; with a "parallel" batch grid a core
    # may never execute iteration 0, so the border cannot be zeroed only once).
    pad_scratch[...] = jnp.zeros_like(pad_scratch)
    pad_scratch[1:H + 1, 1:W + 1, :] = out1.reshape(H, W, Cout)

    # ---- conv2 (3x3) + 1x1 shortcut fused into ONE matmul ----
    #   [patches2 | x_center] @ [[w2 * s2 * (1-dr)] ; [ws * ss]]
    cols2 = []
    for kh in range(3):
        for kw in range(3):
            cols2.append(pad_scratch[kh:kh + H, kw:kw + W, :].reshape(M, Cout))
    cols2.append(x_pad_ref[1:H + 1, 1:W + 1, :].reshape(M, Cin))   # 1x1 center tap
    patches2 = jnp.concatenate(cols2, axis=1)                      # (M, 9*Cout+Cin)
    acc2 = jnp.dot(patches2, wcat_ref[...], preferred_element_type=jnp.float32)

    # ---- combined bias (b2*(1-dr) + b_s) + final relu ----
    o_ref[...] = jnp.maximum(acc2 + bias_ref[1:2, :], 0.0)


def _fold_bn(gamma, beta, mean, var, eps=1e-5):
    s = gamma / jnp.sqrt(var + eps)
    b = beta - mean * s
    return s, b


def dead_basic_block(x_nchw, params, death_rate=0.25):
    """x_nchw: (N, Cin, H, W) float32. Returns (N, Cout, H, W)."""
    N, Cin, H, W = x_nchw.shape
    w1 = params["w1"]       # (Cout, Cin, 3, 3)
    w2 = params["w2"]       # (Cout, Cout, 3, 3)
    ws = params["ws"]       # (Cout, Cin, 1, 1)
    Cout = w1.shape[0]
    live = jnp.float32(1.0 - death_rate)

    # ---- glue: layout conversion & parameter folding (plain JAX, tiny) ----
    x_nhwc = jnp.transpose(x_nchw, (0, 2, 3, 1)).astype(jnp.float32)
    x_pad = jnp.pad(x_nhwc, ((0, 0), (1, 1), (1, 1), (0, 0)))

    s1, b1 = _fold_bn(params["g1"], params["be1"], params["m1"], params["v1"])
    s2, b2 = _fold_bn(params["g2"], params["be2"], params["m2"], params["v2"])
    ss, bs = _fold_bn(params["gs"], params["bes"], params["ms"], params["vs"])

    # im2col-matching weight layout: row index = (kh*3 + kw)*C + c, col = cout.
    # BN scales (and the (1-death_rate) factor) folded into the columns.
    w1_col = (jnp.transpose(w1, (2, 3, 1, 0)).reshape(9 * Cin, Cout)
              * s1[None, :])
    w2_col = (jnp.transpose(w2, (2, 3, 1, 0)).reshape(9 * Cout, Cout)
              * (s2 * live)[None, :])
    ws_col = jnp.transpose(ws[:, :, 0, 0], (1, 0)) * ss[None, :]   # (Cin, Cout)
    w_cat = jnp.concatenate([w2_col, ws_col], axis=0)              # (9*Cout+Cin, Cout)
    bias = jnp.stack([b1, b2 * live + bs], axis=0)                 # (2, Cout)

    full = lambda shape: pl.BlockSpec(shape, lambda n: (0,) * len(shape))
    out_flat = pl.pallas_call(
        _dead_block_kernel,
        out_shape=jax.ShapeDtypeStruct((N, H * W, Cout), jnp.float32),
        grid_spec=pltpu.PrefetchScalarGridSpec(
            num_scalar_prefetch=0,
            grid=(N,),
            in_specs=[
                pl.BlockSpec((None, H + 2, W + 2, Cin), lambda n: (n, 0, 0, 0)),
                full((9 * Cin, Cout)),
                full((9 * Cout + Cin, Cout)),
                full((2, Cout)),
            ],
            out_specs=pl.BlockSpec((None, H * W, Cout), lambda n: (n, 0, 0)),
            scratch_shapes=[pltpu.VMEM((H + 2, W + 2, Cout), jnp.float32)],
        ),
        compiler_params=pltpu.CompilerParams(
            dimension_semantics=("parallel",)),
    )(x_pad.astype(jnp.float32), w1_col.astype(jnp.float32),
      w_cat.astype(jnp.float32), bias.astype(jnp.float32))

    out_nhwc = out_flat.reshape(N, H, W, Cout)
    return jnp.transpose(out_nhwc, (0, 3, 1, 2))                   # back to NCHW


# ---------------- pure-JAX reference (for correctness check) ----------------
def _ref_forward(x, p, death_rate=0.25, eps=1e-5):
    def conv(x, w, pad):
        return lax.conv_general_dilated(
            x, w, window_strides=(1, 1), padding=((pad, pad), (pad, pad)),
            dimension_numbers=("NCHW", "OIHW", "NCHW"))

    def bn(x, g, b, m, v):
        g, b, m, v = (a.reshape(1, -1, 1, 1) for a in (g, b, m, v))
        return (x - m) / jnp.sqrt(v + eps) * g + b

    out = jax.nn.relu(bn(conv(x, p["w1"], 1), p["g1"], p["be1"], p["m1"], p["v1"]))
    out = bn(conv(out, p["w2"], 1), p["g2"], p["be2"], p["m2"], p["v2"])
    out = out * (1.0 - death_rate)
    sc = bn(conv(x, p["ws"], 0), p["gs"], p["bes"], p["ms"], p["vs"])
    return jax.nn.relu(out + sc)


if __name__ == "__main__":
    N, Cin, Cout, H, W = 2, 8, 16, 16, 16
    key = jax.random.PRNGKey(0)
    ks = jax.random.split(key, 16)

    params = {
        "w1": jax.random.normal(ks[0], (Cout, Cin, 3, 3), jnp.float32) * 0.1,
        "w2": jax.random.normal(ks[1], (Cout, Cout, 3, 3), jnp.float32) * 0.1,
        "ws": jax.random.normal(ks[2], (Cout, Cin, 1, 1), jnp.float32) * 0.1,
        "g1": jax.random.uniform(ks[3], (Cout,), jnp.float32, 0.5, 1.5),
        "be1": jax.random.normal(ks[4], (Cout,), jnp.float32) * 0.1,
        "m1": jax.random.normal(ks[5], (Cout,), jnp.float32) * 0.1,
        "v1": jax.random.uniform(ks[6], (Cout,), jnp.float32, 0.5, 1.5),
        "g2": jax.random.uniform(ks[7], (Cout,), jnp.float32, 0.5, 1.5),
        "be2": jax.random.normal(ks[8], (Cout,), jnp.float32) * 0.1,
        "m2": jax.random.normal(ks[9], (Cout,), jnp.float32) * 0.1,
        "v2": jax.random.uniform(ks[10], (Cout,), jnp.float32, 0.5, 1.5),
        "gs": jax.random.uniform(ks[11], (Cout,), jnp.float32, 0.5, 1.5),
        "bes": jax.random.normal(ks[12], (Cout,), jnp.float32) * 0.1,
        "ms": jax.random.normal(ks[13], (Cout,), jnp.float32) * 0.1,
        "vs": jax.random.uniform(ks[14], (Cout,), jnp.float32, 0.5, 1.5),
    }
    x = jax.random.normal(ks[15], (N, Cin, H, W), jnp.float32)

    out = jax.block_until_ready(dead_basic_block(x, params, death_rate=0.25))
    ref = jax.block_until_ready(_ref_forward(x, params, death_rate=0.25))

    assert out.shape == (N, Cout, H, W), out.shape
    assert jnp.allclose(out, ref, rtol=1e-3, atol=1e-3), float(
        jnp.max(jnp.abs(out - ref)))
    print("KERNEL_OK")
</pallas_src>

<mosaic_0001>
module attributes {stable_mosaic.version = 11 : i64} {
  func.func @_dead_block_kernel(%arg0: i32, %arg1: memref<1x18x18x8xf32, #tpu.memory_space<vmem>>, %arg2: memref<72x16xf32, #tpu.memory_space<vmem>>, %arg3: memref<152x16xf32, #tpu.memory_space<vmem>>, %arg4: memref<2x16xf32, #tpu.memory_space<vmem>>, %arg5: memref<1x256x16xf32, #tpu.memory_space<vmem>>, %arg6: memref<18x18x16xf32, #tpu.memory_space<vmem>>) attributes {dimension_semantics = [#tpu.dimension_semantics<parallel>], iteration_bounds = array<i64: 2>, scalar_prefetch = 0 : i64, scratch_operands = 1 : i64, tpu.core_type = #tpu.core_type<tc>, window_params = [{transform_indices = @transform_0, window_bounds = array<i64: 1, 18, 18, 8>}, {pipeline_mode = #tpu.pipeline_mode<synchronous>, transform_indices = @transform_1, window_bounds = array<i64: 72, 16>}, {pipeline_mode = #tpu.pipeline_mode<synchronous>, transform_indices = @transform_2, window_bounds = array<i64: 152, 16>}, {pipeline_mode = #tpu.pipeline_mode<synchronous>, transform_indices = @transform_3, window_bounds = array<i64: 2, 16>}, {transform_indices = @transform_4, window_bounds = array<i64: 1, 256, 16>}]} {
    %c0 = arith.constant 0 : index
    %c0_0 = arith.constant 0 : index
    %c0_1 = arith.constant 0 : index
    %c0_2 = arith.constant 0 : index
    %0 = vector.load %arg1[%c0, %c0_0, %c0_1, %c0_2] : memref<1x18x18x8xf32, #tpu.memory_space<vmem>>, vector<1x16x16x8xf32>
    %1 = vector.shape_cast %0 : vector<1x16x16x8xf32> to vector<16x16x8xf32>
    %2 = vector.shape_cast %1 : vector<16x16x8xf32> to vector<256x8xf32>
    %c0_3 = arith.constant 0 : index
    %c0_4 = arith.constant 0 : index
    %c1 = arith.constant 1 : index
    %c0_5 = arith.constant 0 : index
    %3 = vector.load %arg1[%c0_3, %c0_4, %c1, %c0_5] : memref<1x18x18x8xf32, #tpu.memory_space<vmem>>, vector<1x16x16x8xf32>
    %4 = vector.shape_cast %3 : vector<1x16x16x8xf32> to vector<16x16x8xf32>
    %5 = vector.shape_cast %4 : vector<16x16x8xf32> to vector<256x8xf32>
    %c0_6 = arith.constant 0 : index
    %c0_7 = arith.constant 0 : index
    %c2 = arith.constant 2 : index
    %c0_8 = arith.constant 0 : index
    %6 = vector.load %arg1[%c0_6, %c0_7, %c2, %c0_8] : memref<1x18x18x8xf32, #tpu.memory_space<vmem>>, vector<1x16x16x8xf32>
    %7 = vector.shape_cast %6 : vector<1x16x16x8xf32> to vector<16x16x8xf32>
    %8 = vector.shape_cast %7 : vector<16x16x8xf32> to vector<256x8xf32>
    %c0_9 = arith.constant 0 : index
    %c1_10 = arith.constant 1 : index
    %c0_11 = arith.constant 0 : index
    %c0_12 = arith.constant 0 : index
    %9 = vector.load %arg1[%c0_9, %c1_10, %c0_11, %c0_12] : memref<1x18x18x8xf32, #tpu.memory_space<vmem>>, vector<1x16x16x8xf32>
    %10 = vector.shape_cast %9 : vector<1x16x16x8xf32> to vector<16x16x8xf32>
    %11 = vector.shape_cast %10 : vector<16x16x8xf32> to vector<256x8xf32>
    %c0_13 = arith.constant 0 : index
    %c1_14 = arith.constant 1 : index
    %c1_15 = arith.constant 1 : index
    %c0_16 = arith.constant 0 : index
    %12 = vector.load %arg1[%c0_13, %c1_14, %c1_15, %c0_16] : memref<1x18x18x8xf32, #tpu.memory_space<vmem>>, vector<1x16x16x8xf32>
    %13 = vector.shape_cast %12 : vector<1x16x16x8xf32> to vector<16x16x8xf32>
    %14 = vector.shape_cast %13 : vector<16x16x8xf32> to vector<256x8xf32>
    %c0_17 = arith.constant 0 : index
    %c1_18 = arith.constant 1 : index
    %c2_19 = arith.constant 2 : index
    %c0_20 = arith.constant 0 : index
    %15 = vector.load %arg1[%c0_17, %c1_18, %c2_19, %c0_20] : memref<1x18x18x8xf32, #tpu.memory_space<vmem>>, vector<1x16x16x8xf32>
    %16 = vector.shape_cast %15 : vector<1x16x16x8xf32> to vector<16x16x8xf32>
    %17 = vector.shape_cast %16 : vector<16x16x8xf32> to vector<256x8xf32>
    %c0_21 = arith.constant 0 : index
    %c2_22 = arith.constant 2 : index
    %c0_23 = arith.constant 0 : index
    %c0_24 = arith.constant 0 : index
    %18 = vector.load %arg1[%c0_21, %c2_22, %c0_23, %c0_24] : memref<1x18x18x8xf32, #tpu.memory_space<vmem>>, vector<1x16x16x8xf32>
    %19 = vector.shape_cast %18 : vector<1x16x16x8xf32> to vector<16x16x8xf32>
    %20 = vector.shape_cast %19 : vector<16x16x8xf32> to vector<256x8xf32>
    %c0_25 = arith.constant 0 : index
    %c2_26 = arith.constant 2 : index
    %c1_27 = arith.constant 1 : index
    %c0_28 = arith.constant 0 : index
    %21 = vector.load %arg1[%c0_25, %c2_26, %c1_27, %c0_28] : memref<1x18x18x8xf32, #tpu.memory_space<vmem>>, vector<1x16x16x8xf32>
    %22 = vector.shape_cast %21 : vector<1x16x16x8xf32> to vector<16x16x8xf32>
    %23 = vector.shape_cast %22 : vector<16x16x8xf32> to vector<256x8xf32>
    %c0_29 = arith.constant 0 : index
    %c2_30 = arith.constant 2 : index
    %c2_31 = arith.constant 2 : index
    %c0_32 = arith.constant 0 : index
    %24 = vector.load %arg1[%c0_29, %c2_30, %c2_31, %c0_32] : memref<1x18x18x8xf32, #tpu.memory_space<vmem>>, vector<1x16x16x8xf32>
    %25 = vector.shape_cast %24 : vector<1x16x16x8xf32> to vector<16x16x8xf32>
    %26 = vector.shape_cast %25 : vector<16x16x8xf32> to vector<256x8xf32>
    %27 = tpu.concatenate %2, %5, %8, %11, %14, %17, %20, %23, %26 in 1 : vector<256x8xf32>, vector<256x8xf32>, vector<256x8xf32>, vector<256x8xf32>, vector<256x8xf32>, vector<256x8xf32>, vector<256x8xf32>, vector<256x8xf32>, vector<256x8xf32> -> vector<256x72xf32>
    %c0_33 = arith.constant 0 : index
    %c0_34 = arith.constant 0 : index
    %28 = vector.load %arg2[%c0_33, %c0_34] : memref<72x16xf32, #tpu.memory_space<vmem>>, vector<72x16xf32>
    %cst = arith.constant dense<0.000000e+00> : vector<256x16xf32>
    %29 = tpu.matmul %27, %28, %cst {dimension_numbers = #tpu.dot_dimension_numbers<[1], [0], [0], [1], [0, 0, 1, 1], [], []>} : vector<256x72xf32>, vector<72x16xf32>, vector<256x16xf32> -> vector<256x16xf32>
    %c0_35 = arith.constant 0 : index
    %c0_36 = arith.constant 0 : index
    %30 = vector.load %arg4[%c0_35, %c0_36] : memref<2x16xf32, #tpu.memory_space<vmem>>, vector<1x16xf32>
    %31 = vector.broadcast %30 : vector<1x16xf32> to vector<256x16xf32>
    %32 = arith.addf %29, %31 : vector<256x16xf32>
    %cst_37 = arith.constant 0.000000e+00 : f32
    %33 = vector.broadcast %cst_37 : f32 to vector<256x16xf32>
    %34 = arith.maximumf %32, %33 : vector<256x16xf32>
    %cst_38 = arith.constant 0.000000e+00 : f32
    %35 = vector.broadcast %cst_38 : f32 to vector<18x18x16xf32>
    %c0_39 = arith.constant 0 : index
    %c0_40 = arith.constant 0 : index
    %c0_41 = arith.constant 0 : index
    %36 = vector.load %arg6[%c0_39, %c0_40, %c0_41] : memref<18x18x16xf32, #tpu.memory_space<vmem>>, vector<18x18x16xf32>
    tpu.vector_store %arg6[%c0_39, %c0_40, %c0_41], %35 {strides = array<i32>} : memref<18x18x16xf32, #tpu.memory_space<vmem>>, vector<18x18x16xf32>,
    %37 = vector.shape_cast %34 : vector<256x16xf32> to vector<16x16x16xf32>
    %c1_42 = arith.constant 1 : index
    %c1_43 = arith.constant 1 : index
    %c0_44 = arith.constant 0 : index
    %38 = vector.load %arg6[%c1_42, %c1_43, %c0_44] : memref<18x18x16xf32, #tpu.memory_space<vmem>>, vector<16x16x16xf32>
    tpu.vector_store %arg6[%c1_42, %c1_43, %c0_44], %37 {strides = array<i32>} : memref<18x18x16xf32, #tpu.memory_space<vmem>>, vector<16x16x16xf32>,
    %c0_45 = arith.constant 0 : index
    %c0_46 = arith.constant 0 : index
    %c0_47 = arith.constant 0 : index
    %39 = vector.load %arg6[%c0_45, %c0_46, %c0_47] : memref<18x18x16xf32, #tpu.memory_space<vmem>>, vector<16x16x16xf32>
    %40 = vector.shape_cast %39 : vector<16x16x16xf32> to vector<256x16xf32>
    %c0_48 = arith.constant 0 : index
    %c1_49 = arith.constant 1 : index
    %c0_50 = arith.constant 0 : index
    %41 = vector.load %arg6[%c0_48, %c1_49, %c0_50] : memref<18x18x16xf32, #tpu.memory_space<vmem>>, vector<16x16x16xf32>
    %42 = vector.shape_cast %41 : vector<16x16x16xf32> to vector<256x16xf32>
    %c0_51 = arith.constant 0 : index
    %c2_52 = arith.constant 2 : index
    %c0_53 = arith.constant 0 : index
    %43 = vector.load %arg6[%c0_51, %c2_52, %c0_53] : memref<18x18x16xf32, #tpu.memory_space<vmem>>, vector<16x16x16xf32>
    %44 = vector.shape_cast %43 : vector<16x16x16xf32> to vector<256x16xf32>
    %c1_54 = arith.constant 1 : index
    %c0_55 = arith.constant 0 : index
    %c0_56 = arith.constant 0 : index
    %45 = vector.load %arg6[%c1_54, %c0_55, %c0_56] : memref<18x18x16xf32, #tpu.memory_space<vmem>>, vector<16x16x16xf32>
    %46 = vector.shape_cast %45 : vector<16x16x16xf32> to vector<256x16xf32>
    %c1_57 = arith.constant 1 : index
    %c1_58 = arith.constant 1 : index
    %c0_59 = arith.constant 0 : index
    %47 = vector.load %arg6[%c1_57, %c1_58, %c0_59] : memref<18x18x16xf32, #tpu.memory_space<vmem>>, vector<16x16x16xf32>
    %48 = vector.shape_cast %47 : vector<16x16x16xf32> to vector<256x16xf32>
    %c1_60 = arith.constant 1 : index
    %c2_61 = arith.constant 2 : index
    %c0_62 = arith.constant 0 : index
    %49 = vector.load %arg6[%c1_60, %c2_61, %c0_62] : memref<18x18x16xf32, #tpu.memory_space<vmem>>, vector<16x16x16xf32>
    %50 = vector.shape_cast %49 : vector<16x16x16xf32> to vector<256x16xf32>
    %c2_63 = arith.constant 2 : index
    %c0_64 = arith.constant 0 : index
    %c0_65 = arith.constant 0 : index
    %51 = vector.load %arg6[%c2_63, %c0_64, %c0_65] : memref<18x18x16xf32, #tpu.memory_space<vmem>>, vector<16x16x16xf32>
    %52 = vector.shape_cast %51 : vector<16x16x16xf32> to vector<256x16xf32>
    %c2_66 = arith.constant 2 : index
    %c1_67 = arith.constant 1 : index
    %c0_68 = arith.constant 0 : index
    %53 = vector.load %arg6[%c2_66, %c1_67, %c0_68] : memref<18x18x16xf32, #tpu.memory_space<vmem>>, vector<16x16x16xf32>
    %54 = vector.shape_cast %53 : vector<16x16x16xf32> to vector<256x16xf32>
    %c2_69 = arith.constant 2 : index
    %c2_70 = arith.constant 2 : index
    %c0_71 = arith.constant 0 : index
    %55 = vector.load %arg6[%c2_69, %c2_70, %c0_71] : memref<18x18x16xf32, #tpu.memory_space<vmem>>, vector<16x16x16xf32>
    %56 = vector.shape_cast %55 : vector<16x16x16xf32> to vector<256x16xf32>
    %c0_72 = arith.constant 0 : index
    %c1_73 = arith.constant 1 : index
    %c1_74 = arith.constant 1 : index
    %c0_75 = arith.constant 0 : index
    %57 = vector.load %arg1[%c0_72, %c1_73, %c1_74, %c0_75] : memref<1x18x18x8xf32, #tpu.memory_space<vmem>>, vector<1x16x16x8xf32>
    %58 = vector.shape_cast %57 : vector<1x16x16x8xf32> to vector<16x16x8xf32>
    %59 = vector.shape_cast %58 : vector<16x16x8xf32> to vector<256x8xf32>
    %60 = tpu.concatenate %40, %42, %44, %46, %48, %50, %52, %54, %56, %59 in 1 : vector<256x16xf32>, vector<256x16xf32>, vector<256x16xf32>, vector<256x16xf32>, vector<256x16xf32>, vector<256x16xf32>, vector<256x16xf32>, vector<256x16xf32>, vector<256x16xf32>, vector<256x8xf32> -> vector<256x152xf32>
    %c0_76 = arith.constant 0 : index
    %c0_77 = arith.constant 0 : index
    %61 = vector.load %arg3[%c0_76, %c0_77] : memref<152x16xf32, #tpu.memory_space<vmem>>, vector<152x16xf32>
    %cst_78 = arith.constant dense<0.000000e+00> : vector<256x16xf32>
    %62 = tpu.matmul %60, %61, %cst_78 {dimension_numbers = #tpu.dot_dimension_numbers<[1], [0], [0], [1], [0, 0, 1, 1], [], []>} : vector<256x152xf32>, vector<152x16xf32>, vector<256x16xf32> -> vector<256x16xf32>
    %c1_79 = arith.constant 1 : index
    %c0_80 = arith.constant 0 : index
    %63 = vector.load %arg4[%c1_79, %c0_80] : memref<2x16xf32, #tpu.memory_space<vmem>>, vector<1x16xf32>
    %64 = vector.broadcast %63 : vector<1x16xf32> to vector<256x16xf32>
    %65 = arith.addf %62, %64 : vector<256x16xf32>
    %cst_81 = arith.constant 0.000000e+00 : f32
    %66 = vector.broadcast %cst_81 : f32 to vector<256x16xf32>
    %67 = arith.maximumf %65, %66 : vector<256x16xf32>
    %c0_82 = arith.constant 0 : index
    %c0_83 = arith.constant 0 : index
    %c0_84 = arith.constant 0 : index
    %68 = vector.load %arg5[%c0_82, %c0_83, %c0_84] : memref<1x256x16xf32, #tpu.memory_space<vmem>>, vector<1x256x16xf32>
    %69 = vector.shape_cast %68 : vector<1x256x16xf32> to vector<256x16xf32>
    %70 = vector.shape_cast %67 : vector<256x16xf32> to vector<1x256x16xf32>
    tpu.vector_store %arg5[%c0_82, %c0_83, %c0_84], %70 {strides = array<i32>} : memref<1x256x16xf32, #tpu.memory_space<vmem>>, vector<1x256x16xf32>,
    return
  }
  func.func @transform_0(%arg0: i32) -> (i32, i32, i32, i32) {
    %c0_i32 = arith.constant 0 : i32
    %c0_i32_0 = arith.constant 0 : i32
    %c0_i32_1 = arith.constant 0 : i32
    %c0_i32_2 = arith.constant 0 : i32
    return %arg0, %c0_i32, %c0_i32_0, %c0_i32_1 : i32, i32, i32, i32
  }
  func.func @transform_1(%arg0: i32) -> (i32, i32) {
    %c0_i32 = arith.constant 0 : i32
    %c0_i32_0 = arith.constant 0 : i32
    %c0_i32_1 = arith.constant 0 : i32
    return %c0_i32, %c0_i32_0 : i32, i32
  }
  func.func @transform_2(%arg0: i32) -> (i32, i32) {
    %c0_i32 = arith.constant 0 : i32
    %c0_i32_0 = arith.constant 0 : i32
    %c0_i32_1 = arith.constant 0 : i32
    return %c0_i32, %c0_i32_0 : i32, i32
  }
  func.func @transform_3(%arg0: i32) -> (i32, i32) {
    %c0_i32 = arith.constant 0 : i32
    %c0_i32_0 = arith.constant 0 : i32
    %c0_i32_1 = arith.constant 0 : i32
    return %c0_i32, %c0_i32_0 : i32, i32
  }
  func.func @transform_4(%arg0: i32) -> (i32, i32, i32) {
    %c0_i32 = arith.constant 0 : i32
    %c0_i32_0 = arith.constant 0 : i32
    %c0_i32_1 = arith.constant 0 : i32
    return %arg0, %c0_i32, %c0_i32_0 : i32, i32, i32
  }
}

</mosaic_0001>

<bundles_post_ra>
// kernel: tpu_custom_call.1
= control target key start
LH: loop header
LB: loop body
LE: loop exit
PB: predicated region body
PF: predicated region fallthrough
CT: control target
= control target key end

     0   :  { %s5430_s15 = smov 0   ;;  %s8395_s0 = inlined_call_operand.vmem [shape: f32[2,18,18,8], index: 0, kind: input, shape index: {}]   ;;  %s8396_s1 = inlined_call_operand.vmem [shape: f32[72,16], index: 1, kind: input, shape index: {}]   ;;  %s8397_s2 = inlined_call_operand.vmem [shape: f32[152,16], index: 2, kind: input, shape index: {}]   ;;  %s8398_s3 = inlined_call_operand.vmem [shape: f32[2,16], index: 3, kind: input, shape index: {}]   ;;  %s8399_s4 = inlined_call_operand.vmem [shape: f32[2,256,16], index: 4, kind: output, shape index: {}]  }
   0x1 LB: > { %s4300_s16 = sadd.s32 4294967295, %s5390_s15   ;;  %p4304_p0 = scmp.ge.s32.totalorder %s5390_s15, 1  ;;  %s5390_s15 = sphi %s5430_s15, %s14_s15  }
   0x2   : > { %p162_p1 = scmp.lt.s32.totalorder %s5390_s15, 3 }
   0x4   : > { %p163_p2 = pnand %p4304_p0, %p162_p1 }
   0x6   : > { %166 = sbr.rel (%p163_p2) target bundleno = 1451 (0x5ab), region = 36 }
   0xd   : > { %p188_p3 = scmp.lt.s32.totalorder %s4300_s16, 1  ;;  %s5392_s21 = smov 8   ;;  %vm1512_vm0 = vcmask 64512   ;;  %vm1545_vm1 = vcmask 130048   ;;  %vm1578_vm2 = vcmask 195584   ;;  %vm1611_vm3 = vcmask 261120  }
   0xe   : > { %s5393_s22 = smov 16   ;;  %s5394_s23 = smov 24   ;;  %vm1644_vm4 = vcmask 326656   ;;  %vm1677_vm5 = vcmask 392192   ;;  %vm1710_vm6 = vcmask 457728   ;;  %vm1743_vm7 = vcmask 523264  }
   0xf   : > { %s8717_s16 = smov (!%p188_p3, %s4300_s16), 1  ;;  %s5395_s24 = smov 32   ;;  %vm1790_vm8 = vcmask 588800   ;;  %vm2146_vm9 = vcmask 123904   ;;  %vm3705_vm10 = vcmask 654336   ;;  %vm3738_vm11 = vcmask 785408  }
  0x10   : > { %s4771_s17 = smul.u32 432, %s8717_s16  ;;  %s5396_s25 = smov 40   ;;  %vm3771_vm12 = vcmask 916480  }
  0x11   : > { %s5397_s26 = smov 48   ;;  %s5403_s29 = smov 112  }
  0x12   : > { %s5444_s20 = scalar_lea.vmem %s8395_s0, %s4771_s17  ;;  %s5404_s30 = smov 80  }
  0x13   : > { %v5447_v0 = vld [vmem:[%s5444_s20 + $0x19] sm:$0xff]  ;;  %v230_v1 = vld [vmem:[%s5444_s20 + $0x1] sm:$0xff]  ;;  %v231_v3 = vld [vmem:[%s5444_s20 + $0x9] sm:$0xff] }
  0x14   : > { %524 = vrot.lane.b32.xlu1 %v5447_v0, %s5392_s21  ;;  %520 = vrot.lane.b32.xlu0 %v230_v1, %s5392_s21  ;;  %v5454_v2 = vld [vmem:[%s5444_s20 + $0x21] sm:$0xff]  ;;  %v5461_v4 = vld [vmem:[%s5444_s20 + $0x39] sm:$0xff] }
  0x15   : > { %v5464_v5 = vld [vmem:[%s5444_s20 + $0x31] sm:$0xff]  ;;  %v5474_v7 = vld [vmem:[%s5444_s20 + $0x49] sm:$0xff]  ;;  %v5484_v9 = vld [vmem:[%s5444_s20 + $0x61] sm:$0xff] }
  0x16   : > { %v5471_v6 = vld [vmem:[%s5444_s20 + $0x51] sm:$0xff]  ;;  %v5481_v8 = vld [vmem:[%s5444_s20 + $0x69] sm:$0xff]  ;;  %v5491_v10 = vld [vmem:[%s5444_s20 + $0x81] sm:$0xff] }
  0x17   : > { %v5494_v11 = vld [vmem:[%s5444_s20 + $0x79] sm:$0xff]  ;;  %v5504_v13 = vld [vmem:[%s5444_s20 + $0x91] sm:$0xff]  ;;  %v5514_v15 = vld [vmem:[%s5444_s20 + $0xa9] sm:$0xff] }
  0x18   : > { %526 = vrot.lane.b32.xlu1 %v5454_v2, %s5392_s21  ;;  %522 = vrot.lane.b32.xlu0 %v231_v3, %s5392_s21  ;;  %v5501_v12 = vld [vmem:[%s5444_s20 + $0x99] sm:$0xff]  ;;  %v5511_v14 = vld [vmem:[%s5444_s20 + $0xb1] sm:$0xff] }
  0x19   : > { %v5521_v16 = vld [vmem:[%s5444_s20 + $0xc9] sm:$0xff]  ;;  %v5524_v17 = vld [vmem:[%s5444_s20 + $0xc1] sm:$0xff]  ;;  %v5534_v19 = vld [vmem:[%s5444_s20 + $0xd9] sm:$0xff] }
  0x1a   : > { %v5531_v18 = vld [vmem:[%s5444_s20 + $0xe1] sm:$0xff]  ;;  %v5541_v20 = vld [vmem:[%s5444_s20 + $0xf9] sm:$0xff]  ;;  %v5544_v21 = vld [vmem:[%s5444_s20 + $0xf1] sm:$0xff] }
  0x1b   : > { %v5551_v22 = vld [vmem:[%s5444_s20 + $0x111] sm:$0xff]  ;;  %v5554_v23 = vld [vmem:[%s5444_s20 + $0x109] sm:$0xff]  ;;  %v5564_v25 = vld [vmem:[%s5444_s20 + $0x121] sm:$0xff] }
  0x1c   : > { %530 = vrot.lane.b32.xlu1 %v5461_v4, %s5392_s21  ;;  %528 = vrot.lane.b32.xlu0 %v5464_v5, %s5392_s21  ;;  %v5561_v24 = vld [vmem:[%s5444_s20 + $0x129] sm:$0xff]  ;;  %v5571_v26 = vld [vmem:[%s5444_s20 + $0x141] sm:$0xff] }
  0x1d   : > { %v5574_v27 = vld [vmem:[%s5444_s20 + $0x139] sm:$0xff]  ;;  %v5584_v29 = vld [vmem:[%s5444_s20 + $0x151] sm:$0xff]  ;;  %v5594_v31 = vld [vmem:[%s5444_s20 + $0x169] sm:$0xff] }
  0x1e   : > { %v5581_v28 = vld [vmem:[%s5444_s20 + $0x159] sm:$0xff]  ;;  %v5591_v30 = vld [vmem:[%s5444_s20 + $0x171] sm:$0xff]  ;;  %v262_v33 = vld [vmem:[%s5444_s20 + $0x2] sm:$0xff] }
  0x1f   : > { %v263_v32 = vld [vmem:[%s5444_s20 + $0xa] sm:$0xff]  ;;  %v5605_v34 = vld [vmem:[%s5444_s20 + $0x22] sm:$0xff]  ;;  %v5608_v35 = vld [vmem:[%s5444_s20 + $0x1a] sm:$0xff] }
  0x20   : > { %534 = vrot.lane.b32.xlu1 %v5471_v6, %s5392_s21  ;;  %532 = vrot.lane.b32.xlu0 %v5474_v7, %s5392_s21  ;;  %v5615_v36 = vld [vmem:[%s5444_s20 + $0x3a] sm:$0xff]  ;;  %v5618_v37 = vld [vmem:[%s5444_s20 + $0x32] sm:$0xff] }
  0x21   : > { %v5625_v38 = vld [vmem:[%s5444_s20 + $0x52] sm:$0xff]  ;;  %v5628_v39 = vld [vmem:[%s5444_s20 + $0x4a] sm:$0xff]  ;;  %v5638_v41 = vld [vmem:[%s5444_s20 + $0x62] sm:$0xff] }
  0x22   : > { %v5635_v40 = vld [vmem:[%s5444_s20 + $0x6a] sm:$0xff]  ;;  %v5645_v42 = vld [vmem:[%s5444_s20 + $0x82] sm:$0xff]  ;;  %v5648_v43 = vld [vmem:[%s5444_s20 + $0x7a] sm:$0xff] }
  0x23   : > { %v5655_v44 = vld [vmem:[%s5444_s20 + $0x9a] sm:$0xff]  ;;  %v5658_v45 = vld [vmem:[%s5444_s20 + $0x92] sm:$0xff]  ;;  %v5668_v47 = vld [vmem:[%s5444_s20 + $0xaa] sm:$0xff] }
  0x24   : > { %538 = vrot.lane.b32.xlu1 %v5481_v8, %s5392_s21  ;;  %536 = vrot.lane.b32.xlu0 %v5484_v9, %s5392_s21  ;;  %v5665_v46 = vld [vmem:[%s5444_s20 + $0xb2] sm:$0xff]  ;;  %v5675_v48 = vld [vmem:[%s5444_s20 + $0xca] sm:$0xff] }
  0x25   : > { %v5678_v49 = vld [vmem:[%s5444_s20 + $0xc2] sm:$0xff]  ;;  %v5688_v51 = vld [vmem:[%s5444_s20 + $0xda] sm:$0xff]  ;;  %v5698_v53 = vld [vmem:[%s5444_s20 + $0xf2] sm:$0xff] }
  0x26   : > { %v5685_v50 = vld [vmem:[%s5444_s20 + $0xe2] sm:$0xff]  ;;  %v5695_v52 = vld [vmem:[%s5444_s20 + $0xfa] sm:$0xff]  ;;  %8447 = vst [vmem:[#allocation4_spill] sm:$0xff] %v5698_v53  ;;  %v5705_v54 = vld [vmem:[%s5444_s20 + $0x112] sm:$0xff] }
  0x27   : > { %8446 = vst [vmem:[#allocation3_spill] sm:$0xff] %v5695_v52  ;;  %8448 = vst [vmem:[#allocation5_spill] sm:$0xff] %v5705_v54  ;;  %v5708_v55 = vld [vmem:[%s5444_s20 + $0x10a] sm:$0xff]  ;;  %v5718_v57 = vld [vmem:[%s5444_s20 + $0x122] sm:$0xff] }
  0x28   : > { %542 = vrot.lane.b32.xlu1 %v5491_v10, %s5392_s21  ;;  %540 = vrot.lane.b32.xlu0 %v5494_v11, %s5392_s21  ;;  %8449 = vst [vmem:[#allocation6_spill] sm:$0xff] %v5708_v55  ;;  %v5715_v56 = vld [vmem:[%s5444_s20 + $0x12a] sm:$0xff]  ;;  %8451 = vst [vmem:[#allocation8_spill] sm:$0xff] %v5718_v57  ;;  %v5725_v58 = vld [vmem:[%s5444_s20 + $0x142] sm:$0xff] }
  0x29   : > { %8450 = vst [vmem:[#allocation7_spill] sm:$0xff] %v5715_v56  ;;  %8452 = vst [vmem:[#allocation9_spill] sm:$0xff] %v5725_v58  ;;  %v5728_v59 = vld [vmem:[%s5444_s20 + $0x13a] sm:$0xff]  ;;  %v5742_v63 = vld [vmem:[%s5444_s20 + $0x152] sm:$0xff] }
  0x2a   : > { %8453 = vst [vmem:[#allocation10_spill] sm:$0xff] %v5728_v59  ;;  %v5739_v62 = vld [vmem:[%s5444_s20 + $0x15a] sm:$0xff]  ;;  %8457 = vst [vmem:[#allocation14_spill] sm:$0xff] %v5742_v63 }
  0x2b   : > { %8456 = vst [vmem:[#allocation13_spill] sm:$0xff] %v5739_v62 }
  0x2c   : > { %546 = vrot.lane.b32.xlu1 %v5501_v12, %s5392_s21  ;;  %544 = vrot.lane.b32.xlu0 %v5504_v13, %s5392_s21 }
  0x30   : > { %550 = vrot.lane.b32.xlu1 %v5511_v14, %s5392_s21  ;;  %548 = vrot.lane.b32.xlu0 %v5514_v15, %s5392_s21 }
  0x34   : > { %554 = vrot.lane.b32.xlu1 %v5521_v16, %s5392_s21  ;;  %552 = vrot.lane.b32.xlu0 %v5524_v17, %s5392_s21 }
  0x38   : > { %558 = vrot.lane.b32.xlu1 %v5531_v18, %s5392_s21  ;;  %556 = vrot.lane.b32.xlu0 %v5534_v19, %s5392_s21 }
  0x3c   : > { %562 = vrot.lane.b32.xlu1 %v5541_v20, %s5392_s21  ;;  %560 = vrot.lane.b32.xlu0 %v5544_v21, %s5392_s21 }
  0x40   : > { %566 = vrot.lane.b32.xlu1 %v5551_v22, %s5392_s21  ;;  %564 = vrot.lane.b32.xlu0 %v5554_v23, %s5392_s21 }
  0x44   : > { %570 = vrot.lane.b32.xlu1 %v5561_v24, %s5392_s21  ;;  %568 = vrot.lane.b32.xlu0 %v5564_v25, %s5392_s21 }
  0x48   : > { %574 = vrot.lane.b32.xlu1 %v5571_v26, %s5392_s21  ;;  %572 = vrot.lane.b32.xlu0 %v5574_v27, %s5392_s21 }
  0x4c   : > { %578 = vrot.lane.b32.xlu1 %v5581_v28, %s5392_s21  ;;  %576 = vrot.lane.b32.xlu0 %v5584_v29, %s5392_s21 }
  0x50   : > { %582 = vrot.lane.b32.xlu1 %v5591_v30, %s5392_s21  ;;  %580 = vrot.lane.b32.xlu0 %v5594_v31, %s5392_s21 }
  0x54   : > { %650 = vrot.lane.b32.xlu1 %v263_v32, %s5393_s22  ;;  %648 = vrot.lane.b32.xlu0 %v262_v33, %s5393_s22  ;;  %v5753_v32 = vld [vmem:[%s5444_s20 + $0x172] sm:$0xff]  ;;  %v5756_v33 = vld [vmem:[%s5444_s20 + $0x16a] sm:$0xff] }
  0x55   : > { %8460 = vst [vmem:[#allocation17_spill] sm:$0xff] %v5753_v32  ;;  %8461 = vst [vmem:[#allocation18_spill] sm:$0xff] %v5756_v33 }
  0x58   : > { %654 = vrot.lane.b32.xlu1 %v5605_v34, %s5393_s22  ;;  %652 = vrot.lane.b32.xlu0 %v5608_v35, %s5393_s22 }
  0x5c   : > { %658 = vrot.lane.b32.xlu1 %v5615_v36, %s5393_s22  ;;  %656 = vrot.lane.b32.xlu0 %v5618_v37, %s5393_s22 }
  0x60   : > { %662 = vrot.lane.b32.xlu1 %v5625_v38, %s5393_s22  ;;  %660 = vrot.lane.b32.xlu0 %v5628_v39, %s5393_s22 }
  0x64   : > { %666 = vrot.lane.b32.xlu1 %v5635_v40, %s5393_s22  ;;  %664 = vrot.lane.b32.xlu0 %v5638_v41, %s5393_s22 }
  0x68   : > { %670 = vrot.lane.b32.xlu1 %v5645_v42, %s5393_s22  ;;  %668 = vrot.lane.b32.xlu0 %v5648_v43, %s5393_s22 }
  0x6c   : > { %674 = vrot.lane.b32.xlu1 %v5655_v44, %s5393_s22  ;;  %672 = vrot.lane.b32.xlu0 %v5658_v45, %s5393_s22 }
  0x70   : > { %678 = vrot.lane.b32.xlu1 %v5665_v46, %s5393_s22  ;;  %676 = vrot.lane.b32.xlu0 %v5668_v47, %s5393_s22 }
  0x74   : > { %682 = vrot.lane.b32.xlu1 %v5675_v48, %s5393_s22  ;;  %680 = vrot.lane.b32.xlu0 %v5678_v49, %s5393_s22 }
  0x78   : > { %686 = vrot.lane.b32.xlu1 %v5685_v50, %s5393_s22  ;;  %684 = vrot.lane.b32.xlu0 %v5688_v51, %s5393_s22 }
  0x7c   : > { %690 = vrot.lane.b32.xlu1 %v5695_v52, %s5393_s22  ;;  %688 = vrot.lane.b32.xlu0 %v5698_v53, %s5393_s22 }
  0x80   : > { %694 = vrot.lane.b32.xlu1 %v5705_v54, %s5393_s22  ;;  %692 = vrot.lane.b32.xlu0 %v5708_v55, %s5393_s22  ;;  %v5895_v54 = vld [vmem:[%s5444_s20 + $0xf0] sm:$0xff] }
  0x81   : > { %8498 = vst [vmem:[#allocation55_spill] sm:$0xff] %v5895_v54 }
  0x84   : > { %698 = vrot.lane.b32.xlu1 %v5715_v56, %s5393_s22  ;;  %696 = vrot.lane.b32.xlu0 %v5718_v57, %s5393_s22  ;;  %v5880_v57 = vld [vmem:[%s5444_s20 + $0xd8] sm:$0xff] }
  0x85   : > { %8495 = vst [vmem:[#allocation52_spill] sm:$0xff] %v5880_v57 }
  0x86   : > { %v5730_v60 = vpop.permute.xlu1 %524  ;;  %v5732_v61 = vpop.permute.xlu0 %520 }
  0x87   : > { %8454 = vst [vmem:[#allocation11_spill] sm:$0xff] %v5730_v60  ;;  %8455 = vst [vmem:[#allocation12_spill] sm:$0xff] %v5732_v61 }
  0x88   : > { %702 = vrot.lane.b32.xlu1 %v5725_v58, %s5393_s22  ;;  %700 = vrot.lane.b32.xlu0 %v5728_v59, %s5393_s22  ;;  %v5877_v58 = vld [vmem:[%s5444_s20 + $0xe0] sm:$0xff] }
  0x89   : > { %8494 = vst [vmem:[#allocation51_spill] sm:$0xff] %v5877_v58 }
  0x8a   : > { %v5744_v1 = vpop.permute.xlu1 %526  ;;  %v5746_v3 = vpop.permute.xlu0 %522 }
  0x8b   : > { %8458 = vst [vmem:[#allocation15_spill] sm:$0xff] %v5744_v1  ;;  %8459 = vst [vmem:[#allocation16_spill] sm:$0xff] %v5746_v3 }
  0x8c   : > { %706 = vrot.lane.b32.xlu1 %v5739_v62, %s5393_s22  ;;  %704 = vrot.lane.b32.xlu0 %v5742_v63, %s5393_s22  ;;  %v200_v63 = vld [vmem:[%s5444_s20 + $0x18] sm:$0xff]  ;;  %v201_v62 = vld [vmem:[%s5444_s20 + $0x20] sm:$0xff] }
  0x8e   : > { %v5758_v60 = vpop.permute.xlu1 %530  ;;  %v5760_v61 = vpop.permute.xlu0 %528 }
  0x8f   : > { %8462 = vst [vmem:[#allocation19_spill] sm:$0xff] %v5758_v60  ;;  %8463 = vst [vmem:[#allocation20_spill] sm:$0xff] %v5760_v61 }
  0x90   : > { %710 = vrot.lane.b32.xlu1 %v5753_v32, %s5393_s22  ;;  %708 = vrot.lane.b32.xlu0 %v5756_v33, %s5393_s22  ;;  %v5779_v33 = vld [vmem:[%s5444_s20 + $0x38] sm:$0xff]  ;;  %v5782_v32 = vld [vmem:[%s5444_s20 + $0x30] sm:$0xff] }
  0x91   : > { %8468 = vst [vmem:[#allocation25_spill] sm:$0xff] %v5779_v33  ;;  %8469 = vst [vmem:[#allocation26_spill] sm:$0xff] %v5782_v32 }
  0x92   : > { %v5766_v1 = vpop.permute.xlu1 %534  ;;  %v5768_v3 = vpop.permute.xlu0 %532 }
  0x93   : > { %8464 = vst [vmem:[#allocation21_spill] sm:$0xff] %v5766_v1  ;;  %8465 = vst [vmem:[#allocation22_spill] sm:$0xff] %v5768_v3  ;;  %v5793_v1 = vld [vmem:[%s5444_s20 + $0x50] sm:$0xff] }
  0x94   : > { %778 = vrot.lane.b32.xlu1 %v201_v62, %s5394_s23  ;;  %776 = vrot.lane.b32.xlu0 %v200_v63, %s5394_s23  ;;  %8472 = vst [vmem:[#allocation29_spill] sm:$0xff] %v5793_v1 }
  0x96   : > { %v5774_v60 = vpop.permute.xlu1 %538  ;;  %v5776_v61 = vpop.permute.xlu0 %536 }
  0x97   : > { %8466 = vst [vmem:[#allocation23_spill] sm:$0xff] %v5774_v60  ;;  %8467 = vst [vmem:[#allocation24_spill] sm:$0xff] %v5776_v61  ;;  %v5796_v60 = vld [vmem:[%s5444_s20 + $0x48] sm:$0xff] }
  0x98   : > { %782 = vrot.lane.b32.xlu1 %v5779_v33, %s5394_s23  ;;  %780 = vrot.lane.b32.xlu0 %v5782_v32, %s5394_s23  ;;  %8473 = vst [vmem:[#allocation30_spill] sm:$0xff] %v5796_v60  ;;  %v5807_v32 = vld [vmem:[%s5444_s20 + $0x68] sm:$0xff] }
  0x99   : > { %8476 = vst [vmem:[#allocation33_spill] sm:$0xff] %v5807_v32 }
  0x9a   : > { %v5788_v62 = vpop.permute.xlu1 %542  ;;  %v5790_v63 = vpop.permute.xlu0 %540 }
  0x9b   : > { %8470 = vst [vmem:[#allocation27_spill] sm:$0xff] %v5788_v62  ;;  %8471 = vst [vmem:[#allocation28_spill] sm:$0xff] %v5790_v63  ;;  %v5810_v62 = vld [vmem:[%s5444_s20 + $0x60] sm:$0xff] }
  0x9c   : > { %786 = vrot.lane.b32.xlu1 %v5793_v1, %s5394_s23  ;;  %784 = vrot.lane.b32.xlu0 %v5796_v60, %s5394_s23  ;;  %8477 = vst [vmem:[#allocation34_spill] sm:$0xff] %v5810_v62  ;;  %v5821_v1 = vld [vmem:[%s5444_s20 + $0x80] sm:$0xff] }
  0x9d   : > { %8480 = vst [vmem:[#allocation37_spill] sm:$0xff] %v5821_v1 }
  0x9e   : > { %v5802_v61 = vpop.permute.xlu1 %546  ;;  %v5804_v3 = vpop.permute.xlu0 %544 }
  0x9f   : > { %8474 = vst [vmem:[#allocation31_spill] sm:$0xff] %v5802_v61  ;;  %8475 = vst [vmem:[#allocation32_spill] sm:$0xff] %v5804_v3  ;;  %v5824_v61 = vld [vmem:[%s5444_s20 + $0x78] sm:$0xff] }
  0xa0   : > { %790 = vrot.lane.b32.xlu1 %v5807_v32, %s5394_s23  ;;  %788 = vrot.lane.b32.xlu0 %v5810_v62, %s5394_s23  ;;  %8481 = vst [vmem:[#allocation38_spill] sm:$0xff] %v5824_v61 }
  0xa2   : > { %v5816_v63 = vpop.permute.xlu1 %550  ;;  %v5818_v60 = vpop.permute.xlu0 %548 }
  0xa3   : > { %8478 = vst [vmem:[#allocation35_spill] sm:$0xff] %v5816_v63  ;;  %8479 = vst [vmem:[#allocation36_spill] sm:$0xff] %v5818_v60  ;;  %v5835_v63 = vld [vmem:[%s5444_s20 + $0x98] sm:$0xff]  ;;  %v5838_v60 = vld [vmem:[%s5444_s20 + $0x90] sm:$0xff] }
  0xa4   : > { %794 = vrot.lane.b32.xlu1 %v5821_v1, %s5394_s23  ;;  %792 = vrot.lane.b32.xlu0 %v5824_v61, %s5394_s23  ;;  %8484 = vst [vmem:[#allocation41_spill] sm:$0xff] %v5835_v63  ;;  %8485 = vst [vmem:[#allocation42_spill] sm:$0xff] %v5838_v60 }
  0xa6   : > { %v5830_v3 = vpop.permute.xlu1 %554  ;;  %v5832_v62 = vpop.permute.xlu0 %552 }
  0xa7   : > { %8482 = vst [vmem:[#allocation39_spill] sm:$0xff] %v5830_v3  ;;  %8483 = vst [vmem:[#allocation40_spill] sm:$0xff] %v5832_v62  ;;  %v5849_v3 = vld [vmem:[%s5444_s20 + $0xb0] sm:$0xff]  ;;  %v5852_v62 = vld [vmem:[%s5444_s20 + $0xa8] sm:$0xff] }
  0xa8   : > { %798 = vrot.lane.b32.xlu1 %v5835_v63, %s5394_s23  ;;  %796 = vrot.lane.b32.xlu0 %v5838_v60, %s5394_s23  ;;  %8488 = vst [vmem:[#allocation45_spill] sm:$0xff] %v5849_v3  ;;  %8489 = vst [vmem:[#allocation46_spill] sm:$0xff] %v5852_v62  ;;  %v219_v63 = vld [vmem:[%s5444_s20 + $0xf8] sm:$0xff] }
  0xaa   : > { %v5844_v1 = vpop.permute.xlu1 %558  ;;  %v5846_v61 = vpop.permute.xlu0 %556 }
  0xab   : > { %8486 = vst [vmem:[#allocation43_spill] sm:$0xff] %v5844_v1  ;;  %8487 = vst [vmem:[#allocation44_spill] sm:$0xff] %v5846_v61  ;;  %v5862_v1 = vld [vmem:[%s5444_s20 + $0xc8] sm:$0xff]  ;;  %v5865_v61 = vld [vmem:[%s5444_s20 + $0xc0] sm:$0xff] }
  0xac   : > { %802 = vrot.lane.b32.xlu1 %v5849_v3, %s5394_s23  ;;  %800 = vrot.lane.b32.xlu0 %v5852_v62, %s5394_s23  ;;  %8491 = vst [vmem:[#allocation48_spill] sm:$0xff] %v5862_v1  ;;  %8492 = vst [vmem:[#allocation49_spill] sm:$0xff] %v5865_v61  ;;  %v221_v62 = vld [vmem:[%s5444_s20 + $0x110] sm:$0xff]  ;;  %v220_v3 = vld [vmem:[%s5444_s20 + $0x108] sm:$0xff] }
  0xae   : > { %v563_v60 = vpop.permute.xlu1 %562  ;;  %v5859_v32 = vpop.permute.xlu0 %560 }
  0xaf   : > { %8490 = vst [vmem:[#allocation47_spill] sm:$0xff] %v5859_v32  ;;  %v5868_v33 = vsel %vm1512_vm0, %v219_v63, %v563_v60 }
  0xb0   : > { %8493 = vst [vmem:[#allocation50_spill] sm:$0xff] %v5868_v33  ;;  %806 = vrot.lane.b32.xlu1 %v5862_v1, %s5394_s23  ;;  %804 = vrot.lane.b32.xlu0 %v5865_v61, %s5394_s23  ;;  %v223_v61 = vld [vmem:[%s5444_s20 + $0x128] sm:$0xff]  ;;  %v222_v1 = vld [vmem:[%s5444_s20 + $0x120] sm:$0xff] }
  0xb2   : > { %v567_v59 = vpop.permute.xlu1 %566  ;;  %v565_v32 = vpop.permute.xlu0 %564 }
  0xb3   : > { %v5883_v60 = vsel %vm1512_vm0, %v221_v62, %v567_v59  ;;  %v5886_v33 = vsel %vm1512_vm0, %v220_v3, %v565_v32 }
  0xb4   : > { %8496 = vst [vmem:[#allocation53_spill] sm:$0xff] %v5883_v60  ;;  %8497 = vst [vmem:[#allocation54_spill] sm:$0xff] %v5886_v33  ;;  %810 = vrot.lane.b32.xlu1 %v5877_v58, %s5394_s23  ;;  %808 = vrot.lane.b32.xlu0 %v5880_v57, %s5394_s23  ;;  %v225_v33 = vld [vmem:[%s5444_s20 + $0x140] sm:$0xff]  ;;  %v224_v60 = vld [vmem:[%s5444_s20 + $0x138] sm:$0xff] }
  0xb6   : > { %v571_v56 = vpop.permute.xlu1 %570  ;;  %v569_v55 = vpop.permute.xlu0 %568 }
  0xb7   : > { %v5898_v59 = vsel %vm1512_vm0, %v223_v61, %v571_v56  ;;  %v5901_v32 = vsel %vm1512_vm0, %v222_v1, %v569_v55  ;;  %v227_v55 = vld [vmem:[%s5444_s20 + $0x158] sm:$0xff] }
  0xb8   : > { %8499 = vst [vmem:[#allocation56_spill] sm:$0xff] %v5898_v59  ;;  %8500 = vst [vmem:[#allocation57_spill] sm:$0xff] %v5901_v32  ;;  %814 = vrot.lane.b32.xlu1 %v219_v63, %s5394_s23  ;;  %812 = vrot.lane.b32.xlu0 %v5895_v54, %s5394_s23  ;;  %v226_v63 = vld [vmem:[%s5444_s20 + $0x150] sm:$0xff] }
  0xba   : > { %v575_v57 = vpop.permute.xlu1 %574  ;;  %v573_v58 = vpop.permute.xlu0 %572 }
  0xbb   : > { %v5909_v53 = vsel %vm1512_vm0, %v225_v33, %v575_v57  ;;  %v5912_v56 = vsel %vm1512_vm0, %v224_v60, %v573_v58  ;;  %v229_v57 = vld [vmem:[%s5444_s20 + $0x170] sm:$0xff]  ;;  %v228_v58 = vld [vmem:[%s5444_s20 + $0x168] sm:$0xff] }
  0xbc   : > { %8501 = vst [vmem:[#allocation58_spill] sm:$0xff] %v5909_v53  ;;  %8502 = vst [vmem:[#allocation59_spill] sm:$0xff] %v5912_v56  ;;  %818 = vrot.lane.b32.xlu1 %v221_v62, %s5394_s23  ;;  %816 = vrot.lane.b32.xlu0 %v220_v3, %s5394_s23 }
  0xbe   : > { %v579_v32 = vpop.permute.xlu1 %578  ;;  %v577_v59 = vpop.permute.xlu0 %576 }
  0xbf   : > { %v5919_v54 = vsel %vm1512_vm0, %v227_v55, %v579_v32  ;;  %v5922_v52 = vsel %vm1512_vm0, %v226_v63, %v577_v59 }
  0xc0   : > { %822 = vrot.lane.b32.xlu1 %v223_v61, %s5394_s23  ;;  %820 = vrot.lane.b32.xlu0 %v222_v1, %s5394_s23 }
  0xc2   : > { %v583_v62 = vpop.permute.xlu1 %582  ;;  %v581_v3 = vpop.permute.xlu0 %580 }
  0xc3   : > { %v5929_v56 = vsel %vm1512_vm0, %v229_v57, %v583_v62  ;;  %v5932_v53 = vsel %vm1512_vm0, %v228_v58, %v581_v3  ;;  %v4339_v62 = vld [vmem:[%s5444_s20 + $0x188] sm:$0xff] }
  0xc4   : > { %826 = vrot.lane.b32.xlu1 %v225_v33, %s5394_s23  ;;  %824 = vrot.lane.b32.xlu0 %v224_v60, %s5394_s23  ;;  %v4338_v33 = vld [vmem:[%s5444_s20 + $0x180] sm:$0xff] }
  0xc6   : > { %v5936_v59 = vpop.permute.xlu1 %650  ;;  %v5938_v61 = vpop.permute.xlu0 %648 }
  0xc7   : > { %8503 = vst [vmem:[#allocation60_spill] sm:$0xff] %v5936_v59  ;;  %8504 = vst [vmem:[#allocation61_spill] sm:$0xff] %v5938_v61  ;;  %v4471_v59 = vld [vmem:[%s5444_s20 + $0x52] sm:$0xff] }
  0xc8   : > { %830 = vrot.lane.b32.xlu1 %v227_v55, %s5394_s23  ;;  %828 = vrot.lane.b32.xlu0 %v226_v63, %s5394_s23 }
  0xca   : > { %v5942_v1 = vpop.permute.xlu1 %654  ;;  %v5944_v32 = vpop.permute.xlu0 %652 }
  0xcb   : > { %8505 = vst [vmem:[#allocation62_spill] sm:$0xff] %v5942_v1  ;;  %8506 = vst [vmem:[#allocation63_spill] sm:$0xff] %v5944_v32  ;;  %v4470_v32 = vld [vmem:[%s5444_s20 + $0x4a] sm:$0xff] }
  0xcc   : > { %834 = vrot.lane.b32.xlu1 %v229_v57, %s5394_s23  ;;  %832 = vrot.lane.b32.xlu0 %v228_v58, %s5394_s23 }
  0xce   : > { %v5950_v3 = vpop.permute.xlu1 %658  ;;  %v5952_v60 = vpop.permute.xlu0 %656 }
  0xcf   : > { %8507 = vst [vmem:[#allocation64_spill] sm:$0xff] %v5950_v3  ;;  %8508 = vst [vmem:[#allocation65_spill] sm:$0xff] %v5952_v60  ;;  %v4436_v3 = vld [vmem:[%s5444_s20 + $0x31] sm:$0xff] }
  0xd0   : > { %838 = vrot.lane.b32.xlu1 %v4339_v62, %s5394_s23  ;;  %836 = vrot.lane.b32.xlu0 %v4338_v33, %s5394_s23  ;;  %s5398_s23 = smov 56   ;;  %v4468_v60 = vld [vmem:[%s5444_s20 + $0x32] sm:$0xff] }
  0xd2   : > { %v5956_v55 = vpop.permute.xlu1 %662  ;;  %v5958_v63 = vpop.permute.xlu0 %660 }
  0xd3   : > { %8509 = vst [vmem:[#allocation66_spill] sm:$0xff] %v5956_v55  ;;  %8510 = vst [vmem:[#allocation67_spill] sm:$0xff] %v5958_v63 }
  0xd4   : > { %906 = vrot.lane.b32.xlu1 %v5454_v2, %s5395_s24  ;;  %904 = vrot.lane.b32.xlu0 %v5447_v0, %s5395_s24 }
  0xd6   : > { %v5964_v57 = vpop.permute.xlu1 %666  ;;  %v5966_v58 = vpop.permute.xlu0 %664 }
  0xd7   : > { %8511 = vst [vmem:[#allocation68_spill] sm:$0xff] %v5964_v57  ;;  %8512 = vst [vmem:[#allocation69_spill] sm:$0xff] %v5966_v58  ;;  %v6208_v57 = vld [vmem:[%s5444_s20 + $0x182] sm:$0xff] }
  0xd8   : > { %910 = vrot.lane.b32.xlu1 %v5461_v4, %s5395_s24  ;;  %908 = vrot.lane.b32.xlu0 %v5464_v5, %s5395_s24  ;;  %v8560_v58 = vld [vmem:[#allocation26_spill] sm:$0xff] }
  0xda   : > { %v5972_v62 = vpop.permute.xlu1 %670  ;;  %v5974_v33 = vpop.permute.xlu0 %668 }
  0xdb   : > { %8513 = vst [vmem:[#allocation70_spill] sm:$0xff] %v5972_v62  ;;  %8514 = vst [vmem:[#allocation71_spill] sm:$0xff] %v5974_v33 }
  0xdc   : > { %914 = vrot.lane.b32.xlu1 %v5471_v6, %s5395_s24  ;;  %912 = vrot.lane.b32.xlu0 %v5474_v7, %s5395_s24 }
  0xde   : > { %v5980_v0 = vpop.permute.xlu1 %674  ;;  %v5982_v2 = vpop.permute.xlu0 %672 }
  0xdf   : > { %8515 = vst [vmem:[#allocation72_spill] sm:$0xff] %v5980_v0  ;;  %8516 = vst [vmem:[#allocation73_spill] sm:$0xff] %v5982_v2 }
  0xe0   : > { %918 = vrot.lane.b32.xlu1 %v5481_v8, %s5395_s24  ;;  %916 = vrot.lane.b32.xlu0 %v5484_v9, %s5395_s24 }
  0xe2   : > { %v5988_v4 = vpop.permute.xlu1 %678  ;;  %v5990_v5 = vpop.permute.xlu0 %676 }
  0xe3   : > { %8517 = vst [vmem:[#allocation74_spill] sm:$0xff] %v5988_v4  ;;  %8518 = vst [vmem:[#allocation75_spill] sm:$0xff] %v5990_v5 }
  0xe4   : > { %922 = vrot.lane.b32.xlu1 %v5491_v10, %s5395_s24  ;;  %920 = vrot.lane.b32.xlu0 %v5494_v11, %s5395_s24 }
  0xe6   : > { %v5996_v6 = vpop.permute.xlu1 %682  ;;  %v5998_v7 = vpop.permute.xlu0 %680 }
  0xe8   : > { %926 = vrot.lane.b32.xlu1 %v5501_v12, %s5395_s24  ;;  %924 = vrot.lane.b32.xlu0 %v5504_v13, %s5395_s24 }
  0xea   : > { %v6004_v8 = vpop.permute.xlu1 %686  ;;  %v6006_v9 = vpop.permute.xlu0 %684 }
  0xec   : > { %930 = vrot.lane.b32.xlu1 %v5511_v14, %s5395_s24  ;;  %928 = vrot.lane.b32.xlu0 %v5514_v15, %s5395_s24 }
  0xee   : > { %v6012_v10 = vpop.permute.xlu1 %690  ;;  %v6014_v11 = vpop.permute.xlu0 %688 }
  0xf0   : > { %934 = vrot.lane.b32.xlu1 %v5521_v16, %s5395_s24  ;;  %932 = vrot.lane.b32.xlu0 %v5524_v17, %s5395_s24 }
  0xf2   : > { %v6020_v12 = vpop.permute.xlu1 %694  ;;  %v6022_v13 = vpop.permute.xlu0 %692 }
  0xf4   : > { %938 = vrot.lane.b32.xlu1 %v5531_v18, %s5395_s24  ;;  %936 = vrot.lane.b32.xlu0 %v5534_v19, %s5395_s24 }
  0xf6   : > { %v6028_v14 = vpop.permute.xlu1 %698  ;;  %v6030_v15 = vpop.permute.xlu0 %696 }
  0xf8   : > { %942 = vrot.lane.b32.xlu1 %v5541_v20, %s5395_s24  ;;  %940 = vrot.lane.b32.xlu0 %v5544_v21, %s5395_s24 }
  0xfa   : > { %v6036_v16 = vpop.permute.xlu1 %702  ;;  %v6038_v17 = vpop.permute.xlu0 %700 }
  0xfc   : > { %946 = vrot.lane.b32.xlu1 %v5551_v22, %s5395_s24  ;;  %944 = vrot.lane.b32.xlu0 %v5554_v23, %s5395_s24 }
  0xfe   : > { %v6044_v18 = vpop.permute.xlu1 %706  ;;  %v6046_v19 = vpop.permute.xlu0 %704 }
 0x100   : > { %950 = vrot.lane.b32.xlu1 %v5561_v24, %s5395_s24  ;;  %948 = vrot.lane.b32.xlu0 %v5564_v25, %s5395_s24 }
 0x102   : > { %v6052_v20 = vpop.permute.xlu1 %710  ;;  %v6054_v21 = vpop.permute.xlu0 %708 }
 0x104   : > { %954 = vrot.lane.b32.xlu1 %v5571_v26, %s5395_s24  ;;  %952 = vrot.lane.b32.xlu0 %v5574_v27, %s5395_s24  ;;  %v4371_v26 = vld [vmem:[%s5444_s20 + $0x189] sm:$0xff]  ;;  %v4370_v27 = vld [vmem:[%s5444_s20 + $0x181] sm:$0xff] }
 0x106   : > { %v6060_v22 = vpop.permute.xlu1 %778  ;;  %v6062_v23 = vpop.permute.xlu0 %776 }
 0x107   : > { %8519 = vst [vmem:[#allocation76_spill] sm:$0xff] %v6060_v22  ;;  %8520 = vst [vmem:[#allocation77_spill] sm:$0xff] %v6062_v23  ;;  %v4441_v23 = vld [vmem:[%s5444_s20 + $0x69] sm:$0xff] }
 0x108   : > { %958 = vrot.lane.b32.xlu1 %v5581_v28, %s5395_s24  ;;  %956 = vrot.lane.b32.xlu0 %v5584_v29, %s5395_s24 }
 0x10a   : > { %v6068_v24 = vpop.permute.xlu1 %782  ;;  %v6070_v25 = vpop.permute.xlu0 %780 }
 0x10b   : > { %8521 = vst [vmem:[#allocation78_spill] sm:$0xff] %v6068_v24  ;;  %8522 = vst [vmem:[#allocation79_spill] sm:$0xff] %v6070_v25 }
 0x10c   : > { %962 = vrot.lane.b32.xlu1 %v5591_v30, %s5395_s24  ;;  %960 = vrot.lane.b32.xlu0 %v5594_v31, %s5395_s24 }
 0x10e   : > { %v6078_v4 = vpop.permute.xlu1 %786  ;;  %v6080_v5 = vpop.permute.xlu0 %784 }
 0x10f   : > { %8523 = vst [vmem:[#allocation80_spill] sm:$0xff] %v6078_v4  ;;  %8524 = vst [vmem:[#allocation81_spill] sm:$0xff] %v6080_v5  ;;  %v8582_v4 = vld [vmem:[#allocation52_spill] sm:$0xff]  ;;  %v8583_v5 = vld [vmem:[#allocation55_spill] sm:$0xff] }
 0x110   : > { %966 = vrot.lane.b32.xlu1 %v4371_v26, %s5395_s24  ;;  %964 = vrot.lane.b32.xlu0 %v4370_v27, %s5395_s24 }
 0x112   : > { %v6084_v28 = vpop.permute.xlu1 %790  ;;  %v6086_v29 = vpop.permute.xlu0 %788 }
 0x113   : > { %8525 = vst [vmem:[#allocation82_spill] sm:$0xff] %v6084_v28  ;;  %8526 = vst [vmem:[#allocation83_spill] sm:$0xff] %v6086_v29  ;;  %v8571_v29 = vld [vmem:[#allocation37_spill] sm:$0xff] }
 0x114   : > { %1034 = vrot.lane.b32.xlu1 %v5605_v34, %s5396_s25  ;;  %1032 = vrot.lane.b32.xlu0 %v5608_v35, %s5396_s25 }
 0x116   : > { %v6092_v30 = vpop.permute.xlu1 %794  ;;  %v6094_v31 = vpop.permute.xlu0 %792 }
 0x117   : > { %8527 = vst [vmem:[#allocation84_spill] sm:$0xff] %v6092_v30  ;;  %8528 = vst [vmem:[#allocation85_spill] sm:$0xff] %v6094_v31  ;;  %v8551_v30 = vld [vmem:[#allocation17_spill] sm:$0xff] }
 0x118   : > { %1038 = vrot.lane.b32.xlu1 %v5615_v36, %s5396_s25  ;;  %1036 = vrot.lane.b32.xlu0 %v5618_v37, %s5396_s25 }
 0x11a   : > { %v6100_v26 = vpop.permute.xlu1 %798  ;;  %v6102_v27 = vpop.permute.xlu0 %796 }
 0x11b   : > { %8529 = vst [vmem:[#allocation86_spill] sm:$0xff] %v6100_v26  ;;  %8530 = vst [vmem:[#allocation87_spill] sm:$0xff] %v6102_v27  ;;  %v8547_v27 = vld [vmem:[#allocation13_spill] sm:$0xff] }
 0x11c   : > { %1042 = vrot.lane.b32.xlu1 %v5625_v38, %s5396_s25  ;;  %1040 = vrot.lane.b32.xlu0 %v5628_v39, %s5396_s25 }
 0x11e   : > { %v6108_v34 = vpop.permute.xlu1 %802  ;;  %v6110_v35 = vpop.permute.xlu0 %800 }
 0x11f   : > { %8531 = vst [vmem:[#allocation88_spill] sm:$0xff] %v6108_v34  ;;  %8532 = vst [vmem:[#allocation89_spill] sm:$0xff] %v6110_v35  ;;  %v8537_v34 = vld [vmem:[#allocation5_spill] sm:$0xff] }
 0x120   : > { %1046 = vrot.lane.b32.xlu1 %v5635_v40, %s5396_s25  ;;  %1044 = vrot.lane.b32.xlu0 %v5638_v41, %s5396_s25 }
 0x122   : > { %v6116_v36 = vpop.permute.xlu1 %806  ;;  %v6118_v37 = vpop.permute.xlu0 %804 }
 0x123   : > { %8533 = vst [vmem:[#allocation90_spill] sm:$0xff] %v6116_v36  ;;  %8534 = vst [vmem:[#allocation91_spill] sm:$0xff] %v6118_v37  ;;  %v8535_v36 = vld [vmem:[#allocation3_spill] sm:$0xff] }
 0x124   : > { %1050 = vrot.lane.b32.xlu1 %v5645_v42, %s5396_s25  ;;  %1048 = vrot.lane.b32.xlu0 %v5648_v43, %s5396_s25 }
 0x126   : > { %v6124_v38 = vpop.permute.xlu1 %810  ;;  %v6126_v39 = vpop.permute.xlu0 %808 }
 0x128   : > { %1054 = vrot.lane.b32.xlu1 %v5655_v44, %s5396_s25  ;;  %1052 = vrot.lane.b32.xlu0 %v5658_v45, %s5396_s25 }
 0x12a   : > { %v6132_v40 = vpop.permute.xlu1 %814  ;;  %v6134_v41 = vpop.permute.xlu0 %812 }
 0x12c   : > { %1058 = vrot.lane.b32.xlu1 %v5665_v46, %s5396_s25  ;;  %1056 = vrot.lane.b32.xlu0 %v5668_v47, %s5396_s25 }
 0x12e   : > { %v6140_v42 = vpop.permute.xlu1 %818  ;;  %v6142_v43 = vpop.permute.xlu0 %816 }
 0x130   : > { %1062 = vrot.lane.b32.xlu1 %v5675_v48, %s5396_s25  ;;  %1060 = vrot.lane.b32.xlu0 %v5678_v49, %s5396_s25  ;;  %v8536_v48 = vld [vmem:[#allocation4_spill] sm:$0xff] }
 0x132   : > { %v6148_v44 = vpop.permute.xlu1 %822  ;;  %v6150_v45 = vpop.permute.xlu0 %820 }
 0x134   : > { %1066 = vrot.lane.b32.xlu1 %v5685_v50, %s5396_s25  ;;  %1064 = vrot.lane.b32.xlu0 %v5688_v51, %s5396_s25  ;;  %v8538_v50 = vld [vmem:[#allocation6_spill] sm:$0xff] }
 0x136   : > { %v6156_v46 = vpop.permute.xlu1 %826  ;;  %v6158_v47 = vpop.permute.xlu0 %824 }
 0x138   : > { %1070 = vrot.lane.b32.xlu1 %v8535_v36, %s5396_s25  ;;  %1068 = vrot.lane.b32.xlu0 %v8536_v48, %s5396_s25  ;;  %v8539_v36 = vld [vmem:[#allocation7_spill] sm:$0xff]  ;;  %v8540_v48 = vld [vmem:[#allocation8_spill] sm:$0xff] }
 0x13a   : > { %v6164_v49 = vpop.permute.xlu1 %830  ;;  %v6166_v37 = vpop.permute.xlu0 %828 }
 0x13c   : > { %1074 = vrot.lane.b32.xlu1 %v8537_v34, %s5396_s25  ;;  %1072 = vrot.lane.b32.xlu0 %v8538_v50, %s5396_s25  ;;  %v8543_v34 = vld [vmem:[#allocation9_spill] sm:$0xff]  ;;  %v8544_v50 = vld [vmem:[#allocation10_spill] sm:$0xff] }
 0x13d   : > { %8554 = vst [vmem:[#allocation10_spill] sm:$0xff] %v6208_v57 }
 0x13e   : > { %v6172_v51 = vpop.permute.xlu1 %834  ;;  %v6174_v0 = vpop.permute.xlu0 %832 }
 0x140   : > { %1078 = vrot.lane.b32.xlu1 %v8539_v36, %s5396_s25  ;;  %1076 = vrot.lane.b32.xlu0 %v8540_v48, %s5396_s25  ;;  %v8548_v36 = vld [vmem:[#allocation14_spill] sm:$0xff] }
 0x142   : > { %v6180_v35 = vpop.permute.xlu1 %838  ;;  %v6182_v2 = vpop.permute.xlu0 %836 }
 0x143   : > { %8541 = vst [vmem:[#allocation3_spill] sm:$0xff] %v6180_v35  ;;  %8542 = vst [vmem:[#allocation4_spill] sm:$0xff] %v6182_v2  ;;  %v8601_v35 = vld [vmem:[#allocation40_spill] sm:$0xff] }
 0x144   : > { %1082 = vrot.lane.b32.xlu1 %v8543_v34, %s5396_s25  ;;  %1080 = vrot.lane.b32.xlu0 %v8544_v50, %s5396_s25  ;;  %v8552_v34 = vld [vmem:[#allocation18_spill] sm:$0xff] }
 0x145   : > { %v6205_v50 = vld [vmem:[%s5444_s20 + $0x18a] sm:$0xff] }
 0x146   : > { %v6188_v26 = vpop.permute.xlu1 %906  ;;  %v6190_v62 = vpop.permute.xlu0 %904  ;;  %8553 = vst [vmem:[#allocation9_spill] sm:$0xff] %v6205_v50 }
 0x147   : > { %8545 = vst [vmem:[#allocation5_spill] sm:$0xff] %v6188_v26  ;;  %8546 = vst [vmem:[#allocation6_spill] sm:$0xff] %v6190_v62  ;;  %v4439_v26 = vld [vmem:[%s5444_s20 + $0x51] sm:$0xff] }
 0x148   : > { %1086 = vrot.lane.b32.xlu1 %v8547_v27, %s5396_s25  ;;  %1084 = vrot.lane.b32.xlu0 %v8548_v36, %s5396_s25 }
 0x14a   : > { %v6196_v48 = vpop.permute.xlu1 %910  ;;  %v6198_v33 = vpop.permute.xlu0 %908 }
 0x14b   : > { %8549 = vst [vmem:[#allocation7_spill] sm:$0xff] %v6196_v48  ;;  %8550 = vst [vmem:[#allocation8_spill] sm:$0xff] %v6198_v33  ;;  %v4437_v48 = vld [vmem:[%s5444_s20 + $0x39] sm:$0xff] }
 0x14c   : > { %1090 = vrot.lane.b32.xlu1 %v8551_v30, %s5396_s25  ;;  %1088 = vrot.lane.b32.xlu0 %v8552_v34, %s5396_s25  ;;  %v8559_v34 = vld [vmem:[#allocation25_spill] sm:$0xff] }
 0x14d   : > { %v4469_v33 = vld [vmem:[%s5444_s20 + $0x3a] sm:$0xff] }
 0x14e   : > { %v6210_v31 = vpop.permute.xlu1 %914  ;;  %v6212_v27 = vpop.permute.xlu0 %912 }
 0x14f   : > { %8555 = vst [vmem:[#allocation13_spill] sm:$0xff] %v6210_v31  ;;  %8556 = vst [vmem:[#allocation14_spill] sm:$0xff] %v6212_v27  ;;  %v8579_v31 = vld [vmem:[#allocation48_spill] sm:$0xff] }
 0x150   : > { %1094 = vrot.lane.b32.xlu1 %v6205_v50, %s5396_s25  ;;  %1092 = vrot.lane.b32.xlu0 %v6208_v57, %s5396_s25  ;;  %v8563_v50 = vld [vmem:[#allocation29_spill] sm:$0xff]  ;;  %v8564_v57 = vld [vmem:[#allocation30_spill] sm:$0xff]  ;;  %s5399_s25 = smov 64  }
 0x152   : > { %v6218_v36 = vpop.permute.xlu1 %918  ;;  %v6220_v30 = vpop.permute.xlu0 %916 }
 0x153   : > { %8557 = vst [vmem:[#allocation17_spill] sm:$0xff] %v6218_v36  ;;  %8558 = vst [vmem:[#allocation18_spill] sm:$0xff] %v6220_v30 }
 0x154   : > { %1162 = vrot.lane.b32.xlu1 %v8559_v34, %s5397_s26  ;;  %1160 = vrot.lane.b32.xlu0 %v8560_v58, %s5397_s26  ;;  %v1776_v34 = vld [vmem:[%s8396_s1] sm:$0xff] }
 0x155   : > { %v8567_v58 = vld [vmem:[#allocation33_spill] sm:$0xff] }
 0x156   : > { %v6226_v28 = vpop.permute.xlu1 %922  ;;  %v6228_v55 = vpop.permute.xlu0 %920 }
 0x157   : > { %8561 = vst [vmem:[#allocation25_spill] sm:$0xff] %v6226_v28  ;;  %8562 = vst [vmem:[#allocation26_spill] sm:$0xff] %v6228_v55  ;;  %v8568_v28 = vld [vmem:[#allocation34_spill] sm:$0xff] }
 0x158   : > { %1166 = vrot.lane.b32.xlu1 %v8563_v50, %s5397_s26  ;;  %1164 = vrot.lane.b32.xlu0 %v8564_v57, %s5397_s26  ;;  %v1777_v50 = vld [vmem:[%s8396_s1 + $0x8] sm:$0xff] }
 0x159   : > { %v4708_v55 = vpack.c.bf16 %v1777_v50, %v1776_v34 }
 0x15a   : > { %v6234_v36 = vpop.permute.xlu1 %926  ;;  %v6236_v30 = vpop.permute.xlu0 %924 }
 0x15b   : > { %8565 = vst [vmem:[#allocation29_spill] sm:$0xff] %v6234_v36  ;;  %8566 = vst [vmem:[#allocation30_spill] sm:$0xff] %v6236_v30  ;;  %4709 = vmatprep.subr.bf16.mxu0 %v4708_v55  ;;  %v1778_v30 = vld [vmem:[%s8396_s1 + $0x10] sm:$0xff] }
 0x15c   : > { %1170 = vrot.lane.b32.xlu1 %v8567_v58, %s5397_s26  ;;  %1168 = vrot.lane.b32.xlu0 %v8568_v28, %s5397_s26  ;;  %v8572_v58 = vld [vmem:[#allocation38_spill] sm:$0xff]  ;;  %v1779_v28 = vld [vmem:[%s8396_s1 + $0x18] sm:$0xff] }
 0x15d   : > { %4711 = vmatpush3.bf16.msra.mxu0 %v4708_v55  ;;  %v4712_v34 = vpack.c.bf16 %v1779_v28, %v1778_v30  ;;  %v1781_v55 = vld [vmem:[%s8396_s1 + $0x28] sm:$0xff] }
 0x15e   : > { %v6248_v57 = vpop.permute.xlu1 %930  ;;  %v6250_v36 = vpop.permute.xlu0 %928 }
 0x15f   : > { %8569 = vst [vmem:[#allocation33_spill] sm:$0xff] %v6248_v57  ;;  %8570 = vst [vmem:[#allocation34_spill] sm:$0xff] %v6250_v36  ;;  %4713 = vmatprep.subr.bf16.mxu0 %v4712_v34  ;;  %v1780_v36 = vld [vmem:[%s8396_s1 + $0x20] sm:$0xff] }
 0x160   : > { %1174 = vrot.lane.b32.xlu1 %v8571_v29, %s5397_s26  ;;  %1172 = vrot.lane.b32.xlu0 %v8572_v58, %s5397_s26  ;;  %v8575_v29 = vld [vmem:[#allocation41_spill] sm:$0xff]  ;;  %v8576_v58 = vld [vmem:[#allocation42_spill] sm:$0xff]  ;;  %v4716_v30 = vpack.c.bf16 %v1781_v55, %v1780_v36  ;;  %v1783_v36 = vld [vmem:[%s8396_s1 + $0x38] sm:$0xff] }
 0x161   : > { %4715 = vmatpush3.bf16.msra.mxu0 %v4712_v34 }
 0x162   : > { %v6262_v50 = vpop.permute.xlu1 %934  ;;  %v6264_v57 = vpop.permute.xlu0 %932  ;;  %4717 = vmatprep.subr.bf16.mxu0 %v4716_v30 }
 0x163   : > { %8573 = vst [vmem:[#allocation37_spill] sm:$0xff] %v6262_v50  ;;  %8574 = vst [vmem:[#allocation38_spill] sm:$0xff] %v6264_v57  ;;  %v1782_v57 = vld [vmem:[%s8396_s1 + $0x30] sm:$0xff] }
 0x164   : > { %1178 = vrot.lane.b32.xlu1 %v8575_v29, %s5397_s26  ;;  %1176 = vrot.lane.b32.xlu0 %v8576_v58, %s5397_s26  ;;  %v8577_v29 = vld [vmem:[#allocation45_spill] sm:$0xff]  ;;  %v8578_v58 = vld [vmem:[#allocation46_spill] sm:$0xff]  ;;  %v4720_v34 = vpack.c.bf16 %v1783_v36, %v1782_v57  ;;  %v8581_v36 = vld [vmem:[#allocation51_spill] sm:$0xff] }
 0x165   : > { %4719 = vmatpush3.bf16.msra.mxu0 %v4716_v30 }
 0x166   : > { %v6276_v28 = vpop.permute.xlu1 %938  ;;  %v6278_v50 = vpop.permute.xlu0 %936  ;;  %4721 = vmatprep.subr.bf16.mxu0 %v4720_v34 }
 0x168   : > { %1182 = vrot.lane.b32.xlu1 %v8577_v29, %s5397_s26  ;;  %1180 = vrot.lane.b32.xlu0 %v8578_v58, %s5397_s26  ;;  %v8580_v29 = vld [vmem:[#allocation49_spill] sm:$0xff] }
 0x169   : > { %4723 = vmatpush3.bf16.msra.mxu0 %v4720_v34  ;;  %v1784_v58 = vld [vmem:[%s8396_s1 + $0x40] sm:$0xff] }
 0x16a   : > { %v6290_v55 = vpop.permute.xlu1 %942  ;;  %v6292_v63 = vpop.permute.xlu0 %940  ;;  %4658 = vmatprep.subr.mxu0 %v1784_v58 }
 0x16c   : > { %1186 = vrot.lane.b32.xlu1 %v8579_v31, %s5397_s26  ;;  %1184 = vrot.lane.b32.xlu0 %v8580_v29, %s5397_s26 }
 0x16d   : > { %4659 = vmatpush3.msra.mxu0 %v1784_v58  ;;  %v4438_v58 = vld [vmem:[%s5444_s20 + $0x49] sm:$0xff] }
 0x16e   : > { %v6301_v30 = vpop.permute.xlu1 %946  ;;  %v6303_v57 = vpop.permute.xlu0 %944 }
 0x170   : > { %1190 = vrot.lane.b32.xlu1 %v8581_v36, %s5397_s26  ;;  %1188 = vrot.lane.b32.xlu0 %v8582_v4, %s5397_s26 }
 0x172   : > { %v6310_v34 = vpop.permute.xlu1 %950  ;;  %v6312_v27 = vpop.permute.xlu0 %948 }
 0x174   : > { %1288 = vrot.lane.b32.xlu1 %v4436_v3, %s5398_s23  ;;  %1192 = vrot.lane.b32.xlu0 %v8583_v5, %s5397_s26 }
 0x176   : > { %v6319_v24 = vpop.permute.xlu1 %954  ;;  %v6321_v1 = vpop.permute.xlu0 %952 }
 0x178   : > { %1416 = vrot.lane.b32.xlu1 %v4468_v60, %s5399_s25  ;;  %1290 = vrot.lane.b32.xlu0 %v4437_v48, %s5398_s23  ;;  %v4440_v48 = vld [vmem:[%s5444_s20 + $0x61] sm:$0xff] }
 0x17a   : > { %v6327_v3 = vpop.permute.xlu1 %958  ;;  %v6329_v25 = vpop.permute.xlu0 %956 }
 0x17c   : > { %1292 = vrot.lane.b32.xlu1 %v4438_v58, %s5398_s23  ;;  %1418 = vrot.lane.b32.xlu0 %v4469_v33, %s5399_s25  ;;  %v4472_v33 = vld [vmem:[%s5444_s20 + $0x62] sm:$0xff] }
 0x17e   : > { %v6335_v22 = vpop.permute.xlu1 %962  ;;  %v6337_v60 = vpop.permute.xlu0 %960 }
 0x180   : > { %1420 = vrot.lane.b32.xlu1 %v4470_v32, %s5399_s25  ;;  %1294 = vrot.lane.b32.xlu0 %v4439_v26, %s5398_s23  ;;  %v4442_v26 = vld [vmem:[%s5444_s20 + $0x79] sm:$0xff] }
 0x182   : > { %v6343_v62 = vpop.permute.xlu1 %966  ;;  %v6345_v58 = vpop.permute.xlu0 %964 }
 0x183   : > { %8584 = vst [vmem:[#allocation41_spill] sm:$0xff] %v6343_v62  ;;  %8585 = vst [vmem:[#allocation42_spill] sm:$0xff] %v6345_v58  ;;  %v4473_v62 = vld [vmem:[%s5444_s20 + $0x6a] sm:$0xff] }
 0x184   : > { %1296 = vrot.lane.b32.xlu1 %v4440_v48, %s5398_s23  ;;  %1422 = vrot.lane.b32.xlu0 %v4471_v59, %s5399_s25  ;;  %v4474_v59 = vld [vmem:[%s5444_s20 + $0x7a] sm:$0xff] }
 0x186   : > { %v6351_v61 = vpop.permute.xlu1 %1034  ;;  %v6353_v32 = vpop.permute.xlu0 %1032 }
 0x187   : > { %8586 = vst [vmem:[#allocation45_spill] sm:$0xff] %v6351_v61  ;;  %8587 = vst [vmem:[#allocation46_spill] sm:$0xff] %v6353_v32  ;;  %v4443_v61 = vld [vmem:[%s5444_s20 + $0x81] sm:$0xff] }
 0x188   : > { %1424 = vrot.lane.b32.xlu1 %v4472_v33, %s5399_s25  ;;  %1298 = vrot.lane.b32.xlu0 %v4441_v23, %s5398_s23  ;;  %v4444_v23 = vld [vmem:[%s5444_s20 + $0x91] sm:$0xff] }
 0x18a   : > { %v6359_v58 = vpop.permute.xlu1 %1038  ;;  %v6361_v48 = vpop.permute.xlu0 %1036 }
 0x18b   : > { %8588 = vst [vmem:[#allocation48_spill] sm:$0xff] %v6359_v58  ;;  %8589 = vst [vmem:[#allocation49_spill] sm:$0xff] %v6361_v48  ;;  %v4475_v58 = vld [vmem:[%s5444_s20 + $0x82] sm:$0xff] }
 0x18c   : > { %1300 = vrot.lane.b32.xlu1 %v4442_v26, %s5398_s23  ;;  %1426 = vrot.lane.b32.xlu0 %v4473_v62, %s5399_s25  ;;  %v4476_v62 = vld [vmem:[%s5444_s20 + $0x92] sm:$0xff] }
 0x18e   : > { %v6367_v32 = vpop.permute.xlu1 %1042  ;;  %v6369_v33 = vpop.permute.xlu0 %1040 }
 0x18f   : > { %8590 = vst [vmem:[#allocation51_spill] sm:$0xff] %v6367_v32  ;;  %8591 = vst [vmem:[#allocation52_spill] sm:$0xff] %v6369_v33  ;;  %v4445_v32 = vld [vmem:[%s5444_s20 + $0x99] sm:$0xff] }
 0x190   : > { %1428 = vrot.lane.b32.xlu1 %v4474_v59, %s5399_s25  ;;  %1302 = vrot.lane.b32.xlu0 %v4443_v61, %s5398_s23  ;;  %v4446_v61 = vld [vmem:[%s5444_s20 + $0xa9] sm:$0xff] }
 0x192   : > { %v6375_v48 = vpop.permute.xlu1 %1046  ;;  %v6377_v26 = vpop.permute.xlu0 %1044 }
 0x193   : > { %8592 = vst [vmem:[#allocation55_spill] sm:$0xff] %v6375_v48  ;;  %8593 = vst [vmem:[#allocation92_spill] sm:$0xff] %v6377_v26  ;;  %v4477_v48 = vld [vmem:[%s5444_s20 + $0x9a] sm:$0xff] }
 0x194   : > { %1304 = vrot.lane.b32.xlu1 %v4444_v23, %s5398_s23  ;;  %1430 = vrot.lane.b32.xlu0 %v4475_v58, %s5399_s25  ;;  %v4478_v58 = vld [vmem:[%s5444_s20 + $0xaa] sm:$0xff] }
 0x195   : > { %v4447_v23 = vld [vmem:[%s5444_s20 + $0xb1] sm:$0xff] }
 0x196   : > { %v6383_v33 = vpop.permute.xlu1 %1050  ;;  %v6385_v59 = vpop.permute.xlu0 %1048 }
 0x197   : > { %8594 = vst [vmem:[#allocation93_spill] sm:$0xff] %v6383_v33  ;;  %8595 = vst [vmem:[#allocation94_spill] sm:$0xff] %v6385_v59 }
 0x198   : > { %1432 = vrot.lane.b32.xlu1 %v4476_v62, %s5399_s25  ;;  %1306 = vrot.lane.b32.xlu0 %v4445_v32, %s5398_s23  ;;  %v4448_v32 = vld [vmem:[%s5444_s20 + $0xc1] sm:$0xff]  ;;  %v4479_v62 = vld [vmem:[%s5444_s20 + $0xb2] sm:$0xff] }
 0x19a   : > { %v6391_v26 = vpop.permute.xlu1 %1054  ;;  %v6393_v2 = vpop.permute.xlu0 %1052 }
 0x19b   : > { %8596 = vst [vmem:[#allocation95_spill] sm:$0xff] %v6391_v26  ;;  %8597 = vst [vmem:[#allocation96_spill] sm:$0xff] %v6393_v2 }
 0x19c   : > { %1308 = vrot.lane.b32.xlu1 %v4446_v61, %s5398_s23  ;;  %1434 = vrot.lane.b32.xlu0 %v4477_v48, %s5399_s25  ;;  %v8600_v61 = vld [vmem:[#allocation39_spill] sm:$0xff] }
 0x19d   : > { %v1530_v48 = vsel %vm1512_vm0, %v8579_v31, %v8600_v61  ;;  %v8603_v61 = vld [vmem:[#allocation44_spill] sm:$0xff] }
 0x19e   : > { %v6399_v33 = vpop.permute.xlu1 %1058  ;;  %v6401_v59 = vpop.permute.xlu0 %1056 }
 0x19f   : > { %8598 = vst [vmem:[#allocation97_spill] sm:$0xff] %v6399_v33  ;;  %v1529_v33 = vsel %vm1512_vm0, %v8580_v29, %v8601_v35  ;;  %v4480_v35 = vld [vmem:[%s5444_s20 + $0xc2] sm:$0xff] }
 0x1a0   : > { %1436 = vrot.lane.b32.xlu1 %v4478_v58, %s5399_s25  ;;  %1310 = vrot.lane.b32.xlu0 %v4447_v23, %s5398_s23  ;;  %v1563_v58 = vsel %vm1545_vm1, %v1530_v48, %v5996_v6  ;;  %v1562_v23 = vsel %vm1545_vm1, %v1529_v33, %v5998_v7  ;;  %v4449_v29 = vld [vmem:[%s5444_s20 + $0xc9] sm:$0xff] }
 0x1a1   : > { %v1595_v31 = vsel %vm1578_vm2, %v1562_v23, %v6126_v39  ;;  %v1531_v39 = vsel %vm1512_vm0, %v8582_v4, %v8603_v61  ;;  %v4481_v23 = vld [vmem:[%s5444_s20 + $0xca] sm:$0xff] }
 0x1a2   : > { %v6407_v26 = vpop.permute.xlu1 %1062  ;;  %v6409_v2 = vpop.permute.xlu0 %1060  ;;  %v1628_v7 = vsel %vm1611_vm3, %v1595_v31, %v6278_v50 }
 0x1a3   : > { %8599 = vst [vmem:[#allocation98_spill] sm:$0xff] %v6407_v26  ;;  %v1596_v26 = vsel %vm1578_vm2, %v1563_v58, %v6124_v38  ;;  %v4450_v58 = vld [vmem:[%s5444_s20 + $0xd9] sm:$0xff] }
 0x1a4   : > { %1312 = vrot.lane.b32.xlu1 %v4448_v32, %s5398_s23  ;;  %1438 = vrot.lane.b32.xlu0 %v4479_v62, %s5399_s25  ;;  %v1629_v6 = vsel %vm1611_vm3, %v1596_v26, %v6276_v28  ;;  %v8602_v62 = vld [vmem:[#allocation43_spill] sm:$0xff]  ;;  %v1564_v26 = vsel %vm1545_vm1, %v1531_v39, %v6006_v9 }
 0x1a5   : > { %v1532_v38 = vsel %vm1512_vm0, %v8581_v36, %v8602_v62  ;;  %v1597_v4 = vsel %vm1578_vm2, %v1564_v26, %v6134_v41  ;;  %v4451_v62 = vld [vmem:[%s5444_s20 + $0xe1] sm:$0xff] }
 0x1a6   : > { %v1067_v33 = vpop.permute.xlu1 %1066  ;;  %v1065_v32 = vpop.permute.xlu0 %1064  ;;  %v1565_v50 = vsel %vm1545_vm1, %v1532_v38, %v6004_v8  ;;  %v1630_v9 = vsel %vm1611_vm3, %v1597_v4, %v6292_v63  ;;  %v8607_v26 = vld [vmem:[#allocation54_spill] sm:$0xff]  ;;  %v4421_v4 = vld [vmem:[%s5444_s20 + $0xf8] sm:$0xff] }
 0x1a7   : > { %v6440_v48 = vsel %vm1644_vm4, %v1629_v6, %v1067_v33  ;;  %v6443_v28 = vsel %vm1644_vm4, %v1628_v7, %v1065_v32  ;;  %v1598_v36 = vsel %vm1578_vm2, %v1565_v50, %v6132_v40  ;;  %v8604_v6 = vld [vmem:[#allocation47_spill] sm:$0xff]  ;;  %v8605_v7 = vld [vmem:[#allocation50_spill] sm:$0xff]  ;;  %v4482_v32 = vld [vmem:[%s5444_s20 + $0xda] sm:$0xff] }
 0x1a8   : > { %1440 = vrot.lane.b32.xlu1 %v4480_v35, %s5399_s25  ;;  %1314 = vrot.lane.b32.xlu0 %v4449_v29, %s5398_s23  ;;  %v1631_v8 = vsel %vm1611_vm3, %v1598_v36, %v6290_v55  ;;  %v1533_v29 = vsel %vm1512_vm0, %v8583_v5, %v8604_v6  ;;  %v1567_v33 = vsel %vm1545_vm1, %v8605_v7, %v6012_v10  ;;  %v8606_v50 = vld [vmem:[#allocation53_spill] sm:$0xff]  ;;  %v4452_v7 = vld [vmem:[%s5444_s20 + $0xf1] sm:$0xff] }
 0x1a9   : > { %v1566_v55 = vsel %vm1545_vm1, %v1533_v29, %v6014_v11  ;;  %v1600_v63 = vsel %vm1578_vm2, %v1567_v33, %v6140_v42  ;;  %v1568_v36 = vsel %vm1545_vm1, %v8607_v26, %v6022_v13  ;;  %v4453_v29 = vld [vmem:[%s5444_s20 + $0xf9] sm:$0xff]  ;;  %v4423_v26 = vld [vmem:[%s5444_s20 + $0x110] sm:$0xff] }
 0x1aa   : > { %v1071_v31 = vpop.permute.xlu1 %1070  ;;  %v1069_v35 = vpop.permute.xlu0 %1068  ;;  %v1599_v5 = vsel %vm1578_vm2, %v1566_v55, %v6142_v43  ;;  %v1633_v10 = vsel %vm1611_vm3, %v1600_v63, %v6301_v30  ;;  %v1569_v43 = vsel %vm1545_vm1, %v8606_v50, %v6020_v12 }
 0x1ab   : > { %v6465_v40 = vsel %vm1644_vm4, %v1631_v8, %v1071_v31  ;;  %v6468_v41 = vsel %vm1644_vm4, %v1630_v9, %v1069_v35  ;;  %v1632_v11 = vsel %vm1611_vm3, %v1599_v5, %v6303_v57  ;;  %v1602_v30 = vsel %vm1578_vm2, %v1569_v43, %v6148_v44  ;;  %v8608_v31 = vld [vmem:[#allocation56_spill] sm:$0xff]  ;;  %v8609_v35 = vld [vmem:[#allocation57_spill] sm:$0xff]  ;;  %v8610_v5 = vld [vmem:[#allocation58_spill] sm:$0xff] }
 0x1ac   : > { %1316 = vrot.lane.b32.xlu1 %v4450_v58, %s5398_s23  ;;  %1442 = vrot.lane.b32.xlu0 %v4481_v23, %s5399_s25  ;;  %v1601_v57 = vsel %vm1578_vm2, %v1568_v36, %v6150_v45  ;;  %v4483_v58 = vld [vmem:[%s5444_s20 + $0xe2] sm:$0xff]  ;;  %v1635_v12 = vsel %vm1611_vm3, %v1602_v30, %v6310_v34  ;;  %v1571_v45 = vsel %vm1545_vm1, %v8608_v31, %v6028_v14 }
 0x1ad   : > { %v1634_v13 = vsel %vm1611_vm3, %v1601_v57, %v6312_v27  ;;  %v1570_v6 = vsel %vm1545_vm1, %v8609_v35, %v6030_v15  ;;  %v1604_v27 = vsel %vm1578_vm2, %v1571_v45, %v6156_v46  ;;  %v1574_v43 = vsel %vm1545_vm1, %v5922_v52, %v6046_v19  ;;  %v4422_v36 = vld [vmem:[%s5444_s20 + $0x108] sm:$0xff]  ;;  %v4487_v35 = vld [vmem:[%s5444_s20 + $0x112] sm:$0xff] }
 0x1ae   : > { %v1075_v38 = vpop.permute.xlu1 %1074  ;;  %v1073_v61 = vpop.permute.xlu0 %1072  ;;  %v1603_v34 = vsel %vm1578_vm2, %v1570_v6, %v6158_v47  ;;  %v1637_v14 = vsel %vm1611_vm3, %v1604_v27, %v6319_v24  ;;  %v1573_v47 = vsel %vm1545_vm1, %v8610_v5, %v6036_v16  ;;  %v4486_v6 = vld [vmem:[%s5444_s20 + $0x10a] sm:$0xff] }
 0x1af   : > { %v6488_v39 = vsel %vm1644_vm4, %v1633_v10, %v1075_v38  ;;  %v6491_v42 = vsel %vm1644_vm4, %v1632_v11, %v1073_v61  ;;  %v1636_v15 = vsel %vm1611_vm3, %v1603_v34, %v6321_v1  ;;  %v1606_v1 = vsel %vm1578_vm2, %v1573_v47, %v6164_v49  ;;  %v4485_v10 = vld [vmem:[%s5444_s20 + $0xfa] sm:$0xff]  ;;  %v4484_v11 = vld [vmem:[%s5444_s20 + $0xf2] sm:$0xff] }
 0x1b0   : > { %1444 = vrot.lane.b32.xlu1 %v4482_v32, %s5399_s25  ;;  %1318 = vrot.lane.b32.xlu0 %v4451_v62, %s5398_s23  ;;  %v8611_v32 = vld [vmem:[#allocation59_spill] sm:$0xff]  ;;  %v1639_v16 = vsel %vm1611_vm3, %v1606_v1, %v6327_v3  ;;  %v1607_v3 = vsel %vm1578_vm2, %v1574_v43, %v6174_v0  ;;  %v1577_v0 = vsel %vm1545_vm1, %v5929_v56, %v6052_v20  ;;  %v8614_v56 = vld [vmem:[#allocation41_spill] sm:$0xff] }
 0x1b1   : > { %v1572_v62 = vsel %vm1545_vm1, %v8611_v32, %v6038_v17  ;;  %v1640_v52 = vsel %vm1611_vm3, %v1607_v3, %v6337_v60  ;;  %v8612_v60 = vld [vmem:[#allocation3_spill] sm:$0xff]  ;;  %v4490_v3 = vld [vmem:[%s5444_s20 + $0x13a] sm:$0xff] }
 0x1b2   : > { %v1079_v23 = vpop.permute.xlu1 %1078  ;;  %v1077_v8 = vpop.permute.xlu0 %1076  ;;  %v1605_v24 = vsel %vm1578_vm2, %v1572_v62, %v6166_v37  ;;  %v1575_v37 = vsel %vm1545_vm1, %v5919_v54, %v6044_v18  ;;  %v1610_v57 = vsel %vm1578_vm2, %v1577_v0, %v8612_v60  ;;  %v4489_v32 = vld [vmem:[%s5444_s20 + $0x12a] sm:$0xff]  ;;  %v4488_v62 = vld [vmem:[%s5444_s20 + $0x122] sm:$0xff] }
 0x1b3   : > { %v6512_v9 = vsel %vm1644_vm4, %v1635_v12, %v1079_v23  ;;  %v6515_v44 = vsel %vm1644_vm4, %v1634_v13, %v1077_v8  ;;  %v1638_v17 = vsel %vm1611_vm3, %v1605_v24, %v6329_v25  ;;  %v1608_v25 = vsel %vm1578_vm2, %v1575_v37, %v6172_v51  ;;  %v4455_v12 = vld [vmem:[%s5444_s20 + $0x111] sm:$0xff]  ;;  %v4454_v13 = vld [vmem:[%s5444_s20 + $0x109] sm:$0xff] }
 0x1b4   : > { %1194 = vrot.lane.b32.xlu1 %v4421_v4, %s5397_s26  ;;  %1446 = vrot.lane.b32.xlu0 %v4483_v58, %s5399_s25  ;;  %v1641_v54 = vsel %vm1611_vm3, %v1608_v25, %v6335_v22  ;;  %v1576_v22 = vsel %vm1545_vm1, %v5932_v53, %v6054_v21  ;;  %v8613_v4 = vld [vmem:[#allocation4_spill] sm:$0xff]  ;;  %v1643_v20 = vsel %vm1611_vm3, %v1610_v57, %v8614_v56  ;;  %v8615_v23 = vld [vmem:[#allocation42_spill] sm:$0xff]  ;;  %v8618_v56 = vld [vmem:[#allocation77_spill] sm:$0xff] }
 0x1b5   : > { %v1609_v58 = vsel %vm1578_vm2, %v1576_v22, %v8613_v4  ;;  %v4491_v25 = vld [vmem:[%s5444_s20 + $0x142] sm:$0xff]  ;;  %v8616_v22 = vld [vmem:[#allocation12_spill] sm:$0xff] }
 0x1b6   : > { %v1083_v33 = vpop.permute.xlu1 %1082  ;;  %v1081_v55 = vpop.permute.xlu0 %1080  ;;  %v1642_v53 = vsel %vm1611_vm3, %v1609_v58, %v8615_v23  ;;  %v199_v57 = vld [vmem:[%s5444_s20 + $0x8] sm:$0xff]  ;;  %v8617_v4 = vld [vmem:[#allocation61_spill] sm:$0xff] }
 0x1b7   : > { %v6536_v63 = vsel %vm1644_vm4, %v1637_v14, %v1083_v33  ;;  %v6539_v46 = vsel %vm1644_vm4, %v1636_v15, %v1081_v55  ;;  %v4457_v33 = vld [vmem:[%s5444_s20 + $0x129] sm:$0xff]  ;;  %v4456_v55 = vld [vmem:[%s5444_s20 + $0x121] sm:$0xff] }
 0x1b8   : > { %1322 = vrot.lane.b32.xlu1 %v4453_v29, %s5398_s23  ;;  %1320 = vrot.lane.b32.xlu0 %v4452_v7, %s5398_s23  ;;  %v4425_v29 = vld [vmem:[%s5444_s20 + $0x128] sm:$0xff]  ;;  %v4424_v7 = vld [vmem:[%s5444_s20 + $0x120] sm:$0xff] }
 0x1ba   : > { %v1087_v38 = vpop.permute.xlu1 %1086  ;;  %v1085_v61 = vpop.permute.xlu0 %1084 }
 0x1bb   : > { %v6560_v50 = vsel %vm1644_vm4, %v1639_v16, %v1087_v38  ;;  %v6563_v49 = vsel %vm1644_vm4, %v1638_v17, %v1085_v61  ;;  %v4459_v38 = vld [vmem:[%s5444_s20 + $0x141] sm:$0xff]  ;;  %v4458_v61 = vld [vmem:[%s5444_s20 + $0x139] sm:$0xff] }
 0x1bc   : > { %1450 = vrot.lane.b32.xlu1 %v4485_v10, %s5399_s25  ;;  %1448 = vrot.lane.b32.xlu0 %v4484_v11, %s5399_s25  ;;  %v4427_v10 = vld [vmem:[%s5444_s20 + $0x140] sm:$0xff]  ;;  %v4426_v11 = vld [vmem:[%s5444_s20 + $0x138] sm:$0xff] }
 0x1be   : > { %v1091_v18 = vpop.permute.xlu1 %1090  ;;  %v1089_v19 = vpop.permute.xlu0 %1088 }
 0x1bf   : > { %v6584_v30 = vsel %vm1644_vm4, %v1641_v54, %v1091_v18  ;;  %v6587_v51 = vsel %vm1644_vm4, %v1640_v52, %v1089_v19  ;;  %v198_v54 = vld [vmem:[%s5444_s20] sm:$0xff]  ;;  %v4429_v52 = vld [vmem:[%s5444_s20 + $0x158] sm:$0xff]  ;;  %v4428_v18 = vld [vmem:[%s5444_s20 + $0x150] sm:$0xff] }
 0x1c0   : > { %1198 = vrot.lane.b32.xlu1 %v4423_v26, %s5397_s26  ;;  %1196 = vrot.lane.b32.xlu0 %v4422_v36, %s5397_s26  ;;  %v1513_v60 = vsel %vm1512_vm0, %v198_v54, %v8616_v22  ;;  %v8624_v54 = vld [vmem:[#allocation5_spill] sm:$0xff]  ;;  %v5353_v22 = vld [vmem:[%s5444_s20 + $0x18] sm:$0xff] }
 0x1c1   : > { %v1546_v58 = vsel %vm1545_vm1, %v1513_v60, %v8617_v4  ;;  %v8625_v60 = vld [vmem:[#allocation11_spill] sm:$0xff] }
 0x1c2   : > { %v1095_v21 = vpop.permute.xlu1 %1094  ;;  %v1093_v8 = vpop.permute.xlu0 %1092 }
 0x1c3   : > { %v6608_v31 = vsel %vm1644_vm4, %v1643_v20, %v1095_v21  ;;  %v6611_v45 = vsel %vm1644_vm4, %v1642_v53, %v1093_v8  ;;  %v1579_v20 = vsel %vm1578_vm2, %v1546_v58, %v8618_v56  ;;  %v8619_v21 = vld [vmem:[#allocation6_spill] sm:$0xff]  ;;  %v8627_v58 = vld [vmem:[#allocation63_spill] sm:$0xff] }
 0x1c4   : > { %1326 = vrot.lane.b32.xlu1 %v4455_v12, %s5398_s23  ;;  %1324 = vrot.lane.b32.xlu0 %v4454_v13, %s5398_s23  ;;  %v4461_v12 = vld [vmem:[%s5444_s20 + $0x159] sm:$0xff]  ;;  %v4460_v13 = vld [vmem:[%s5444_s20 + $0x151] sm:$0xff]  ;;  %v1612_v8 = vsel %vm1611_vm3, %v1579_v20, %v8619_v21 }
 0x1c5   : > { %v4431_v56 = vld [vmem:[%s5444_s20 + $0x170] sm:$0xff]  ;;  %v4430_v20 = vld [vmem:[%s5444_s20 + $0x168] sm:$0xff] }
 0x1c6   : > { %v6617_v27 = vpop.permute.xlu1 %1162  ;;  %v6619_v34 = vpop.permute.xlu0 %1160 }
 0x1c8   : > { %1454 = vrot.lane.b32.xlu1 %v4487_v35, %s5399_s25  ;;  %1452 = vrot.lane.b32.xlu0 %v4486_v6, %s5399_s25  ;;  %v8620_v35 = vld [vmem:[#allocation16_spill] sm:$0xff] }
 0x1c9   : > { %v1514_v6 = vsel %vm1512_vm0, %v199_v57, %v8620_v35  ;;  %v8626_v57 = vld [vmem:[#allocation45_spill] sm:$0xff] }
 0x1ca   : > { %v6625_v14 = vpop.permute.xlu1 %1166  ;;  %v6627_v15 = vpop.permute.xlu0 %1164 }
 0x1cc   : > { %1202 = vrot.lane.b32.xlu1 %v4425_v29, %s5397_s26  ;;  %1200 = vrot.lane.b32.xlu0 %v4424_v7, %s5397_s26  ;;  %v8621_v29 = vld [vmem:[#allocation46_spill] sm:$0xff] }
 0x1cd   : > { %v1645_v7 = vsel %vm1644_vm4, %v1612_v8, %v8621_v29  ;;  %v8629_v29 = vld [vmem:[#allocation8_spill] sm:$0xff] }
 0x1ce   : > { %v6633_v5 = vpop.permute.xlu1 %1170  ;;  %v6635_v47 = vpop.permute.xlu0 %1168 }
 0x1d0   : > { %1330 = vrot.lane.b32.xlu1 %v4457_v33, %s5398_s23  ;;  %1328 = vrot.lane.b32.xlu0 %v4456_v55, %s5398_s23  ;;  %v8622_v33 = vld [vmem:[#allocation60_spill] sm:$0xff] }
 0x1d1   : > { %v1547_v55 = vsel %vm1545_vm1, %v1514_v6, %v8622_v33 }
 0x1d2   : > { %v6641_v1 = vpop.permute.xlu1 %1174  ;;  %v6643_v24 = vpop.permute.xlu0 %1172 }
 0x1d4   : > { %1458 = vrot.lane.b32.xlu1 %v4489_v32, %s5399_s25  ;;  %1456 = vrot.lane.b32.xlu0 %v4488_v62, %s5399_s25  ;;  %v1678_v32 = vsel %vm1677_vm5, %v1645_v7, %v6619_v34  ;;  %v4493_v62 = vld [vmem:[%s5444_s20 + $0x15a] sm:$0xff]  ;;  %v1515_v34 = vsel %vm1512_vm0, %v5353_v22, %v8625_v60 }
 0x1d6   : > { %v6649_v16 = vpop.permute.xlu1 %1178  ;;  %v6651_v17 = vpop.permute.xlu0 %1176 }
 0x1d8   : > { %1206 = vrot.lane.b32.xlu1 %v4427_v10, %s5397_s26  ;;  %1204 = vrot.lane.b32.xlu0 %v4426_v11, %s5397_s26  ;;  %v4492_v10 = vld [vmem:[%s5444_s20 + $0x152] sm:$0xff] }
 0x1d9   : > { %v8623_v11 = vld [vmem:[#allocation76_spill] sm:$0xff] }
 0x1da   : > { %v6657_v37 = vpop.permute.xlu1 %1182  ;;  %v6659_v43 = vpop.permute.xlu0 %1180 }
 0x1dc   : > { %1334 = vrot.lane.b32.xlu1 %v4459_v38, %s5398_s23  ;;  %1332 = vrot.lane.b32.xlu0 %v4458_v61, %s5398_s23  ;;  %v1580_v38 = vsel %vm1578_vm2, %v1547_v55, %v8623_v11  ;;  %v5354_v55 = vld [vmem:[%s5444_s20 + $0x20] sm:$0xff]  ;;  %v8632_v11 = vld [vmem:[#allocation62_spill] sm:$0xff] }
 0x1de   : > { %v6665_v26 = vpop.permute.xlu1 %1186  ;;  %v6667_v36 = vpop.permute.xlu0 %1184 }
 0x1e0   : > { %1462 = vrot.lane.b32.xlu1 %v4491_v25, %s5399_s25  ;;  %1460 = vrot.lane.b32.xlu0 %v4490_v3, %s5399_s25 }
 0x1e2   : > { %v6674_v19 = vpop.permute.xlu1 %1190  ;;  %v6676_v0 = vpop.permute.xlu0 %1188 }
 0x1e4   : > { %1210 = vrot.lane.b32.xlu1 %v4429_v52, %s5397_s26  ;;  %1208 = vrot.lane.b32.xlu0 %v4428_v18, %s5397_s26  ;;  %v1613_v52 = vsel %vm1611_vm3, %v1580_v38, %v8624_v54  ;;  %v8633_v54 = vld [vmem:[#allocation78_spill] sm:$0xff] }
 0x1e5   : > { %v1646_v4 = vsel %vm1644_vm4, %v1613_v52, %v8626_v57 }
 0x1e6   : > { %v1289_v23 = vpop.permute.xlu1 %1288  ;;  %v6689_v53 = vpop.permute.xlu0 %1192 }
 0x1e7   : > { %v1711_v61 = vsel %vm1710_vm6, %v1678_v32, %v1289_v23  ;;  %v8628_v23 = vld [vmem:[#allocation79_spill] sm:$0xff] }
 0x1e8   : > { %1338 = vrot.lane.b32.xlu1 %v4461_v12, %s5398_s23  ;;  %1336 = vrot.lane.b32.xlu0 %v4460_v13, %s5398_s23  ;;  %v1548_v12 = vsel %vm1545_vm1, %v1515_v34, %v8627_v58  ;;  %v1679_v13 = vsel %vm1677_vm5, %v1646_v4, %v6617_v27  ;;  %v8630_v27 = vld [vmem:[#allocation15_spill] sm:$0xff] }
 0x1e9   : > { %v1581_v21 = vsel %vm1578_vm2, %v1548_v12, %v8628_v23  ;;  %v1516_v32 = vsel %vm1512_vm0, %v5354_v55, %v8630_v27  ;;  %v8634_v34 = vld [vmem:[#allocation7_spill] sm:$0xff]  ;;  %v8639_v27 = vld [vmem:[#allocation14_spill] sm:$0xff] }
 0x1ea   : > { %v1417_v25 = vpop.permute.xlu1 %1416  ;;  %v1291_v3 = vpop.permute.xlu0 %1290  ;;  %v1614_v7 = vsel %vm1611_vm3, %v1581_v21, %v8629_v29  ;;  %v1549_v38 = vsel %vm1545_vm1, %v1516_v32, %v8632_v11  ;;  %v5355_v58 = vld [vmem:[%s5444_s20 + $0x30] sm:$0xff] }
 0x1eb   : > { %v1744_v18 = vsel %vm1743_vm7, %v1711_v61, %v1417_v25  ;;  %v1712_v8 = vsel %vm1710_vm6, %v1679_v13, %v1291_v3  ;;  %v4463_v25 = vld [vmem:[%s5444_s20 + $0x171] sm:$0xff]  ;;  %v4462_v3 = vld [vmem:[%s5444_s20 + $0x169] sm:$0xff]  ;;  %v1582_v52 = vsel %vm1578_vm2, %v1549_v38, %v8633_v54 }
 0x1ec   : > { %1466 = vrot.lane.b32.xlu1 %v4493_v62, %s5399_s25  ;;  %1464 = vrot.lane.b32.xlu0 %v4492_v10, %s5399_s25  ;;  %v8631_v62 = vld [vmem:[#allocation49_spill] sm:$0xff]  ;;  %v1615_v57 = vsel %vm1611_vm3, %v1582_v52, %v8634_v34  ;;  %v8636_v13 = vld [vmem:[#allocation48_spill] sm:$0xff]  ;;  %v4433_v52 = vld [vmem:[%s5444_s20 + $0x188] sm:$0xff] }
 0x1ed   : > { %4660 = vmatprep.mubr.msk.f32.mxu0 %vm1790_vm8, %v1744_v18  ;;  %v1647_v10 = vsel %vm1644_vm4, %v1614_v7, %v8631_v62  ;;  %v8641_v38 = vld [vmem:[#allocation52_spill] sm:$0xff] }
 0x1ee   : > { %v1293_v35 = vpop.permute.xlu1 %1292  ;;  %v1419_v6 = vpop.permute.xlu0 %1418  ;;  %v1680_v61 = vsel %vm1677_vm5, %v1647_v10, %v6627_v15  ;;  %v8635_v15 = vld [vmem:[#allocation20_spill] sm:$0xff] }
 0x1ef   : > { %v1745_v33 = vsel %vm1743_vm7, %v1712_v8, %v1419_v6  ;;  %v1713_v18 = vsel %vm1710_vm6, %v1680_v61, %v1293_v35  ;;  %v1517_v12 = vsel %vm1512_vm0, %v5355_v58, %v8635_v15  ;;  %v4495_v8 = vld [vmem:[%s5444_s20 + $0x172] sm:$0xff]  ;;  %v4494_v35 = vld [vmem:[%s5444_s20 + $0x16a] sm:$0xff]  ;;  %v8638_v6 = vld [vmem:[#allocation81_spill] sm:$0xff] }
 0x1f0   : > { %1214 = vrot.lane.b32.xlu1 %v4431_v56, %s5397_s26  ;;  %1212 = vrot.lane.b32.xlu0 %v4430_v20, %s5397_s26  ;;  %v1648_v56 = vsel %vm1644_vm4, %v1615_v57, %v8636_v13  ;;  %v8637_v20 = vld [vmem:[#allocation65_spill] sm:$0xff]  ;;  %v5356_v10 = vld [vmem:[%s5444_s20 + $0x38] sm:$0xff]  ;;  %v5357_v13 = vld [vmem:[%s5444_s20 + $0x48] sm:$0xff] }
 0x1f1   : > { %4661 = vmatmul.mubr.msk.f32.vlgmr.msra.gmra.mrb[0].mxu0 %vm1790_vm8, %v1745_v33  ;;  %v1550_v23 = vsel %vm1545_vm1, %v1517_v12, %v8637_v20  ;;  %v1681_v21 = vsel %vm1677_vm5, %v1648_v56, %v6625_v14  ;;  %v8640_v14 = vld [vmem:[#allocation19_spill] sm:$0xff]  ;;  %v8644_v58 = vld [vmem:[#allocation13_spill] sm:$0xff] }
 0x1f2   : > { %v1421_v22 = vpop.permute.xlu1 %1420  ;;  %v1295_v60 = vpop.permute.xlu0 %1294  ;;  %v1583_v29 = vsel %vm1578_vm2, %v1550_v23, %v8638_v6  ;;  %v1518_v11 = vsel %vm1512_vm0, %v5356_v10, %v8640_v14  ;;  %v8646_v20 = vld [vmem:[#allocation51_spill] sm:$0xff] }
 0x1f3   : > { %v1746_v4 = vsel %vm1743_vm7, %v1713_v18, %v1421_v22  ;;  %v1714_v7 = vsel %vm1710_vm6, %v1681_v21, %v1295_v60  ;;  %v1616_v32 = vsel %vm1611_vm3, %v1583_v29, %v8639_v27  ;;  %v4432_v18 = vld [vmem:[%s5444_s20 + $0x180] sm:$0xff]  ;;  %v8643_v22 = vld [vmem:[#allocation80_spill] sm:$0xff]  ;;  %v8647_v21 = vld [vmem:[#allocation67_spill] sm:$0xff] }
 0x1f4   : > { %1342 = vrot.lane.b32.xlu1 %v4463_v25, %s5398_s23  ;;  %1340 = vrot.lane.b32.xlu0 %v4462_v3, %s5398_s23  ;;  %v1649_v61 = vsel %vm1644_vm4, %v1616_v32, %v8641_v38  ;;  %v8642_v25 = vld [vmem:[#allocation64_spill] sm:$0xff]  ;;  %v4465_v6 = vld [vmem:[%s5444_s20 + $0x189] sm:$0xff]  ;;  %v4464_v29 = vld [vmem:[%s5444_s20 + $0x181] sm:$0xff] }
 0x1f5   : > { %4663 = vmatprep.mubr.msk.f32.mxu0 %vm1790_vm8, %v1746_v4  ;;  %v1551_v3 = vsel %vm1545_vm1, %v1518_v11, %v8642_v25  ;;  %v1682_v54 = vsel %vm1677_vm5, %v1649_v61, %v6635_v47  ;;  %v8645_v47 = vld [vmem:[#allocation22_spill] sm:$0xff]  ;;  %v5358_v11 = vld [vmem:[%s5444_s20 + $0x50] sm:$0xff]  ;;  %v8650_v38 = vld [vmem:[#allocation21_spill] sm:$0xff] }
 0x1f6   : > { %v1297_v33 = vpop.permute.xlu1 %1296  ;;  %v1423_v55 = vpop.permute.xlu0 %1422  ;;  %v1584_v60 = vsel %vm1578_vm2, %v1551_v3, %v8643_v22  ;;  %v1519_v56 = vsel %vm1512_vm0, %v5357_v13, %v8645_v47  ;;  %v8651_v61 = vld [vmem:[#allocation92_spill] sm:$0xff]  ;;  %v8652_v3 = vld [vmem:[#allocation66_spill] sm:$0xff]  ;;  %v8656_v47 = vld [vmem:[#allocation55_spill] sm:$0xff] }
 0x1f7   : > { %v1747_v62 = vsel %vm1743_vm7, %v1714_v7, %v1423_v55  ;;  %v1715_v34 = vsel %vm1710_vm6, %v1682_v54, %v1297_v33  ;;  %v1617_v15 = vsel %vm1611_vm3, %v1584_v60, %v8644_v58  ;;  %v8648_v7 = vld [vmem:[#allocation83_spill] sm:$0xff]  ;;  %v8655_v13 = vld [vmem:[#allocation24_spill] sm:$0xff] }
 0x1f8   : > { %1470 = vrot.lane.b32.xlu1 %v4495_v8, %s5399_s25  ;;  %1468 = vrot.lane.b32.xlu0 %v4494_v35, %s5399_s25  ;;  %v1650_v23 = vsel %vm1644_vm4, %v1617_v15, %v8646_v20  ;;  %v1552_v8 = vsel %vm1545_vm1, %v1519_v56, %v8647_v21  ;;  %v8657_v20 = vld [vmem:[#allocation9_spill] sm:$0xff] }
 0x1f9   : > { %4664 = vmatmul.mubr.msk.f32.gmra.mrb[2].mxu0 %vm1790_vm8, %v1747_v62  ;;  %v1683_v35 = vsel %vm1677_vm5, %v1650_v23, %v6633_v5  ;;  %v1585_v33 = vsel %vm1578_vm2, %v1552_v8, %v8648_v7  ;;  %v8649_v62 = vld [vmem:[#allocation18_spill] sm:$0xff]  ;;  %v1520_v5 = vsel %vm1512_vm0, %v5358_v11, %v8650_v38  ;;  %v8659_v21 = vld [vmem:[#allocation69_spill] sm:$0xff] }
 0x1fa   : > { %v1425_v57 = vpop.permute.xlu1 %1424  ;;  %v1299_v4 = vpop.permute.xlu0 %1298  ;;  %v1618_v10 = vsel %vm1611_vm3, %v1585_v33, %v8649_v62  ;;  %v1553_v54 = vsel %vm1545_vm1, %v1520_v5, %v8652_v3  ;;  %v8658_v23 = vld [vmem:[#allocation10_spill] sm:$0xff]  ;;  %v8660_v7 = vld [vmem:[#allocation85_spill] sm:$0xff] }
 0x1fb   : > { %v1748_v12 = vsel %vm1743_vm7, %v1715_v34, %v1425_v57  ;;  %v1716_v55 = vsel %vm1710_vm6, %v1683_v35, %v1299_v4  ;;  %v1651_v25 = vsel %vm1644_vm4, %v1618_v10, %v8651_v61  ;;  %v8654_v4 = vld [vmem:[#allocation17_spill] sm:$0xff]  ;;  %v8661_v62 = vld [vmem:[#allocation26_spill] sm:$0xff] }
 0x1fc   : > { %1218 = vrot.lane.b32.xlu1 %v4433_v52, %s5397_s26  ;;  %1216 = vrot.lane.b32.xlu0 %v4432_v18, %s5397_s26  ;;  %v1684_v52 = vsel %vm1677_vm5, %v1651_v25, %v6643_v24  ;;  %v8653_v18 = vld [vmem:[#allocation82_spill] sm:$0xff]  ;;  %v8664_v25 = vld [vmem:[#allocation68_spill] sm:$0xff] }
 0x1fd   : > { %4666 = vmatprep.mubr.msk.f32.mxu0 %vm1790_vm8, %v1748_v12  ;;  %v1586_v22 = vsel %vm1578_vm2, %v1553_v54, %v8653_v18  ;;  %v5359_v12 = vld [vmem:[%s5444_s20 + $0x60] sm:$0xff]  ;;  %v5360_v11 = vld [vmem:[%s5444_s20 + $0x68] sm:$0xff] }
 0x1fe   : > { %v1301_v27 = vpop.permute.xlu1 %1300  ;;  %v1427_v32 = vpop.permute.xlu0 %1426  ;;  %v1619_v58 = vsel %vm1611_vm3, %v1586_v22, %v8654_v4  ;;  %v1521_v24 = vsel %vm1512_vm0, %v5359_v12, %v8655_v13  ;;  %v8663_v5 = vld [vmem:[#allocation94_spill] sm:$0xff]  ;;  %v4466_v18 = vld [vmem:[%s5444_s20 + $0x199] sm:$0xff] }
 0x1ff   : > { %v1749_v14 = vsel %vm1743_vm7, %v1716_v55, %v1427_v32  ;;  %v1717_v60 = vsel %vm1710_vm6, %v1684_v52, %v1301_v27  ;;  %v1652_v56 = vsel %vm1644_vm4, %v1619_v58, %v8656_v47  ;;  %v1554_v8 = vsel %vm1545_vm1, %v1521_v24, %v8659_v21  ;;  %v4467_v52 = vld [vmem:[%s5444_s20 + $0x1a1] sm:$0xff]  ;;  %v8665_v22 = vld [vmem:[#allocation84_spill] sm:$0xff] }
 0x200   : > { %1346 = vrot.lane.b32.xlu1 %v4465_v6, %s5398_s23  ;;  %1344 = vrot.lane.b32.xlu0 %v4464_v29, %s5398_s23  ;;  %v1685_v35 = vsel %vm1677_vm5, %v1652_v56, %v6641_v1  ;;  %v4435_v6 = vld [vmem:[%s5444_s20 + $0x1a0] sm:$0xff]  ;;  %v4434_v29 = vld [vmem:[%s5444_s20 + $0x198] sm:$0xff]  ;;  %v1587_v33 = vsel %vm1578_vm2, %v1554_v8, %v8660_v7  ;;  %v8662_v1 = vld [vmem:[#allocation23_spill] sm:$0xff] }
 0x201   : > { %4667 = vmatmul.mubr.msk.f32.gmra.mrb[4].mxu0 %vm1790_vm8, %v1749_v14  ;;  %v1620_v10 = vsel %vm1611_vm3, %v1587_v33, %v8661_v62  ;;  %v1522_v38 = vsel %vm1512_vm0, %v5360_v11, %v8662_v1  ;;  %v8666_v58 = vld [vmem:[#allocation25_spill] sm:$0xff]  ;;  %v5361_v13 = vld [vmem:[%s5444_s20 + $0x78] sm:$0xff] }
 0x202   : > { %v1429_v34 = vpop.permute.xlu1 %1428  ;;  %v1303_v57 = vpop.permute.xlu0 %1302  ;;  %v1653_v61 = vsel %vm1644_vm4, %v1620_v10, %v8663_v5  ;;  %v1555_v3 = vsel %vm1545_vm1, %v1522_v38, %v8664_v25  ;;  %v8668_v47 = vld [vmem:[#allocation93_spill] sm:$0xff]  ;;  %v8673_v11 = vld [vmem:[#allocation96_spill] sm:$0xff]  ;;  %v8674_v38 = vld [vmem:[#allocation70_spill] sm:$0xff] }
 0x203   : > { %v1750_v15 = vsel %vm1743_vm7, %v1717_v60, %v1429_v34  ;;  %v1718_v55 = vsel %vm1710_vm6, %v1685_v35, %v1303_v57  ;;  %v1686_v54 = vsel %vm1677_vm5, %v1653_v61, %v6651_v17  ;;  %v1588_v60 = vsel %vm1578_vm2, %v1555_v3, %v8665_v22  ;;  %v8667_v17 = vld [vmem:[#allocation28_spill] sm:$0xff]  ;;  %v4499_v8 = vld [vmem:[%s5444_s20 + $0x1a2] sm:$0xff] }
 0x204   : > { %1474 = vrot.lane.b32.xlu1 %v8657_v20, %s5399_s25  ;;  %1472 = vrot.lane.b32.xlu0 %v8658_v23, %s5399_s25  ;;  %v1523_v24 = vsel %vm1512_vm0, %v5361_v13, %v8667_v17  ;;  %v8669_v20 = vld [vmem:[#allocation71_spill] sm:$0xff]  ;;  %v4498_v35 = vld [vmem:[%s5444_s20 + $0x19a] sm:$0xff]  ;;  %v8675_v25 = vld [vmem:[#allocation86_spill] sm:$0xff] }
 0x205   : > { %4669 = vmatprep.mubr.msk.f32.mxu0 %vm1790_vm8, %v1750_v15  ;;  %v1621_v15 = vsel %vm1611_vm3, %v1588_v60, %v8666_v58  ;;  %v1556_v23 = vsel %vm1545_vm1, %v1523_v24, %v8669_v20  ;;  %v5362_v10 = vld [vmem:[%s5444_s20 + $0x80] sm:$0xff] }
 0x206   : > { %v1305_v27 = vpop.permute.xlu1 %1304  ;;  %v1431_v32 = vpop.permute.xlu0 %1430  ;;  %v1654_v56 = vsel %vm1644_vm4, %v1621_v15, %v8668_v47  ;;  %v8676_v22 = vld [vmem:[#allocation29_spill] sm:$0xff] }
 0x207   : > { %v1751_v14 = vsel %vm1743_vm7, %v1718_v55, %v1431_v32  ;;  %v1719_v34 = vsel %vm1710_vm6, %v1686_v54, %v1305_v27  ;;  %v1687_v21 = vsel %vm1677_vm5, %v1654_v56, %v6649_v16  ;;  %v8671_v27 = vld [vmem:[#allocation30_spill] sm:$0xff]  ;;  %v8680_v24 = vld [vmem:[#allocation89_spill] sm:$0xff] }
 0x208   : > { %1222 = vrot.lane.b32.xlu1 %v4435_v6, %s5397_s26  ;;  %1220 = vrot.lane.b32.xlu0 %v4434_v29, %s5397_s26  ;;  %v8670_v6 = vld [vmem:[#allocation87_spill] sm:$0xff] }
 0x209   : > { %4670 = vmatmul.mubr.msk.f32.gmra.mrb[6].mxu0 %vm1790_vm8, %v1751_v14  ;;  %v1589_v29 = vsel %vm1578_vm2, %v1556_v23, %v8670_v6  ;;  %v8672_v14 = vld [vmem:[#allocation27_spill] sm:$0xff]  ;;  %v5364_v6 = vld [vmem:[%s5444_s20 + $0x98] sm:$0xff] }
 0x20a   : > { %v1433_v57 = vpop.permute.xlu1 %1432  ;;  %v1307_v4 = vpop.permute.xlu0 %1306  ;;  %v1622_v32 = vsel %vm1611_vm3, %v1589_v29, %v8671_v27  ;;  %v1524_v16 = vsel %vm1512_vm0, %v5362_v10, %v8672_v14  ;;  %v8682_v29 = vld [vmem:[#allocation31_spill] sm:$0xff] }
 0x20b   : > { %v1752_v12 = vsel %vm1743_vm7, %v1719_v34, %v1433_v57  ;;  %v1720_v7 = vsel %vm1710_vm6, %v1687_v21, %v1307_v4  ;;  %v1655_v1 = vsel %vm1644_vm4, %v1622_v32, %v8673_v11  ;;  %v1557_v5 = vsel %vm1545_vm1, %v1524_v16, %v8674_v38  ;;  %v5363_v57 = vld [vmem:[%s5444_s20 + $0x90] sm:$0xff]  ;;  %v8677_v4 = vld [vmem:[#allocation32_spill] sm:$0xff]  ;;  %v8681_v21 = vld [vmem:[#allocation34_spill] sm:$0xff] }
 0x20c   : > { %1350 = vrot.lane.b32.xlu1 %v4467_v52, %s5398_s23  ;;  %1348 = vrot.lane.b32.xlu0 %v4466_v18, %s5398_s23  ;;  %v1688_v61 = vsel %vm1677_vm5, %v1655_v1, %v6659_v43  ;;  %v1590_v3 = vsel %vm1578_vm2, %v1557_v5, %v8675_v25  ;;  %v1525_v58 = vsel %vm1512_vm0, %v5363_v57, %v8677_v4  ;;  %v8678_v43 = vld [vmem:[#allocation95_spill] sm:$0xff]  ;;  %v8684_v32 = vld [vmem:[#allocation88_spill] sm:$0xff]  ;;  %v8685_v11 = vld [vmem:[#allocation33_spill] sm:$0xff]  ;;  %s5402_s23 = smov 96  }
 0x20d   : > { %4672 = vmatprep.mubr.msk.f32.mxu0 %vm1790_vm8, %v1752_v12  ;;  %v1623_v60 = vsel %vm1611_vm3, %v1590_v3, %v8676_v22  ;;  %v8679_v12 = vld [vmem:[#allocation73_spill] sm:$0xff]  ;;  %v5365_v38 = vld [vmem:[%s5444_s20 + $0xa8] sm:$0xff]  ;;  %v8686_v5 = vld [vmem:[#allocation36_spill] sm:$0xff] }
 0x20e   : > { %v1309_v33 = vpop.permute.xlu1 %1308  ;;  %v1435_v55 = vpop.permute.xlu0 %1434  ;;  %v1656_v15 = vsel %vm1644_vm4, %v1623_v60, %v8678_v43  ;;  %v1558_v13 = vsel %vm1545_vm1, %v1525_v58, %v8679_v12  ;;  %v8687_v25 = vld [vmem:[#allocation97_spill] sm:$0xff]  ;;  %v8688_v3 = vld [vmem:[#allocation75_spill] sm:$0xff]  ;;  %v8690_v4 = vld [vmem:[#allocation38_spill] sm:$0xff] }
 0x20f   : > { %v1753_v62 = vsel %vm1743_vm7, %v1720_v7, %v1435_v55  ;;  %v1721_v54 = vsel %vm1710_vm6, %v1688_v61, %v1309_v33  ;;  %v1689_v17 = vsel %vm1677_vm5, %v1656_v15, %v6657_v37  ;;  %v1591_v47 = vsel %vm1578_vm2, %v1558_v13, %v8680_v24  ;;  %v8683_v33 = vld [vmem:[#allocation72_spill] sm:$0xff]  ;;  %v5366_v15 = vld [vmem:[%s5444_s20 + $0xb0] sm:$0xff] }
 0x210   : > { %1478 = vrot.lane.b32.xlu1 %v4499_v8, %s5399_s25  ;;  %1476 = vrot.lane.b32.xlu0 %v4498_v35, %s5399_s25  ;;  %v1624_v8 = vsel %vm1611_vm3, %v1591_v47, %v8681_v21  ;;  %v1526_v7 = vsel %vm1512_vm0, %v5364_v6, %v8682_v29  ;;  %v1527_v61 = vsel %vm1512_vm0, %v5365_v38, %v8686_v5  ;;  %v8691_v12 = vld [vmem:[#allocation35_spill] sm:$0xff]  ;;  %v8695_v29 = vld [vmem:[#allocation98_spill] sm:$0xff] }
 0x211   : > { %4673 = vmatmul.mubr.msk.f32.gmra.mrb[8].mxu0 %vm1790_vm8, %v1753_v62  ;;  %v1657_v37 = vsel %vm1644_vm4, %v1624_v8, %v6401_v59  ;;  %v1559_v55 = vsel %vm1545_vm1, %v1526_v7, %v8683_v33  ;;  %v1528_v13 = vsel %vm1512_vm0, %v5366_v15, %v8691_v12 }
 0x212   : > { %v1437_v52 = vpop.permute.xlu1 %1436  ;;  %v1311_v18 = vpop.permute.xlu0 %1310  ;;  %v1690_v27 = vsel %vm1677_vm5, %v1657_v37, %v6667_v36  ;;  %v1592_v62 = vsel %vm1578_vm2, %v1559_v55, %v8684_v32 }
 0x213   : > { %v1754_v34 = vsel %vm1743_vm7, %v1721_v54, %v1437_v52  ;;  %v1722_v56 = vsel %vm1710_vm6, %v1689_v17, %v1311_v18  ;;  %v1625_v1 = vsel %vm1611_vm3, %v1592_v62, %v8685_v11  ;;  %v1560_v54 = vsel %vm1545_vm1, %v1527_v61, %v8688_v3  ;;  %v8689_v18 = vld [vmem:[#allocation91_spill] sm:$0xff] }
 0x214   : > { %4675 = vmatprep.mubr.msk.f32.mxu0 %vm1790_vm8, %v1754_v34  ;;  %v1658_v36 = vsel %vm1644_vm4, %v1625_v1, %v8687_v25  ;;  %v1593_v22 = vsel %vm1578_vm2, %v1560_v54, %v8689_v18 }
 0x215   : > { %v1691_v52 = vsel %vm1677_vm5, %v1658_v36, %v6665_v26  ;;  %v1626_v58 = vsel %vm1611_vm3, %v1593_v22, %v8690_v4  ;;  %v8692_v26 = vld [vmem:[#allocation74_spill] sm:$0xff] }
 0x216   : > { %v1313_v20 = vpop.permute.xlu1 %1312  ;;  %v1439_v23 = vpop.permute.xlu0 %1438  ;;  %v1659_v17 = vsel %vm1644_vm4, %v1626_v58, %v6409_v2  ;;  %v1561_v24 = vsel %vm1545_vm1, %v1528_v13, %v8692_v26  ;;  %v5400_v26 = vmov 0.0  }
 0x217   : > { %v1755_v35 = vsel %vm1743_vm7, %v1722_v56, %v1439_v23  ;;  %v1723_v10 = vsel %vm1710_vm6, %v1690_v27, %v1313_v20  ;;  %v1692_v47 = vsel %vm1677_vm5, %v1659_v17, %v6676_v0  ;;  %v8693_v56 = vld [vmem:[#allocation90_spill] sm:$0xff]  ;;  %2149 = vst.msk [vmem:[#allocation2 + $0x20] sm:$0xff] %vm1545_vm1, %v5400_v26  ;;  %2144 = vst.msk [vmem:[#allocation2] sm:$0xff] %vm1545_vm1, %v5400_v26 }
 0x218   : > { %4676 = vmatmul.mubr.msk.f32.gmra.mrb[10].mxu0 %vm1790_vm8, %v1755_v35  ;;  %v1594_v20 = vsel %vm1578_vm2, %v1561_v24, %v8693_v56  ;;  %v8694_v35 = vld [vmem:[#allocation37_spill] sm:$0xff]  ;;  %2150 = vst.msk [vmem:[#allocation2 + $0x28] sm:$0x3] %vm2146_vm9, %v5400_v26  ;;  %2147 = vst.msk [vmem:[#allocation2 + $0x10] sm:$0x3] %vm2146_vm9, %v5400_v26 }
 0x219   : > { %v1627_v6 = vsel %vm1611_vm3, %v1594_v20, %v8694_v35  ;;  %2145 = vst.msk [vmem:[#allocation2 + $0x8] sm:$0xff] %vm1545_vm1, %v5400_v26  ;;  %2148 = vst.msk [vmem:[#allocation2 + $0x18] sm:$0xff] %vm1545_vm1, %v5400_v26 }
 0x21a   : > { %v1441_v14 = vpop.permute.xlu1 %1440  ;;  %v1315_v16 = vpop.permute.xlu0 %1314  ;;  %v1660_v7 = vsel %vm1644_vm4, %v1627_v6, %v8695_v29  ;;  %2151 = vst.msk [vmem:[#allocation2 + $0x30] sm:$0xff] %vm1545_vm1, %v5400_v26  ;;  %2152 = vst.msk [vmem:[#allocation2 + $0x38] sm:$0xff] %vm1545_vm1, %v5400_v26 }
 0x21b   : > { %v1756_v59 = vsel %vm1743_vm7, %v1723_v10, %v1441_v14  ;;  %v1724_v60 = vsel %vm1710_vm6, %v1691_v52, %v1315_v16  ;;  %v1693_v0 = vsel %vm1677_vm5, %v1660_v7, %v6674_v19  ;;  %v1694_v10 = vsel %vm1677_vm5, %v6443_v28, %v6689_v53  ;;  %2153 = vst.msk [vmem:[#allocation2 + $0x40] sm:$0x3] %vm2146_vm9, %v5400_v26 }
 0x21c   : > { %4678 = vmatprep.mubr.msk.f32.mxu0 %vm1790_vm8, %v1756_v59  ;;  %2154 = vst.msk [vmem:[#allocation2 + $0x48] sm:$0xff] %vm1545_vm1, %v5400_v26  ;;  %2155 = vst.msk [vmem:[#allocation2 + $0x50] sm:$0xff] %vm1545_vm1, %v5400_v26 }
 0x21d   : > { %2156 = vst.msk [vmem:[#allocation2 + $0x58] sm:$0x3] %vm2146_vm9, %v5400_v26  ;;  %2159 = vst.msk [vmem:[#allocation2 + $0x70] sm:$0x3] %vm2146_vm9, %v5400_v26 }
 0x21e   : > { %v1317_v34 = vpop.permute.xlu1 %1316  ;;  %v1443_v57 = vpop.permute.xlu0 %1442  ;;  %2157 = vst.msk [vmem:[#allocation2 + $0x60] sm:$0xff] %vm1545_vm1, %v5400_v26  ;;  %2158 = vst.msk [vmem:[#allocation2 + $0x68] sm:$0xff] %vm1545_vm1, %v5400_v26 }
 0x21f   : > { %v1757_v43 = vsel %vm1743_vm7, %v1724_v60, %v1443_v57  ;;  %v1725_v23 = vsel %vm1710_vm6, %v1692_v47, %v1317_v34  ;;  %2160 = vst.msk [vmem:[#allocation2 + $0x78] sm:$0xff] %vm1545_vm1, %v5400_v26  ;;  %2161 = vst.msk [vmem:[#allocation2 + $0x80] sm:$0xff] %vm1545_vm1, %v5400_v26 }
 0x220   : > { %4679 = vmatmul.mubr.msk.f32.gmra.mrb[12].mxu0 %vm1790_vm8, %v1757_v43  ;;  %2162 = vst.msk [vmem:[#allocation2 + $0x88] sm:$0x3] %vm2146_vm9, %v5400_v26  ;;  %2165 = vst.msk [vmem:[#allocation2 + $0xa0] sm:$0x3] %vm2146_vm9, %v5400_v26  ;;  %v2264_v29 = vld [vmem:[#allocation2 + $0x1] sm:$0xff]  ;;  %v2265_v7 = vld [vmem:[#allocation2 + $0x9] sm:$0xff] }
 0x221   : > { %2163 = vst.msk [vmem:[#allocation2 + $0x90] sm:$0xff] %vm1545_vm1, %v5400_v26  ;;  %2164 = vst.msk [vmem:[#allocation2 + $0x98] sm:$0xff] %vm1545_vm1, %v5400_v26 }
 0x222   : > { %v1445_v21 = vpop.permute.xlu1 %1444  ;;  %v1319_v8 = vpop.permute.xlu0 %1318  ;;  %2166 = vst.msk [vmem:[#allocation2 + $0xa8] sm:$0xff] %vm1545_vm1, %v5400_v26  ;;  %2167 = vst.msk [vmem:[#allocation2 + $0xb0] sm:$0xff] %vm1545_vm1, %v5400_v26 }
 0x223   : > { %v1758_v2 = vsel %vm1743_vm7, %v1725_v23, %v1445_v21  ;;  %v1726_v37 = vsel %vm1710_vm6, %v1693_v0, %v1319_v8  ;;  %2168 = vst.msk [vmem:[#allocation2 + $0xb8] sm:$0x3] %vm2146_vm9, %v5400_v26  ;;  %2171 = vst.msk [vmem:[#allocation2 + $0xd0] sm:$0x3] %vm2146_vm9, %v5400_v26 }
 0x224   : > { %4681 = vmatprep.mubr.msk.f32.mxu0 %vm1790_vm8, %v1758_v2  ;;  %2169 = vst.msk [vmem:[#allocation2 + $0xc0] sm:$0xff] %vm1545_vm1, %v5400_v26  ;;  %2170 = vst.msk [vmem:[#allocation2 + $0xc8] sm:$0xff] %vm1545_vm1, %v5400_v26 }
 0x225   : > { %2172 = vst.msk [vmem:[#allocation2 + $0xd8] sm:$0xff] %vm1545_vm1, %v5400_v26  ;;  %2173 = vst.msk [vmem:[#allocation2 + $0xe0] sm:$0xff] %vm1545_vm1, %v5400_v26 }
 0x226   : > { %v1195_v33 = vpop.permute.xlu1 %1194  ;;  %v1447_v55 = vpop.permute.xlu0 %1446  ;;  %2174 = vst.msk [vmem:[#allocation2 + $0xe8] sm:$0x3] %vm2146_vm9, %v5400_v26  ;;  %2177 = vst.msk [vmem:[#allocation2 + $0x100] sm:$0x3] %vm2146_vm9, %v5400_v26 }
 0x227   : > { %v1759_v27 = vsel %vm1743_vm7, %v1726_v37, %v1447_v55  ;;  %v1695_v14 = vsel %vm1677_vm5, %v6440_v48, %v1195_v33  ;;  %2175 = vst.msk [vmem:[#allocation2 + $0xf0] sm:$0xff] %vm1545_vm1, %v5400_v26  ;;  %2176 = vst.msk [vmem:[#allocation2 + $0xf8] sm:$0xff] %vm1545_vm1, %v5400_v26  ;;  %v4793_v37 = vpack.i.bf16 %v2265_v7, %v2264_v29 }
 0x228   : > { %4682 = vmatmul.mubr.msk.f32.gmra.mrb[14].mxu0 %vm1790_vm8, %v1759_v27  ;;  %2178 = vst.msk [vmem:[#allocation2 + $0x108] sm:$0xff] %vm1545_vm1, %v5400_v26  ;;  %2179 = vst.msk [vmem:[#allocation2 + $0x110] sm:$0xff] %vm1545_vm1, %v5400_v26 }
 0x229   : > { %2180 = vst.msk [vmem:[#allocation2 + $0x118] sm:$0x3] %vm2146_vm9, %v5400_v26  ;;  %2183 = vst.msk [vmem:[#allocation2 + $0x130] sm:$0x3] %vm2146_vm9, %v5400_v26  ;;  %4794 = vrot.lane.b32.xlu0 %v4793_v37, %s5393_s22 }
 0x22a   : > { %v1323_v32 = vpop.permute.xlu1 %1322  ;;  %v1321_v62 = vpop.permute.xlu0 %1320  ;;  %2181 = vst.msk [vmem:[#allocation2 + $0x120] sm:$0xff] %vm1545_vm1, %v5400_v26  ;;  %2182 = vst.msk [vmem:[#allocation2 + $0x128] sm:$0xff] %vm1545_vm1, %v5400_v26 }
 0x22b   : > { %v1728_v16 = vsel %vm1710_vm6, %v1695_v14, %v1323_v32  ;;  %v1727_v19 = vsel %vm1710_vm6, %v1694_v10, %v1321_v62  ;;  %2184 = vst.msk [vmem:[#allocation2 + $0x138] sm:$0xff] %vm1545_vm1, %v5400_v26  ;;  %2185 = vst.msk [vmem:[#allocation2 + $0x140] sm:$0xff] %vm1545_vm1, %v5400_v26 }
 0x22c   : > { %2186 = vst.msk [vmem:[#allocation2 + $0x148] sm:$0x3] %vm2146_vm9, %v5400_v26  ;;  %2189 = vst.msk [vmem:[#allocation2 + $0x160] sm:$0x3] %vm2146_vm9, %v5400_v26 }
 0x22d   : > { %2187 = vst.msk [vmem:[#allocation2 + $0x150] sm:$0xff] %vm1545_vm1, %v5400_v26  ;;  %2188 = vst.msk [vmem:[#allocation2 + $0x158] sm:$0xff] %vm1545_vm1, %v5400_v26 }
 0x22e   : > { %v1451_v11 = vpop.permute.xlu1 %1450  ;;  %v1449_v1 = vpop.permute.xlu0 %1448  ;;  %2190 = vst.msk [vmem:[#allocation2 + $0x168] sm:$0xff] %vm1545_vm1, %v5400_v26  ;;  %2191 = vst.msk [vmem:[#allocation2 + $0x170] sm:$0xff] %vm1545_vm1, %v5400_v26 }
 0x22f   : > { %v1761_v59 = vsel %vm1743_vm7, %v1728_v16, %v1451_v11  ;;  %v1760_v38 = vsel %vm1743_vm7, %v1727_v19, %v1449_v1  ;;  %2192 = vst.msk [vmem:[#allocation2 + $0x178] sm:$0x3] %vm2146_vm9, %v5400_v26  ;;  %2195 = vst.msk [vmem:[#allocation2 + $0x190] sm:$0x3] %vm2146_vm9, %v5400_v26 }
 0x230   : > { %4684 = vmatprep.mubr.msk.f32.mxu0 %vm1790_vm8, %v1760_v38  ;;  %2193 = vst.msk [vmem:[#allocation2 + $0x180] sm:$0xff] %vm1545_vm1, %v5400_v26  ;;  %2194 = vst.msk [vmem:[#allocation2 + $0x188] sm:$0xff] %vm1545_vm1, %v5400_v26 }
 0x231   : > { %4685 = vmatmul.mubr.msk.f32.gmra.mrb[16].mxu0 %vm1790_vm8, %v1761_v59  ;;  %2196 = vst.msk [vmem:[#allocation2 + $0x198] sm:$0xff] %vm1545_vm1, %v5400_v26  ;;  %2197 = vst.msk [vmem:[#allocation2 + $0x1a0] sm:$0xff] %vm1545_vm1, %v5400_v26 }
 0x232   : > { %v1199_v5 = vpop.permute.xlu1 %1198  ;;  %v1197_v61 = vpop.permute.xlu0 %1196  ;;  %2198 = vst.msk [vmem:[#allocation2 + $0x1a8] sm:$0x3] %vm2146_vm9, %v5400_v26 }
 0x233   : > { %v1697_v48 = vsel %vm1677_vm5, %v6465_v40, %v1199_v5  ;;  %v1696_v25 = vsel %vm1677_vm5, %v6468_v41, %v1197_v61 }
 0x236   : > { %v1327_v28 = vpop.permute.xlu1 %1326  ;;  %v1325_v53 = vpop.permute.xlu0 %1324 }
 0x237   : > { %v1730_v36 = vsel %vm1710_vm6, %v1697_v48, %v1327_v28  ;;  %v1729_v3 = vsel %vm1710_vm6, %v1696_v25, %v1325_v53 }
 0x23a   : > { %v1455_v54 = vpop.permute.xlu1 %1454  ;;  %v1453_v52 = vpop.permute.xlu0 %1452 }
 0x23b   : > { %v1763_v18 = vsel %vm1743_vm7, %v1730_v36, %v1455_v54  ;;  %v1762_v22 = vsel %vm1743_vm7, %v1729_v3, %v1453_v52 }
 0x23c   : > { %4687 = vmatprep.mubr.msk.f32.mxu0 %vm1790_vm8, %v1762_v22 }
 0x23d   : > { %4688 = vmatmul.mubr.msk.f32.gmra.mrb[18].mxu0 %vm1790_vm8, %v1763_v18 }
 0x23e   : > { %v1203_v60 = vpop.permute.xlu1 %1202  ;;  %v1201_v34 = vpop.permute.xlu0 %1200 }
 0x23f   : > { %v1699_v41 = vsel %vm1677_vm5, %v6488_v39, %v1203_v60  ;;  %v1698_v4 = vsel %vm1677_vm5, %v6491_v42, %v1201_v34 }
 0x242   : > { %v1331_v40 = vpop.permute.xlu1 %1330  ;;  %v1329_v57 = vpop.permute.xlu0 %1328 }
 0x243   : > { %v1732_v58 = vsel %vm1710_vm6, %v1699_v41, %v1331_v40  ;;  %v1731_v43 = vsel %vm1710_vm6, %v1698_v4, %v1329_v57 }
 0x246   : > { %v1459_v15 = vpop.permute.xlu1 %1458  ;;  %v1457_v12 = vpop.permute.xlu0 %1456 }
 0x247   : > { %v1765_v13 = vsel %vm1743_vm7, %v1732_v58, %v1459_v15  ;;  %v1764_v17 = vsel %vm1743_vm7, %v1731_v43, %v1457_v12 }
 0x248   : > { %4690 = vmatprep.mubr.msk.f32.mxu0 %vm1790_vm8, %v1764_v17 }
 0x249   : > { %4691 = vmatmul.mubr.msk.f32.gmra.mrb[20].mxu0 %vm1790_vm8, %v1765_v13 }
 0x24a   : > { %v1207_v39 = vpop.permute.xlu1 %1206  ;;  %v1205_v42 = vpop.permute.xlu0 %1204 }
 0x24b   : > { %v1701_v56 = vsel %vm1677_vm5, %v6512_v9, %v1207_v39  ;;  %v1700_v20 = vsel %vm1677_vm5, %v6515_v44, %v1205_v42 }
 0x24e   : > { %v1335_v24 = vpop.permute.xlu1 %1334  ;;  %v1333_v47 = vpop.permute.xlu0 %1332 }
 0x24f   : > { %v1734_v23 = vsel %vm1710_vm6, %v1701_v56, %v1335_v24  ;;  %v1733_v21 = vsel %vm1710_vm6, %v1700_v20, %v1333_v47 }
 0x252   : > { %v1463_v8 = vpop.permute.xlu1 %1462  ;;  %v1461_v35 = vpop.permute.xlu0 %1460 }
 0x253   : > { %v1767_v6 = vsel %vm1743_vm7, %v1734_v23, %v1463_v8  ;;  %v1766_v2 = vsel %vm1743_vm7, %v1733_v21, %v1461_v35 }
 0x254   : > { %4693 = vmatprep.mubr.msk.f32.mxu0 %vm1790_vm8, %v1766_v2 }
 0x255   : > { %4694 = vmatmul.mubr.msk.f32.gmra.mrb[22].mxu0 %vm1790_vm8, %v1767_v6 }
 0x256   : > { %v1211_v9 = vpop.permute.xlu1 %1210  ;;  %v1209_v0 = vpop.permute.xlu0 %1208 }
 0x257   : > { %v1703_v55 = vsel %vm1677_vm5, %v6536_v63, %v1211_v9  ;;  %v1702_v27 = vsel %vm1677_vm5, %v6539_v46, %v1209_v0 }
 0x25a   : > { %v1339_v44 = vpop.permute.xlu1 %1338  ;;  %v1337_v33 = vpop.permute.xlu0 %1336 }
 0x25b   : > { %v1736_v32 = vsel %vm1710_vm6, %v1703_v55, %v1339_v44  ;;  %v1735_v62 = vsel %vm1710_vm6, %v1702_v27, %v1337_v33 }
 0x25e   : > { %v1467_v10 = vpop.permute.xlu1 %1466  ;;  %v1465_v14 = vpop.permute.xlu0 %1464 }
 0x25f   : > { %v1769_v16 = vsel %vm1743_vm7, %v1736_v32, %v1467_v10  ;;  %v1768_v19 = vsel %vm1743_vm7, %v1735_v62, %v1465_v14 }
 0x260   : > { %4696 = vmatprep.mubr.msk.f32.mxu0 %vm1790_vm8, %v1768_v19 }
 0x261   : > { %4697 = vmatmul.mubr.msk.f32.gmra.mrb[24].mxu0 %vm1790_vm8, %v1769_v16 }
 0x262   : > { %v1215_v11 = vpop.permute.xlu1 %1214  ;;  %v1213_v1 = vpop.permute.xlu0 %1212 }
 0x263   : > { %v1705_v46 = vsel %vm1677_vm5, %v6560_v50, %v1215_v11  ;;  %v1704_v38 = vsel %vm1677_vm5, %v6563_v49, %v1213_v1 }
 0x266   : > { %v1343_v63 = vpop.permute.xlu1 %1342  ;;  %v1341_v59 = vpop.permute.xlu0 %1340 }
 0x267   : > { %v1738_v5 = vsel %vm1710_vm6, %v1705_v46, %v1343_v63  ;;  %v1737_v61 = vsel %vm1710_vm6, %v1704_v38, %v1341_v59 }
 0x26a   : > { %v1471_v28 = vpop.permute.xlu1 %1470  ;;  %v1469_v53 = vpop.permute.xlu0 %1468 }
 0x26b   : > { %v1771_v48 = vsel %vm1743_vm7, %v1738_v5, %v1471_v28  ;;  %v1770_v25 = vsel %vm1743_vm7, %v1737_v61, %v1469_v53 }
 0x26c   : > { %4699 = vmatprep.mubr.msk.f32.mxu0 %vm1790_vm8, %v1770_v25 }
 0x26d   : > { %4700 = vmatmul.mubr.msk.f32.gmra.mrb[26].mxu0 %vm1790_vm8, %v1771_v48 }
 0x26e   : > { %v1219_v36 = vpop.permute.xlu1 %1218  ;;  %v1217_v3 = vpop.permute.xlu0 %1216 }
 0x26f   : > { %v1707_v49 = vsel %vm1677_vm5, %v6584_v30, %v1219_v36  ;;  %v1706_v52 = vsel %vm1677_vm5, %v6587_v51, %v1217_v3 }
 0x272   : > { %v1347_v50 = vpop.permute.xlu1 %1346  ;;  %v1345_v54 = vpop.permute.xlu0 %1344 }
 0x273   : > { %v1740_v18 = vsel %vm1710_vm6, %v1707_v49, %v1347_v50  ;;  %v1739_v22 = vsel %vm1710_vm6, %v1706_v52, %v1345_v54 }
 0x276   : > { %v1475_v60 = vpop.permute.xlu1 %1474  ;;  %v1473_v34 = vpop.permute.xlu0 %1472 }
 0x277   : > { %v1773_v40 = vsel %vm1743_vm7, %v1740_v18, %v1475_v60  ;;  %v1772_v57 = vsel %vm1743_vm7, %v1739_v22, %v1473_v34 }
 0x278   : > { %4702 = vmatprep.mubr.msk.f32.mxu0 %vm1790_vm8, %v1772_v57 }
 0x279   : > { %4703 = vmatmul.mubr.msk.f32.gmra.mrb[28].mxu0 %vm1790_vm8, %v1773_v40 }
 0x27a   : > { %v1223_v41 = vpop.permute.xlu1 %1222  ;;  %v1221_v4 = vpop.permute.xlu0 %1220 }
 0x27b   : > { %v1709_v51 = vsel %vm1677_vm5, %v6608_v31, %v1223_v41  ;;  %v1708_v43 = vsel %vm1677_vm5, %v6611_v45, %v1221_v4  ;;  %v7174_v31 = vld [vmem:[%s8398_s3] ss:$0 sm:$0xff] }
 0x27e   : > { %v1351_v30 = vpop.permute.xlu1 %1350  ;;  %v1349_v58 = vpop.permute.xlu0 %1348 }
 0x27f   : > { %v1742_v15 = vsel %vm1710_vm6, %v1709_v51, %v1351_v30  ;;  %v1741_v12 = vsel %vm1710_vm6, %v1708_v43, %v1349_v58 }
 0x282   : > { %v1479_v13 = vpop.permute.xlu1 %1478  ;;  %v1477_v17 = vpop.permute.xlu0 %1476 }
 0x283   : > { %v1775_v39 = vsel %vm1743_vm7, %v1742_v15, %v1479_v13  ;;  %v1774_v42 = vsel %vm1743_vm7, %v1741_v12, %v1477_v17 }
 0x284   : > { %4705 = vmatprep.mubr.msk.f32.mxu0 %vm1790_vm8, %v1774_v42 }
 0x285   : > { %4706 = vmatmul.mubr.msk.f32.gmra.mrb[30].mxu0 %vm1790_vm8, %v1775_v39 }
 0x2c4   : > { %v4662_v45 = vpop.f32.mrb[0].mxu0 }
 0x2c5   : > { %v1959_v24 = vadd.f32 %v4662_v45, %v7174_v31  ;;  %v1953_v47 = vpop.f32.mrb[1].mxu0 }
 0x2c6   : > { %v1954_v56 = vadd.f32 %v7174_v31, %v1953_v47 }
 0x2c7   : > { %v2113_v20 = vmax.f32 %v1959_v24, 0.0 }
 0x2c8   : > { %v2112_v23 = vmax.f32 %v1954_v56, 0.0 }
 0x2c9   : > { %2201 = vst.msk [vmem:[#allocation2 + $0x21] sm:$0xff] %vm1545_vm1, %v2113_v20 }
 0x2ca   : > { %2200 = vst.msk [vmem:[#allocation2 + $0x19] sm:$0xff] %vm1545_vm1, %v2112_v23 }
 0x2cc   : > { %v4665_v21 = vpop.f32.mrb[2].mxu0 }
 0x2cd   : > { %v1969_v8 = vadd.f32 %v4665_v21, %v7174_v31  ;;  %v1963_v35 = vpop.f32.mrb[3].mxu0 }
 0x2ce   : > { %v1964_v6 = vadd.f32 %v7174_v31, %v1963_v35 }
 0x2cf   : > { %v2115_v2 = vmax.f32 %v1969_v8, 0.0 }
 0x2d0   : > { %v2114_v29 = vmax.f32 %v1964_v6, 0.0  ;;  %v2267_v7 = vld [vmem:[#allocation2 + $0x21] sm:$0xff] }
 0x2d1   : > { %2203 = vst.msk [vmem:[#allocation2 + $0x39] sm:$0xff] %vm1545_vm1, %v2115_v2  ;;  %v2266_v9 = vld [vmem:[#allocation2 + $0x19] sm:$0xff] }
 0x2d2   : > { %2202 = vst.msk [vmem:[#allocation2 + $0x31] sm:$0xff] %vm1545_vm1, %v2114_v29  ;;  %v4798_v0 = vpack.i.bf16 %v2267_v7, %v2266_v9 }
 0x2d4   : > { %v4668_v37 = vpop.f32.mrb[4].mxu0  ;;  %4799 = vrot.lane.b32.xlu1 %v4798_v0, %s5393_s22 }
 0x2d5   : > { %v1979_v44 = vadd.f32 %v4668_v37, %v7174_v31  ;;  %v1973_v33 = vpop.f32.mrb[5].mxu0 }
 0x2d6   : > { %v1974_v55 = vadd.f32 %v7174_v31, %v1973_v33 }
 0x2d7   : > { %v2117_v27 = vmax.f32 %v1979_v44, 0.0 }
 0x2d8   : > { %v2116_v32 = vmax.f32 %v1974_v55, 0.0  ;;  %v2269_v62 = vld [vmem:[#allocation2 + $0x39] sm:$0xff] }
 0x2d9   : > { %2205 = vst.msk [vmem:[#allocation2 + $0x51] sm:$0xff] %vm1545_vm1, %v2117_v27  ;;  %v2268_v10 = vld [vmem:[#allocation2 + $0x31] sm:$0xff] }
 0x2da   : > { %2204 = vst.msk [vmem:[#allocation2 + $0x49] sm:$0xff] %vm1545_vm1, %v2116_v32  ;;  %v4803_v14 = vpack.i.bf16 %v2269_v62, %v2268_v10 }
 0x2dc   : > { %v4671_v16 = vpop.f32.mrb[6].mxu0  ;;  %4804 = vrot.lane.b32.xlu0 %v4803_v14, %s5393_s22 }
 0x2dd   : > { %v1989_v19 = vadd.f32 %v4671_v16, %v7174_v31  ;;  %v1983_v11 = vpop.f32.mrb[7].mxu0 }
 0x2de   : > { %v1984_v1 = vadd.f32 %v7174_v31, %v1983_v11 }
 0x2df   : > { %v2119_v63 = vmax.f32 %v1989_v19, 0.0 }
 0x2e0   : > { %v2118_v59 = vmax.f32 %v1984_v1, 0.0  ;;  %v2271_v46 = vld [vmem:[#allocation2 + $0x51] sm:$0xff] }
 0x2e1   : > { %2207 = vst.msk [vmem:[#allocation2 + $0x69] sm:$0xff] %vm1545_vm1, %v2119_v63  ;;  %v2270_v38 = vld [vmem:[#allocation2 + $0x49] sm:$0xff] }
 0x2e2   : > { %2206 = vst.msk [vmem:[#allocation2 + $0x61] sm:$0xff] %vm1545_vm1, %v2118_v59  ;;  %v4808_v5 = vpack.i.bf16 %v2271_v46, %v2270_v38 }
 0x2e4   : > { %v4674_v61 = vpop.f32.mrb[8].mxu0  ;;  %4809 = vrot.lane.b32.xlu1 %v4808_v5, %s5393_s22 }
 0x2e5   : > { %v1999_v28 = vadd.f32 %v4674_v61, %v7174_v31  ;;  %v1993_v53 = vpop.f32.mrb[9].mxu0 }
 0x2e6   : > { %v1994_v48 = vadd.f32 %v7174_v31, %v1993_v53 }
 0x2e7   : > { %v2121_v25 = vmax.f32 %v1999_v28, 0.0 }
 0x2e8   : > { %v2120_v36 = vmax.f32 %v1994_v48, 0.0  ;;  %v2273_v3 = vld [vmem:[#allocation2 + $0x69] sm:$0xff] }
 0x2e9   : > { %2209 = vst.msk [vmem:[#allocation2 + $0x81] sm:$0xff] %vm1545_vm1, %v2121_v25  ;;  %v2272_v50 = vld [vmem:[#allocation2 + $0x61] sm:$0xff] }
 0x2ea   : > { %2208 = vst.msk [vmem:[#allocation2 + $0x79] sm:$0xff] %vm1545_vm1, %v2120_v36  ;;  %v4813_v54 = vpack.i.bf16 %v2273_v3, %v2272_v50 }
 0x2eb   : > { %v4677_v49 = vpop.f32.mrb[10].mxu0 }
 0x2ec   : > { %v2009_v52 = vadd.f32 %v4677_v49, %v7174_v31  ;;  %4814 = vrot.lane.b32.xlu0 %v4813_v54, %s5393_s22  ;;  %v2003_v18 = vpop.f32.mrb[11].mxu0 }
 0x2ed   : > { %v2004_v22 = vadd.f32 %v7174_v31, %v2003_v18 }
 0x2ee   : > { %v2123_v60 = vmax.f32 %v2009_v52, 0.0 }
 0x2ef   : > { %v2122_v34 = vmax.f32 %v2004_v22, 0.0 }
 0x2f0   : > { %2211 = vst.msk [vmem:[#allocation2 + $0x99] sm:$0xff] %vm1545_vm1, %v2123_v60  ;;  %v2275_v40 = vld [vmem:[#allocation2 + $0x81] sm:$0xff] }
 0x2f1   : > { %2210 = vst.msk [vmem:[#allocation2 + $0x91] sm:$0xff] %vm1545_vm1, %v2122_v34  ;;  %v2274_v57 = vld [vmem:[#allocation2 + $0x79] sm:$0xff] }
 0x2f2   : > { %v4818_v41 = vpack.i.bf16 %v2275_v40, %v2274_v57 }
 0x2f3   : > { %v4680_v4 = vpop.f32.mrb[12].mxu0 }
 0x2f4   : > { %v2019_v30 = vadd.f32 %v4680_v4, %v7174_v31  ;;  %4819 = vrot.lane.b32.xlu1 %v4818_v41, %s5393_s22  ;;  %v2013_v58 = vpop.f32.mrb[13].mxu0 }
 0x2f5   : > { %v2014_v51 = vadd.f32 %v7174_v31, %v2013_v58 }
 0x2f6   : > { %v2125_v43 = vmax.f32 %v2019_v30, 0.0 }
 0x2f7   : > { %v2124_v15 = vmax.f32 %v2014_v51, 0.0  ;;  %v2277_v12 = vld [vmem:[#allocation2 + $0x99] sm:$0xff] }
 0x2f8   : > { %2213 = vst.msk [vmem:[#allocation2 + $0xb1] sm:$0xff] %vm1545_vm1, %v2125_v43  ;;  %v2276_v13 = vld [vmem:[#allocation2 + $0x91] sm:$0xff] }
 0x2f9   : > { %2212 = vst.msk [vmem:[#allocation2 + $0xa9] sm:$0xff] %vm1545_vm1, %v2124_v15  ;;  %v7209_v17 = vpack.i.bf16 %v2277_v12, %v2276_v13 }
 0x2fb   : > { %v4683_v39 = vpop.f32.mrb[14].mxu0  ;;  %4824 = vrot.lane.b32.xlu0 %v7209_v17, %s5393_s22 }
 0x2fc   : > { %v2029_v42 = vadd.f32 %v4683_v39, %v7174_v31  ;;  %v2023_v45 = vpop.f32.mrb[15].mxu0 }
 0x2fd   : > { %v2024_v24 = vadd.f32 %v7174_v31, %v2023_v45 }
 0x2fe   : > { %v2127_v47 = vmax.f32 %v2029_v42, 0.0 }
 0x2ff   : > { %v2126_v56 = vmax.f32 %v2024_v24, 0.0  ;;  %v2279_v20 = vld [vmem:[#allocation2 + $0xb1] sm:$0xff] }
 0x300   : > { %2215 = vst.msk [vmem:[#allocation2 + $0xc9] sm:$0xff] %vm1545_vm1, %v2127_v47  ;;  %v2278_v23 = vld [vmem:[#allocation2 + $0xa9] sm:$0xff] }
 0x301   : > { %2214 = vst.msk [vmem:[#allocation2 + $0xc1] sm:$0xff] %vm1545_vm1, %v2126_v56  ;;  %v7217_v21 = vpack.i.bf16 %v2279_v20, %v2278_v23  ;;  %v2296_v23 = vld [vmem:[#allocation2 + $0x2] sm:$0xff] }
 0x303   : > { %4829 = vrot.lane.b32.xlu1 %v7217_v21, %s5393_s22 }
 0x304   : > { %v4686_v8 = vpop.f32.mrb[16].mxu0 }
 0x305   : > { %v2039_v35 = vadd.f32 %v4686_v8, %v7174_v31  ;;  %v2033_v6 = vpop.f32.mrb[17].mxu0  ;;  %v2297_v8 = vld [vmem:[#allocation2 + $0xa] sm:$0xff] }
 0x306   : > { %v2034_v2 = vadd.f32 %v7174_v31, %v2033_v6 }
 0x307   : > { %v2129_v29 = vmax.f32 %v2039_v35, 0.0  ;;  %v2281_v7 = vld [vmem:[#allocation2 + $0xc9] sm:$0xff] }
 0x308   : > { %v2128_v9 = vmax.f32 %v2034_v2, 0.0  ;;  %v2280_v0 = vld [vmem:[#allocation2 + $0xc1] sm:$0xff] }
 0x309   : > { %2217 = vst.msk [vmem:[#allocation2 + $0xe1] sm:$0xff] %vm1545_vm1, %v2129_v29  ;;  %v7224_v37 = vpack.i.bf16 %v2281_v7, %v2280_v0  ;;  %v4873_v7 = vpack.i.bf16 %v2297_v8, %v2296_v23  ;;  %v2301_v0 = vld [vmem:[#allocation2 + $0x3a] sm:$0xff]  ;;  %v3841_v23 = vld [vmem:[%s8397_s2 + $0x28] sm:$0xff] }
 0x30a   : > { %2216 = vst.msk [vmem:[#allocation2 + $0xd9] sm:$0xff] %vm1545_vm1, %v2128_v9  ;;  %v7283_v9 = vld [vmem:[#allocation2 + $0x32] sm:$0xff] }
 0x30b   : > { %4834 = vrot.lane.b32.xlu0 %v7224_v37, %s5393_s22 }
 0x310   : > { %v4689_v44 = vpop.f32.mrb[18].mxu0  ;;  %v2283_v33 = vld [vmem:[#allocation2 + $0xe1] sm:$0xff] }
 0x311   : > { %v2049_v55 = vadd.f32 %v4689_v44, %v7174_v31  ;;  %v2043_v27 = vpop.f32.mrb[19].mxu0  ;;  %v2282_v32 = vld [vmem:[#allocation2 + $0xd9] sm:$0xff]  ;;  %v4883_v44 = vpack.i.bf16 %v2301_v0, %v7283_v9 }
 0x312   : > { %v2044_v62 = vadd.f32 %v7174_v31, %v2043_v27  ;;  %v7231_v10 = vpack.i.bf16 %v2283_v33, %v2282_v32  ;;  %v2304_v33 = vld [vmem:[#allocation2 + $0x62] sm:$0xff]  ;;  %v2314_v0 = vld [vmem:[#allocation2 + $0xda] sm:$0xff] }
 0x313   : > { %v2131_v14 = vmax.f32 %v2049_v55, 0.0  ;;  %v2305_v55 = vld [vmem:[#allocation2 + $0x6a] sm:$0xff] }
 0x314   : > { %v2130_v16 = vmax.f32 %v2044_v62, 0.0  ;;  %4839 = vrot.lane.b32.xlu1 %v7231_v10, %s5393_s22 }
 0x315   : > { %2219 = vst.msk [vmem:[#allocation2 + $0xf9] sm:$0xff] %vm1545_vm1, %v2131_v14 }
 0x316   : > { %2218 = vst.msk [vmem:[#allocation2 + $0xf1] sm:$0xff] %vm1545_vm1, %v2130_v16 }
 0x31c   : > { %v4692_v19 = vpop.f32.mrb[20].mxu0  ;;  %v2285_v11 = vld [vmem:[#allocation2 + $0xf9] sm:$0xff] }
 0x31d   : > { %v2059_v1 = vadd.f32 %v4692_v19, %v7174_v31  ;;  %v2053_v63 = vpop.f32.mrb[21].mxu0  ;;  %v2284_v59 = vld [vmem:[#allocation2 + $0xf1] sm:$0xff] }
 0x31e   : > { %v2054_v46 = vadd.f32 %v7174_v31, %v2053_v63  ;;  %v7239_v38 = vpack.i.bf16 %v2285_v11, %v2284_v59  ;;  %v4893_v11 = vpack.i.bf16 %v2305_v55, %v2304_v33  ;;  %v7290_v63 = vld [vmem:[#allocation2 + $0x22] sm:$0xff]  ;;  %v3843_v33 = vld [vmem:[%s8397_s2 + $0x38] sm:$0xff] }
 0x31f   : > { %v2133_v5 = vmax.f32 %v2059_v1, 0.0 }
 0x320   : > { %v2132_v61 = vmax.f32 %v2054_v46, 0.0  ;;  %4844 = vrot.lane.b32.xlu0 %v7239_v38, %s5393_s22  ;;  %v2308_v46 = vld [vmem:[#allocation2 + $0x92] sm:$0xff] }
 0x321   : > { %2221 = vst.msk [vmem:[#allocation2 + $0x111] sm:$0xff] %vm1545_vm1, %v2133_v5  ;;  %v2309_v5 = vld [vmem:[#allocation2 + $0x9a] sm:$0xff] }
 0x322   : > { %2220 = vst.msk [vmem:[#allocation2 + $0x109] sm:$0xff] %vm1545_vm1, %v2132_v61  ;;  %v7292_v61 = vld [vmem:[#allocation2 + $0x1a] sm:$0xff] }
 0x328   : > { %v4695_v28 = vpop.f32.mrb[22].mxu0  ;;  %v2287_v53 = vld [vmem:[#allocation2 + $0x111] sm:$0xff] }
 0x329   : > { %v2069_v48 = vadd.f32 %v4695_v28, %v7174_v31  ;;  %v2063_v25 = vpop.f32.mrb[23].mxu0  ;;  %v2286_v36 = vld [vmem:[#allocation2 + $0x109] sm:$0xff] }
 0x32a   : > { %v2064_v3 = vadd.f32 %v7174_v31, %v2063_v25  ;;  %v7247_v50 = vpack.i.bf16 %v2287_v53, %v2286_v36  ;;  %v7298_v53 = vpack.i.bf16 %v2309_v5, %v2308_v46  ;;  %v2312_v25 = vld [vmem:[#allocation2 + $0xc2] sm:$0xff]  ;;  %v2313_v36 = vld [vmem:[#allocation2 + $0xca] sm:$0xff] }
 0x32b   : > { %v2135_v54 = vmax.f32 %v2069_v48, 0.0  ;;  %v2303_v48 = vld [vmem:[#allocation2 + $0x52] sm:$0xff]  ;;  %v2238_v46 = vld [vmem:[#allocation2 + $0x48] sm:$0xff] }
 0x32c   : > { %v2134_v49 = vmax.f32 %v2064_v3, 0.0  ;;  %4849 = vrot.lane.b32.xlu1 %v7247_v50, %s5393_s22  ;;  %v2302_v3 = vld [vmem:[#allocation2 + $0x4a] sm:$0xff] }
 0x32d   : > { %2223 = vst.msk [vmem:[#allocation2 + $0x129] sm:$0xff] %vm1545_vm1, %v2135_v54  ;;  %v3836_v54 = vld [vmem:[%s8397_s2] sm:$0xff] }
 0x32e   : > { %2222 = vst.msk [vmem:[#allocation2 + $0x121] sm:$0xff] %vm1545_vm1, %v2134_v49  ;;  %v3837_v49 = vld [vmem:[%s8397_s2 + $0x8] sm:$0xff] }
 0x334   : > { %v4698_v52 = vpop.f32.mrb[24].mxu0  ;;  %v7253_v18 = vld [vmem:[#allocation2 + $0x129] sm:$0xff] }
 0x335   : > { %v2079_v22 = vadd.f32 %v4698_v52, %v7174_v31  ;;  %v2073_v60 = vpop.f32.mrb[25].mxu0  ;;  %v7256_v34 = vld [vmem:[#allocation2 + $0x121] sm:$0xff]  ;;  %v4725_v52 = vpack.c.bf16 %v3837_v49, %v3836_v54  ;;  %v7388_v49 = vld [vmem:[#allocation2 + $0x78] sm:$0xff] }
 0x336   : > { %v2074_v40 = vadd.f32 %v7174_v31, %v2073_v60  ;;  %v7261_v57 = vpack.i.bf16 %v7253_v18, %v7256_v34  ;;  %v4888_v60 = vpack.i.bf16 %v2303_v48, %v2302_v3  ;;  %v3847_v3 = vld [vmem:[%s8397_s2 + $0x58] sm:$0xff] }
 0x337   : > { %v2137_v41 = vmax.f32 %v2079_v22, 0.0  ;;  %v7311_v22 = vpack.i.bf16 %v2313_v36, %v2312_v25  ;;  %v3846_v36 = vld [vmem:[%s8397_s2 + $0x50] sm:$0xff] }
 0x338   : > { %v2136_v4 = vmax.f32 %v2074_v40, 0.0  ;;  %4854 = vrot.lane.b32.xlu0 %v7261_v57, %s5393_s22  ;;  %v2307_v40 = vld [vmem:[#allocation2 + $0x82] sm:$0xff]  ;;  %v4740_v54 = vpack.c.bf16 %v3847_v3, %v3846_v36 }
 0x339   : > { %2225 = vst.msk [vmem:[#allocation2 + $0x141] sm:$0xff] %vm1545_vm1, %v2137_v41  ;;  %v5401_v41 = vmov 0.0|0.0   ;;  %v4547_v36 = vld [vmem:[%s5444_s20 + $0xc1] sm:$0xff] }
 0x33a   : > { %2224 = vst.msk [vmem:[#allocation2 + $0x139] sm:$0xff] %vm1545_vm1, %v2136_v4  ;;  %4751 = vmatprep.subr.bf16.mxu1 %v5401_v41  ;;  %4724 = vmatprep.subr.bf16.mxu0 %v5401_v41  ;;  %v2316_v4 = vld [vmem:[#allocation2 + $0xf2] sm:$0xff] }
 0x33b   : > { %4761 = vmatpush1.bf16.msra.mxu1 %v4725_v52  ;;  %4726 = vmatpush1.bf16.msra.mxu0 %v4725_v52 }
 0x33c   : > { %4752 = vmatprep.subr.bf16.mxu1 %v5401_v41  ;;  %4727 = vmatprep.subr.bf16.mxu0 %v5401_v41 }
 0x340   : > { %v4701_v30 = vpop.f32.mrb[26].mxu0  ;;  %v7267_v58 = vld [vmem:[#allocation2 + $0x141] sm:$0xff] }
 0x341   : > { %v2089_v51 = vadd.f32 %v4701_v30, %v7174_v31  ;;  %v2083_v43 = vpop.f32.mrb[27].mxu0  ;;  %v7270_v15 = vld [vmem:[#allocation2 + $0x139] sm:$0xff]  ;;  %v7375_v25 = vld [vmem:[#allocation2 + $0x142] sm:$0xff] }
 0x342   : > { %v2084_v12 = vadd.f32 %v7174_v31, %v2083_v43  ;;  %v4858_v13 = vpack.i.bf16 %v7267_v58, %v7270_v15  ;;  %v2317_v30 = vld [vmem:[#allocation2 + $0xfa] sm:$0xff]  ;;  %v3838_v43 = vld [vmem:[%s8397_s2 + $0x10] sm:$0xff] }
 0x343   : > { %v2139_v39 = vmax.f32 %v2089_v51, 0.0  ;;  %v2306_v51 = vld [vmem:[#allocation2 + $0x7a] sm:$0xff] }
 0x344   : > { %v2138_v42 = vmax.f32 %v2084_v12, 0.0  ;;  %4859 = vrot.lane.b32.xlu1 %v4858_v13, %s5393_s22  ;;  %v3839_v12 = vld [vmem:[%s8397_s2 + $0x18] sm:$0xff] }
 0x345   : > { %2227 = vst.msk [vmem:[#allocation2 + $0x159] sm:$0xff] %vm1545_vm1, %v2139_v39  ;;  %v4728_v13 = vpack.c.bf16 %v3839_v12, %v3838_v43  ;;  %v7326_v39 = vpack.i.bf16 %v2317_v30, %v2316_v4  ;;  %v7373_v48 = vld [vmem:[#allocation2 + $0x13a] sm:$0xff]  ;;  %v3849_v43 = vld [vmem:[%s8397_s2 + $0x68] sm:$0xff] }
 0x346   : > { %2226 = vst.msk [vmem:[#allocation2 + $0x151] sm:$0xff] %vm1545_vm1, %v2138_v42  ;;  %v4898_v42 = vpack.i.bf16 %v2307_v40, %v2306_v51  ;;  %v7392_v40 = vld [vmem:[#allocation2 + $0x80] sm:$0xff] }
 0x347   : > { %4762 = vmatpush1.bf16.msra.mxu1 %v4728_v13  ;;  %4729 = vmatpush1.bf16.msra.mxu0 %v4728_v13  ;;  %v3848_v51 = vld [vmem:[%s8397_s2 + $0x60] sm:$0xff]  ;;  %v4973_v13 = vpack.i.bf16 %v7392_v40, %v7388_v49 }
 0x348   : > { %4753 = vmatprep.subr.bf16.mxu1 %v5401_v41  ;;  %4730 = vmatprep.subr.bf16.mxu0 %v5401_v41  ;;  %v4743_v12 = vpack.c.bf16 %v3849_v43, %v3848_v51  ;;  %v7515_v51 = vld [vmem:[#allocation2 + $0xf8] sm:$0xff] }
 0x34c   : > { %v4704_v45 = vpop.f32.mrb[28].mxu0  ;;  %v2293_v24 = vld [vmem:[#allocation2 + $0x159] sm:$0xff] }
 0x34d   : > { %v2099_v47 = vadd.f32 %v4704_v45, %v7174_v31  ;;  %v2093_v56 = vpop.f32.mrb[29].mxu0  ;;  %v2292_v20 = vld [vmem:[#allocation2 + $0x151] sm:$0xff] }
 0x34e   : > { %v2094_v35 = vadd.f32 %v7174_v31, %v2093_v56  ;;  %v4863_v6 = vpack.i.bf16 %v2293_v24, %v2292_v20  ;;  %v2311_v45 = vld [vmem:[#allocation2 + $0xb2] sm:$0xff]  ;;  %v7328_v24 = vld [vmem:[#allocation2 + $0x122] sm:$0xff]  ;;  %v2310_v56 = vld [vmem:[#allocation2 + $0xaa] sm:$0xff] }
 0x34f   : > { %v2141_v2 = vmax.f32 %v2099_v47, 0.0  ;;  %v7330_v47 = vld [vmem:[#allocation2 + $0x12a] sm:$0xff]  ;;  %v3840_v20 = vld [vmem:[%s8397_s2 + $0x20] sm:$0xff] }
 0x350   : > { %v2140_v29 = vmax.f32 %v2094_v35, 0.0  ;;  %4864 = vrot.lane.b32.xlu0 %v4863_v6, %s5393_s22  ;;  %v4731_v8 = vpack.c.bf16 %v3841_v23, %v3840_v20  ;;  %v4933_v35 = vpack.i.bf16 %v7330_v47, %v7328_v24  ;;  %v7345_v6 = vpack.i.bf16 %v2311_v45, %v2310_v56  ;;  %v7406_v45 = vld [vmem:[#allocation2 + $0x30] sm:$0xff]  ;;  %v7408_v56 = vld [vmem:[#allocation2 + $0x38] sm:$0xff] }
 0x351   : > { %2229 = vst.msk [vmem:[#allocation2 + $0x171] sm:$0xff] %vm1545_vm1, %v2141_v2  ;;  %v2315_v2 = vld [vmem:[#allocation2 + $0xe2] sm:$0xff]  ;;  %v3850_v20 = vld [vmem:[%s8397_s2 + $0x70] sm:$0xff]  ;;  %v3851_v23 = vld [vmem:[%s8397_s2 + $0x78] sm:$0xff] }
 0x352   : > { %2228 = vst.msk [vmem:[#allocation2 + $0x169] sm:$0xff] %vm1545_vm1, %v2140_v29  ;;  %v2324_v29 = vld [vmem:[#allocation2 + $0x152] sm:$0xff]  ;;  %4763 = vmatpush1.bf16.msra.mxu1 %v4731_v8  ;;  %4732 = vmatpush1.bf16.msra.mxu0 %v4731_v8  ;;  %v4746_v8 = vpack.c.bf16 %v3851_v23, %v3850_v20 }
 0x353   : > { %4754 = vmatprep.subr.bf16.mxu1 %v5401_v41  ;;  %4733 = vmatprep.subr.bf16.mxu0 %v5401_v41 }
 0x354   : > { %4874 = vrot.lane.b32.xlu0 %v4873_v7, %s5395_s24  ;;  %v2325_v7 = vld [vmem:[#allocation2 + $0x15a] sm:$0xff] }
 0x358   : > { %v4707_v27 = vpop.f32.mrb[30].mxu0  ;;  %4884 = vrot.lane.b32.xlu0 %v4883_v44, %s5395_s24  ;;  %v2295_v32 = vld [vmem:[#allocation2 + $0x171] sm:$0xff] }
 0x359   : > { %v2109_v62 = vadd.f32 %v4707_v27, %v7174_v31  ;;  %v2103_v14 = vpop.f32.mrb[31].mxu0  ;;  %v2294_v16 = vld [vmem:[#allocation2 + $0x169] sm:$0xff]  ;;  %v2234_v27 = vld [vmem:[#allocation2 + $0x18] sm:$0xff] }
 0x35a   : > { %v2104_v19 = vadd.f32 %v7174_v31, %v2103_v14  ;;  %v4868_v1 = vpack.i.bf16 %v2295_v32, %v2294_v16  ;;  %v4878_v31 = vpack.i.bf16 %v7290_v63, %v7292_v61  ;;  %v3842_v44 = vld [vmem:[%s8397_s2 + $0x30] sm:$0xff]  ;;  %v4943_v32 = vpack.i.bf16 %v2325_v7, %v2324_v29  ;;  %v2235_v14 = vld [vmem:[#allocation2 + $0x20] sm:$0xff]  ;;  %v2241_v29 = vld [vmem:[#allocation2 + $0x68] sm:$0xff] }
 0x35b   : > { %v2143_v59 = vmax.f32 %v2109_v62, 0.0  ;;  %v4734_v55 = vpack.c.bf16 %v3843_v33, %v3842_v44  ;;  %v7358_v62 = vpack.i.bf16 %v2315_v2, %v2314_v0  ;;  %v2318_v16 = vld [vmem:[#allocation2 + $0x10a] sm:$0xff]  ;;  %v4953_v5 = vpack.i.bf16 %v2235_v14, %v2234_v27  ;;  %v2327_v30 = vld [vmem:[#allocation2 + $0x172] sm:$0xff]  ;;  %v3852_v44 = vld [vmem:[%s8397_s2 + $0x80] sm:$0xff] }
 0x35c   : > { %v2142_v28 = vmax.f32 %v2104_v19, 0.0  ;;  %4894 = vrot.lane.b32.xlu0 %v4893_v11, %s5395_s24  ;;  %4869 = vrot.lane.b32.xlu1 %v4868_v1, %s5393_s22  ;;  %v2319_v19 = vld [vmem:[#allocation2 + $0x112] sm:$0xff]  ;;  %v3844_v11 = vld [vmem:[%s8397_s2 + $0x40] sm:$0xff]  ;;  %v3845_v1 = vld [vmem:[%s8397_s2 + $0x48] sm:$0xff]  ;;  %v4958_v2 = vpack.i.bf16 %v7408_v56, %v7406_v45 }
 0x35d   : > { %2231 = vst.msk [vmem:[#allocation2 + $0x189] sm:$0xff] %vm1545_vm1, %v2143_v59  ;;  %4764 = vmatpush1.bf16.msra.mxu1 %v4734_v55  ;;  %4735 = vmatpush1.bf16.msra.mxu0 %v4734_v55  ;;  %v4737_v59 = vpack.c.bf16 %v3845_v1, %v3844_v11  ;;  %v2326_v4 = vld [vmem:[#allocation2 + $0x16a] sm:$0xff]  ;;  %v7441_v14 = vld [vmem:[#allocation2 + $0x98] sm:$0xff] }
 0x35e   : > { %2230 = vst.msk [vmem:[#allocation2 + $0x181] sm:$0xff] %vm1545_vm1, %v2142_v28  ;;  %4755 = vmatprep.subr.bf16.mxu1 %v5401_v41  ;;  %4736 = vmatprep.subr.bf16.mxu0 %v5401_v41  ;;  %v7371_v28 = vpack.i.bf16 %v2319_v19, %v2318_v16  ;;  %v7422_v7 = vld [vmem:[#allocation2 + $0xa8] sm:$0xff]  ;;  %v7424_v0 = vld [vmem:[#allocation2 + $0xb0] sm:$0xff]  ;;  %v4544_v11 = vld [vmem:[%s5444_s20 + $0x99] sm:$0xff] }
 0x35f   : > { %v3853_v33 = vld [vmem:[%s8397_s2 + $0x88] sm:$0xff]  ;;  %v4993_v27 = vpack.i.bf16 %v7424_v0, %v7422_v7  ;;  %v4543_v19 = vld [vmem:[%s5444_s20 + $0x91] sm:$0xff] }
 0x360   : > { %4904 = vrot.lane.b32.xlu0 %v7298_v53, %s5395_s24  ;;  %4879 = vrot.lane.b32.xlu1 %v4878_v31, %s5395_s24  ;;  %v2239_v31 = vld [vmem:[#allocation2 + $0x50] sm:$0xff]  ;;  %v4749_v55 = vpack.c.bf16 %v3853_v33, %v3852_v44 }
 0x361   : > { %4765 = vmatpush1.bf16.msra.mxu1 %v4737_v59  ;;  %4738 = vmatpush1.bf16.msra.mxu0 %v4737_v59  ;;  %v4963_v52 = vpack.i.bf16 %v2239_v31, %v2238_v46  ;;  %v4546_v1 = vld [vmem:[%s5444_s20 + $0xb1] sm:$0xff]  ;;  %v7467_v59 = vld [vmem:[#allocation2 + $0xc0] sm:$0xff]  ;;  %v7469_v46 = vld [vmem:[#allocation2 + $0xc8] sm:$0xff] }
 0x362   : > { %4756 = vmatprep.subr.bf16.mxu1 %v5401_v41  ;;  %4739 = vmatprep.subr.bf16.mxu0 %v5401_v41 }
 0x364   : > { %4914 = vrot.lane.b32.xlu0 %v7311_v22, %s5395_s24  ;;  %4889 = vrot.lane.b32.xlu1 %v4888_v60, %s5395_s24  ;;  %v4938_v60 = vpack.i.bf16 %v7375_v25, %v7373_v48 }
 0x365   : > { %4766 = vmatpush1.bf16.msra.mxu1 %v4740_v54  ;;  %4741 = vmatpush1.bf16.msra.mxu0 %v4740_v54  ;;  %v4548_v54 = vld [vmem:[%s5444_s20 + $0xc9] sm:$0xff] }
 0x366   : > { %4757 = vmatprep.subr.bf16.mxu1 %v5401_v41  ;;  %4742 = vmatprep.subr.bf16.mxu0 %v5401_v41 }
 0x368   : > { %4924 = vrot.lane.b32.xlu0 %v7326_v39, %s5395_s24  ;;  %4899 = vrot.lane.b32.xlu1 %v4898_v42, %s5395_s24  ;;  %v4948_v42 = vpack.i.bf16 %v2327_v30, %v2326_v4  ;;  %v7509_v4 = vpop.permute.xlu1 %4799  ;;  %v7513_v30 = vld [vmem:[#allocation2 + $0xf0] sm:$0xff] }
 0x369   : > { %4767 = vmatpush1.bf16.msra.mxu1 %v4743_v12  ;;  %4744 = vmatpush1.bf16.msra.mxu0 %v4743_v12  ;;  %v5068_v12 = vpack.i.bf16 %v7515_v51, %v7513_v30 }
 0x36a   : > { %4758 = vmatprep.subr.bf16.mxu1 %v5401_v41  ;;  %4745 = vmatprep.subr.bf16.mxu0 %v5401_v41 }
 0x36c   : > { %4934 = vrot.lane.b32.xlu0 %v4933_v35, %s5395_s24  ;;  %4909 = vrot.lane.b32.xlu1 %v7345_v6, %s5395_s24  ;;  %v2240_v35 = vld [vmem:[#allocation2 + $0x60] sm:$0xff] }
 0x36d   : > { %4768 = vmatpush1.bf16.msra.mxu1 %v4746_v8  ;;  %4747 = vmatpush1.bf16.msra.mxu0 %v4746_v8 }
 0x36e   : > { %4759 = vmatprep.subr.bf16.mxu1 %v5401_v41  ;;  %4748 = vmatprep.subr.bf16.mxu0 %v5401_v41  ;;  %v3854_v41 = vld [vmem:[%s8397_s2 + $0x90] sm:$0xff] }
 0x370   : > { %4944 = vrot.lane.b32.xlu0 %v4943_v32, %s5395_s24  ;;  %4919 = vrot.lane.b32.xlu1 %v7358_v62, %s5395_s24  ;;  %v4968_v32 = vpack.i.bf16 %v2241_v29, %v2240_v35 }
 0x371   : > { %4769 = vmatpush1.bf16.msra.mxu1 %v4749_v55  ;;  %4750 = vmatpush1.bf16.msra.mxu0 %v4749_v55  ;;  %v4553_v55 = vld [vmem:[%s5444_s20 + $0x109] sm:$0xff] }
 0x372   : > { %4760 = vmatprep.subr.mxu1 %v5400_v26  ;;  %3992 = vmatprep.subr.mxu0 %v5400_v26  ;;  %v4545_v26 = vld [vmem:[%s5444_s20 + $0xa9] sm:$0xff] }
 0x374   : > { %4954 = vrot.lane.b32.xlu0 %v4953_v5, %s5397_s26  ;;  %4929 = vrot.lane.b32.xlu1 %v7371_v28, %s5395_s24  ;;  %v7478_v5 = vld [vmem:[#allocation2 + $0xe0] sm:$0xff] }
 0x375   : > { %4770 = vmatpush1.msra.mxu1 %v3854_v41  ;;  %3993 = vmatpush1.msra.mxu0 %v3854_v41 }
 0x378   : > { %4964 = vrot.lane.b32.xlu0 %v4963_v52, %s5397_s26  ;;  %4939 = vrot.lane.b32.xlu1 %v4938_v60, %s5395_s24  ;;  %v4550_v60 = vld [vmem:[%s5444_s20 + $0xe1] sm:$0xff] }
 0x37c   : > { %4974 = vrot.lane.b32.xlu0 %v4973_v13, %s5397_s26  ;;  %4949 = vrot.lane.b32.xlu1 %v4948_v42, %s5395_s24  ;;  %v7526_v13 = vld [vmem:[#allocation2 + $0x108] sm:$0xff]  ;;  %v2255_v42 = vld [vmem:[#allocation2 + $0x110] sm:$0xff] }
 0x380   : > { %4984 = vrot.lane.b32.xlu0 %v7209_v17, %s5399_s25  ;;  %4959 = vrot.lane.b32.xlu1 %v4958_v2, %s5397_s26  ;;  %v7439_v17 = vld [vmem:[#allocation2 + $0x90] sm:$0xff] }
 0x381   : > { %v4978_v16 = vpack.i.bf16 %v7441_v14, %v7439_v17 }
 0x384   : > { %4994 = vrot.lane.b32.xlu0 %v4993_v27, %s5402_s23  ;;  %4969 = vrot.lane.b32.xlu1 %v4968_v32, %s5397_s26 }
 0x388   : > { %4999 = vrot.lane.b32.xlu0 %v7217_v21, %s5403_s29  ;;  %4979 = vrot.lane.b32.xlu1 %v4978_v16, %s5397_s26 }
 0x38c   : > { %5004 = vrot.lane.b32.xlu0 %v4993_v27, %s5397_s26  ;;  %4989 = vrot.lane.b32.xlu1 %v7298_v53, %s5404_s30  ;;  %v5018_v53 = vpack.i.bf16 %v7469_v46, %v7467_v59  ;;  %v4552_v27 = vld [vmem:[%s5444_s20 + $0xf9] sm:$0xff] }
 0x390   : > { %5014 = vrot.lane.b32.xlu0 %v7345_v6, %s5404_s30  ;;  %3501 = vrot.lane.b32.xlu1 %v4543_v19, %s5393_s22  ;;  %v7476_v6 = vld [vmem:[#allocation2 + $0xd8] sm:$0xff] }
 0x391   : > { %v5043_v31 = vpack.i.bf16 %v7478_v5, %v7476_v6 }
 0x394   : > { %3505 = vrot.lane.b32.xlu0 %v4545_v26, %s5393_s22  ;;  %3503 = vrot.lane.b32.xlu1 %v4544_v11, %s5393_s22  ;;  %v2256_v26 = vld [vmem:[#allocation2 + $0x120] sm:$0xff]  ;;  %v2257_v11 = vld [vmem:[#allocation2 + $0x128] sm:$0xff] }
 0x398   : > { %3507 = vrot.lane.b32.xlu0 %v4546_v1, %s5393_s22  ;;  %5009 = vrot.lane.b32.xlu1 %v7217_v21, %s5399_s25  ;;  %v7488_v21 = vpop.permute.xlu0 %4794 }
 0x39c   : > { %5034 = vrot.lane.b32.xlu0 %v7224_v37, %s5399_s25  ;;  %5019 = vrot.lane.b32.xlu1 %v5018_v53, %s5402_s23  ;;  %v7497_v3 = vpop.permute.xlu0 %4804 }
 0x3a0   : > { %5044 = vrot.lane.b32.xlu0 %v5043_v31, %s5402_s23  ;;  %5024 = vrot.lane.b32.xlu1 %v7224_v37, %s5403_s29  ;;  %v4549_v37 = vld [vmem:[%s5444_s20 + $0xd9] sm:$0xff]  ;;  %v7504_v52 = vpop.permute.xlu0 %4814 }
 0x3a1   : > { %8696 = vst [vmem:[#allocation39_spill] sm:$0xff] %v7504_v52 }
 0x3a4   : > { %5049 = vrot.lane.b32.xlu0 %v7231_v10, %s5403_s29  ;;  %5029 = vrot.lane.b32.xlu1 %v5018_v53, %s5397_s26 }
 0x3a8   : > { %5054 = vrot.lane.b32.xlu0 %v5043_v31, %s5397_s26  ;;  %5039 = vrot.lane.b32.xlu1 %v7311_v22, %s5404_s30  ;;  %v7511_v22 = vpop.permute.xlu0 %4824 }
 0x3ac   : > { %5064 = vrot.lane.b32.xlu0 %v7358_v62, %s5404_s30  ;;  %3509 = vrot.lane.b32.xlu1 %v4547_v36, %s5393_s22  ;;  %v7520_v62 = vpop.permute.xlu1 %4809  ;;  %v7522_v43 = vpop.permute.xlu0 %4834  ;;  %v5118_v36 = vpack.i.bf16 %v2257_v11, %v2256_v26 }
 0x3ad   : > { %8697 = vst [vmem:[#allocation40_spill] sm:$0xff] %v7520_v62 }
 0x3b0   : > { %3513 = vrot.lane.b32.xlu0 %v4549_v37, %s5393_s22  ;;  %3511 = vrot.lane.b32.xlu1 %v4548_v54, %s5393_s22  ;;  %v7531_v20 = vpop.permute.xlu1 %4819  ;;  %v7533_v23 = vpop.permute.xlu0 %4844  ;;  %v2258_v37 = vld [vmem:[#allocation2 + $0x138] sm:$0xff] }
 0x3b4   : > { %3515 = vrot.lane.b32.xlu0 %v4550_v60, %s5393_s22  ;;  %5059 = vrot.lane.b32.xlu1 %v7231_v10, %s5399_s25  ;;  %v5093_v10 = vpack.i.bf16 %v2255_v42, %v7526_v13  ;;  %v7539_v8 = vpop.permute.xlu1 %4829  ;;  %v7541_v35 = vpop.permute.xlu0 %4854 }
 0x3b8   : > { %5084 = vrot.lane.b32.xlu0 %v7239_v38, %s5399_s25  ;;  %5069 = vrot.lane.b32.xlu1 %v5068_v12, %s5402_s23  ;;  %v7546_v2 = vpop.permute.xlu1 %4839 }
 0x3bc   : > { %5094 = vrot.lane.b32.xlu0 %v5093_v10, %s5402_s23  ;;  %5074 = vrot.lane.b32.xlu1 %v7239_v38, %s5403_s29  ;;  %v4551_v38 = vld [vmem:[%s5444_s20 + $0xf1] sm:$0xff]  ;;  %v7554_v44 = vpop.permute.xlu1 %4849 }
 0x3c0   : > { %5099 = vrot.lane.b32.xlu0 %v7247_v50, %s5403_s29  ;;  %5079 = vrot.lane.b32.xlu1 %v5068_v12, %s5397_s26  ;;  %v7563_v32 = vpop.permute.xlu1 %4859  ;;  %v5143_v12 = vpack.i.bf16 %v2258_v37, %v7406_v45 }
 0x3c2   : > { %v7548_v29 = vpop.permute.xlu0 %4864 }
 0x3c3   : > { %8698 = vst [vmem:[#allocation43_spill] sm:$0xff] %v7548_v29 }
 0x3c4   : > { %5104 = vrot.lane.b32.xlu0 %v5093_v10, %s5397_s26  ;;  %5089 = vrot.lane.b32.xlu1 %v7326_v39, %s5404_s30  ;;  %v4554_v39 = vld [vmem:[%s5444_s20 + $0x111] sm:$0xff]  ;;  %v2361_v10 = vld [vmem:[#allocation2 + $0x21] sm:$0xff] }
 0x3c6   : > { %v7556_v33 = vpop.permute.xlu0 %4874 }
 0x3c8   : > { %5114 = vrot.lane.b32.xlu0 %v7371_v28, %s5404_s30  ;;  %3517 = vrot.lane.b32.xlu1 %v4551_v38, %s5393_s22  ;;  %v2360_v28 = vld [vmem:[#allocation2 + $0x19] sm:$0xff] }
 0x3c9   : > { %v5133_v31 = vpack.i.bf16 %v7256_v34, %v2360_v28 }
 0x3ca   : > { %v7565_v41 = vpop.permute.xlu0 %4884 }
 0x3cc   : > { %3521 = vrot.lane.b32.xlu0 %v4553_v55, %s5393_s22  ;;  %3519 = vrot.lane.b32.xlu1 %v4552_v27, %s5393_s22  ;;  %v5153_v55 = vpack.i.bf16 %v7253_v18, %v2361_v10  ;;  %v2259_v27 = vld [vmem:[#allocation2 + $0x140] sm:$0xff]  ;;  %v4556_v18 = vld [vmem:[%s5444_s20 + $0x129] sm:$0xff] }
 0x3cd   : > { %v5163_v28 = vpack.i.bf16 %v2259_v27, %v7408_v56 }
 0x3ce   : > { %v7570_v16 = vpop.permute.xlu0 %4894  ;;  %v7572_v19 = vpop.permute.xlu1 %4869 }
 0x3cf   : > { %8699 = vst [vmem:[#allocation44_spill] sm:$0xff] %v7570_v16  ;;  %8700 = vst [vmem:[#allocation47_spill] sm:$0xff] %v7572_v19 }
 0x3d0   : > { %3523 = vrot.lane.b32.xlu0 %v4554_v39, %s5393_s22  ;;  %5109 = vrot.lane.b32.xlu1 %v7247_v50, %s5399_s25  ;;  %v4555_v50 = vld [vmem:[%s5444_s20 + $0x121] sm:$0xff]  ;;  %v4533_v39 = vld [vmem:[%s5444_s20 + $0x19] sm:$0xff] }
 0x3d2   : > { %v7577_v1 = vpop.permute.xlu0 %4904  ;;  %v7579_v53 = vpop.permute.xlu1 %4879 }
 0x3d4   : > { %5134 = vrot.lane.b32.xlu0 %v5133_v31, %s5399_s25  ;;  %5119 = vrot.lane.b32.xlu1 %v5118_v36, %s5402_s23  ;;  %v2457_v31 = vld [vmem:[#allocation2 + $0x31] sm:$0xff] }
 0x3d6   : > { %v7584_v54 = vpop.permute.xlu0 %4914  ;;  %v7586_v60 = vpop.permute.xlu1 %4889 }
 0x3d7   : > { %8701 = vst [vmem:[#allocation50_spill] sm:$0xff] %v7586_v60  ;;  %v4557_v60 = vld [vmem:[%s5444_s20 + $0x139] sm:$0xff] }
 0x3d8   : > { %5144 = vrot.lane.b32.xlu0 %v5143_v12, %s5402_s23  ;;  %5124 = vrot.lane.b32.xlu1 %v7261_v57, %s5403_s29  ;;  %v5138_v57 = vpack.i.bf16 %v7328_v24, %v7292_v61  ;;  %v7624_v12 = vld [vmem:[#allocation2 + $0x39] sm:$0xff] }
 0x3d9   : > { %v5173_v10 = vpack.i.bf16 %v7267_v58, %v7624_v12  ;;  %v4535_v58 = vld [vmem:[%s5444_s20 + $0x31] sm:$0xff] }
 0x3da   : > { %v7593_v34 = vpop.permute.xlu0 %4924  ;;  %v7595_v42 = vpop.permute.xlu1 %4899 }
 0x3db   : > { %v4901_v16 = vunpack.i.l.bf16 %v7595_v42 }
 0x3dc   : > { %3525 = vrot.lane.b32.xlu0 %v4555_v50, %s5393_s22  ;;  %5129 = vrot.lane.b32.xlu1 %v5118_v36, %s5397_s26  ;;  %v5148_v36 = vpack.i.bf16 %v7270_v15, %v2457_v31  ;;  %v4534_v15 = vld [vmem:[%s5444_s20 + $0x21] sm:$0xff] }
 0x3de   : > { %v7599_v38 = vpop.permute.xlu0 %4934  ;;  %v7601_v45 = vpop.permute.xlu1 %4909 }
 0x3e0   : > { %5154 = vrot.lane.b32.xlu0 %v5153_v55, %s5399_s25  ;;  %5139 = vrot.lane.b32.xlu1 %v5138_v57, %s5404_s30  ;;  %v5158_v55 = vpack.i.bf16 %v7330_v47, %v7290_v63  ;;  %v5168_v63 = vpack.i.bf16 %v2259_v27, %v2258_v37  ;;  %v2481_v47 = vld [vmem:[#allocation2 + $0x151] sm:$0xff]  ;;  %v4822_v37 = vunpack.i.h.bf16 %v7531_v20  ;;  %v7662_v27 = vld [vmem:[#allocation2 + $0x3a] sm:$0xff] }
 0x3e2   : > { %v7609_v26 = vpop.permute.xlu0 %4944  ;;  %v7611_v11 = vpop.permute.xlu1 %4919 }
 0x3e3   : > { %8702 = vst [vmem:[#allocation53_spill] sm:$0xff] %v7609_v26  ;;  %v4536_v26 = vld [vmem:[%s5444_s20 + $0x39] sm:$0xff] }
 0x3e4   : > { %5164 = vrot.lane.b32.xlu0 %v5163_v28, %s5402_s23  ;;  %3481 = vrot.lane.b32.xlu1 %v4533_v39, %s5393_s22  ;;  %v5183_v28 = vpack.i.bf16 %v7373_v48, %v7283_v9 }
 0x3e6   : > { %v7617_v61 = vpop.permute.xlu0 %4954  ;;  %v7619_v24 = vpop.permute.xlu1 %4929 }
 0x3e8   : > { %3527 = vrot.lane.b32.xlu0 %v4556_v18, %s5393_s22  ;;  %5149 = vrot.lane.b32.xlu1 %v5148_v36, %s5403_s29 }
 0x3ea   : > { %v7626_v56 = vpop.permute.xlu0 %4964  ;;  %v7628_v50 = vpop.permute.xlu1 %4939 }
 0x3ec   : > { %5174 = vrot.lane.b32.xlu0 %v5173_v10, %s5403_s29  ;;  %5159 = vrot.lane.b32.xlu1 %v5158_v55, %s5404_s30  ;;  %v2384_v10 = vld [vmem:[#allocation2 + $0x139] sm:$0xff]  ;;  %v2459_v55 = vld [vmem:[#allocation2 + $0x49] sm:$0xff] }
 0x3ed   : > { %v7654_v9 = vpack.i.bf16 %v2481_v47, %v2459_v55  ;;  %v5178_v48 = vpack.i.bf16 %v2384_v10, %v2457_v31  ;;  %v5203_v10 = vpack.i.bf16 %v7375_v25, %v7662_v27 }
 0x3ee   : > { %v7637_v57 = vpop.permute.xlu0 %4974  ;;  %v7639_v39 = vpop.permute.xlu1 %4949 }
 0x3ef   : > { %8703 = vst [vmem:[#allocation54_spill] sm:$0xff] %v7637_v57  ;;  %8704 = vst [vmem:[#allocation56_spill] sm:$0xff] %v7639_v39 }
 0x3f0   : > { %5184 = vrot.lane.b32.xlu0 %v5183_v28, %s5404_s30  ;;  %3483 = vrot.lane.b32.xlu1 %v4534_v15, %s5393_s22  ;;  %v4821_v15 = vunpack.i.l.bf16 %v7531_v20  ;;  %v2260_v28 = vld [vmem:[#allocation2 + $0x150] sm:$0xff] }
 0x3f2   : > { %v4985_v18 = vpop.permute.xlu0 %4984  ;;  %v7646_v36 = vpop.permute.xlu1 %4959  ;;  %v3587_v19 = vsel %vm1545_vm1, %v7388_v49, %v4821_v15  ;;  %v2261_v15 = vld [vmem:[#allocation2 + $0x158] sm:$0xff] }
 0x3f3   : > { %v3619_v20 = vsel %vm1611_vm3, %v3587_v19, %v4901_v16 }
 0x3f4   : > { %3485 = vrot.lane.b32.xlu0 %v4535_v58, %s5393_s22  ;;  %5169 = vrot.lane.b32.xlu1 %v5168_v63, %s5397_s26  ;;  %v2427_v58 = vld [vmem:[#allocation2 + $0x48] sm:$0xff]  ;;  %v4902_v63 = vunpack.i.h.bf16 %v7595_v42  ;;  %v3588_v42 = vsel %vm1545_vm1, %v7392_v40, %v4822_v37 }
 0x3f5   : > { %v5188_v55 = vpack.i.bf16 %v2260_v28, %v2427_v58  ;;  %v4986_v58 = vunpack.i.l.bf16 %v4985_v18 }
 0x3f6   : > { %v7650_v57 = vpop.permute.xlu0 %4994  ;;  %v7652_v39 = vpop.permute.xlu1 %4969  ;;  %v3620_v25 = vsel %vm1611_vm3, %v3588_v42, %v4902_v63  ;;  %v5213_v42 = vpack.i.bf16 %v2261_v15, %v2260_v28 }
 0x3f7   : > { %8705 = vst [vmem:[#allocation57_spill] sm:$0xff] %v7652_v39  ;;  %v4996_v40 = vunpack.i.l.bf16 %v7650_v57  ;;  %v4997_v62 = vunpack.i.h.bf16 %v7650_v57 }
 0x3f8   : > { %5194 = vrot.lane.b32.xlu0 %v7654_v9, %s5403_s29  ;;  %5179 = vrot.lane.b32.xlu1 %v5178_v48, %s5399_s25 }
 0x3fa   : > { %v7665_v31 = vpop.permute.xlu0 %4999  ;;  %v4980_v47 = vpop.permute.xlu1 %4979 }
 0x3fb   : > { %v4982_v48 = vunpack.i.h.bf16 %v4980_v47  ;;  %v4981_v52 = vunpack.i.l.bf16 %v4980_v47  ;;  %v5001_v37 = vunpack.i.l.bf16 %v7665_v31 }
 0x3fc   : > { %5204 = vrot.lane.b32.xlu0 %v5203_v10, %s5404_s30  ;;  %5189 = vrot.lane.b32.xlu1 %v5188_v55, %s5402_s23  ;;  %v2385_v10 = vld [vmem:[#allocation2 + $0x141] sm:$0xff]  ;;  %v4987_v55 = vunpack.i.h.bf16 %v4985_v18  ;;  %v2499_v18 = vld [vmem:[#allocation2 + $0xaa] sm:$0xff] }
 0x3fd   : > { %v3651_v39 = vsel %vm1677_vm5, %v3619_v20, %v4981_v52  ;;  %v3652_v16 = vsel %vm1677_vm5, %v3620_v25, %v4982_v48  ;;  %v5198_v25 = vpack.i.bf16 %v2385_v10, %v7624_v12  ;;  %v2428_v12 = vld [vmem:[#allocation2 + $0x50] sm:$0xff] }
 0x3fe   : > { %v7680_v29 = vpop.permute.xlu0 %5004  ;;  %v4990_v49 = vpop.permute.xlu1 %4989  ;;  %v3683_v52 = vsel %vm1743_vm7, %v3651_v39, %v4986_v58  ;;  %v5208_v10 = vpack.i.bf16 %v2261_v15, %v2428_v12  ;;  %v2460_v12 = vld [vmem:[#allocation2 + $0x51] sm:$0xff] }
 0x3ff   : > { %v4992_v19 = vunpack.i.h.bf16 %v4990_v49  ;;  %v4991_v47 = vunpack.i.l.bf16 %v4990_v49 }
 0x400   : > { %3487 = vrot.lane.b32.xlu0 %v4536_v26, %s5393_s22  ;;  %3529 = vrot.lane.b32.xlu1 %v4557_v60, %s5393_s22  ;;  %v3684_v26 = vsel %vm1743_vm7, %v3652_v16, %v4987_v55 }
 0x401   : > { %v3716_v63 = vsel %vm3705_vm10, %v3683_v52, %v4991_v47  ;;  %v3717_v58 = vsel %vm3705_vm10, %v3684_v26, %v4992_v19  ;;  %v2500_v47 = vld [vmem:[#allocation2 + $0xb2] sm:$0xff]  ;;  %v5002_v19 = vunpack.i.h.bf16 %v7665_v31  ;;  %v4826_v52 = vunpack.i.l.bf16 %v7511_v22 }
 0x402   : > { %v7689_v20 = vpop.permute.xlu0 %5014  ;;  %v3502_v48 = vpop.permute.xlu1 %3501  ;;  %v3749_v49 = vsel %vm3738_vm11, %v3716_v63, %v4996_v40  ;;  %v3750_v55 = vsel %vm3738_vm11, %v3717_v58, %v4997_v62  ;;  %v7702_v40 = vld [vmem:[#allocation2 + $0x168] sm:$0xff]  ;;  %v2429_v63 = vld [vmem:[#allocation2 + $0x60] sm:$0xff]  ;;  %v4559_v58 = vld [vmem:[%s5444_s20 + $0x151] sm:$0xff] }
 0x403   : > { %v3814_v60 = vsel %vm1545_vm1, %v2499_v18, %v3502_v48  ;;  %v3782_v39 = vsel %vm3771_vm12, %v3749_v49, %v5001_v37  ;;  %v2501_v37 = vld [vmem:[#allocation2 + $0xc2] sm:$0xff]  ;;  %v3783_v15 = vsel %vm3771_vm12, %v3750_v55, %v5002_v19  ;;  %v4906_v48 = vunpack.i.l.bf16 %v7577_v1  ;;  %v2482_v49 = vld [vmem:[#allocation2 + $0x159] sm:$0xff] }
 0x404   : > { %5214 = vrot.lane.b32.xlu0 %v5213_v42, %s5397_s26  ;;  %5199 = vrot.lane.b32.xlu1 %v5198_v25, %s5399_s25  ;;  %v4558_v62 = vld [vmem:[%s5444_s20 + $0x141] sm:$0xff]  ;;  %v5006_v18 = vunpack.i.l.bf16 %v7680_v29  ;;  %v5218_v55 = vpack.i.bf16 %v2482_v49, %v2460_v12  ;;  %v5007_v19 = vunpack.i.h.bf16 %v7680_v29  ;;  %v4832_v12 = vunpack.i.h.bf16 %v7539_v8 }
 0x405   : > { %4576 = vmatprep.mubr.msk.f32.mxu1 %vm1578_vm2, %v3814_v60  ;;  %v4827_v60 = vunpack.i.h.bf16 %v7511_v22 }
 0x406   : > { %4071 = vmatmul.mubr.f32.vlgmr.msra.gmra.mrb[0].mxu1 %v3782_v39  ;;  %v3506_v28 = vpop.permute.xlu0 %3505  ;;  %v3504_v16 = vpop.permute.xlu1 %3503  ;;  %v3589_v39 = vsel %vm1545_vm1, %v7439_v17, %v4826_v52  ;;  %v5016_v52 = vunpack.i.l.bf16 %v7689_v20 }
 0x407   : > { %v3815_v57 = vsel %vm1545_vm1, %v2500_v47, %v3504_v16  ;;  %v3816_v31 = vsel %vm1545_vm1, %v2501_v37, %v3506_v28  ;;  %v4907_v28 = vunpack.i.h.bf16 %v7577_v1  ;;  %v3621_v47 = vsel %vm1611_vm3, %v3589_v39, %v4906_v48  ;;  %v7730_v37 = vld [vmem:[#allocation2 + $0x152] sm:$0xff] }
 0x408   : > { %5224 = vrot.lane.b32.xlu0 %v7654_v9, %s5399_s25  ;;  %5209 = vrot.lane.b32.xlu1 %v5208_v10, %s5402_s23  ;;  %v5233_v9 = vpack.i.bf16 %v7702_v40, %v2429_v63  ;;  %v3590_v1 = vsel %vm1545_vm1, %v7441_v14, %v4827_v60  ;;  %v7738_v63 = vld [vmem:[#allocation2 + $0x4a] sm:$0xff] }
 0x409   : > { %4577 = vmatprep.mubr.msk.f32.mxu1 %vm1578_vm2, %v3815_v57  ;;  %v3653_v57 = vsel %vm1677_vm5, %v3621_v47, %v5006_v18  ;;  %v3622_v29 = vsel %vm1611_vm3, %v3590_v1, %v4907_v28  ;;  %v5017_v28 = vunpack.i.h.bf16 %v7689_v20  ;;  %v2502_v47 = vld [vmem:[#allocation2 + $0xca] sm:$0xff] }
 0x40a   : > { %4076 = vmatmul.mubr.f32.gmra.mrb[2].mxu1 %v3783_v15  ;;  %v3508_v42 = vpop.permute.xlu0 %3507  ;;  %v5010_v25 = vpop.permute.xlu1 %5009  ;;  %v3654_v18 = vsel %vm1677_vm5, %v3622_v29, %v5007_v19  ;;  %v4537_v1 = vld [vmem:[%s5444_s20 + $0x49] sm:$0xff] }
 0x40b   : > { %4578 = vmatprep.mubr.msk.f32.mxu1 %vm1578_vm2, %v3816_v31  ;;  %v5011_v26 = vunpack.i.l.bf16 %v5010_v25  ;;  %v5012_v22 = vunpack.i.h.bf16 %v5010_v25  ;;  %v5228_v31 = vpack.i.bf16 %v7730_v37, %v7738_v63  ;;  %v4831_v25 = vunpack.i.l.bf16 %v7539_v8 }
 0x40c   : > { %5234 = vrot.lane.b32.xlu0 %v5233_v9, %s5402_s23  ;;  %3531 = vrot.lane.b32.xlu1 %v4558_v62, %s5393_s22  ;;  %v7746_v9 = vld [vmem:[#allocation2 + $0x170] sm:$0xff] }
 0x40d   : > { %v3685_v15 = vsel %vm1743_vm7, %v3653_v57, %v5011_v26  ;;  %v4911_v26 = vunpack.i.l.bf16 %v7601_v45  ;;  %v3686_v60 = vsel %vm1743_vm7, %v3654_v18, %v5012_v22  ;;  %v3591_v8 = vsel %vm1545_vm1, %v7422_v7, %v4831_v25 }
 0x40e   : > { %v7726_v16 = vpop.permute.xlu0 %5034  ;;  %v5020_v10 = vpop.permute.xlu1 %5019  ;;  %v3718_v49 = vsel %vm3705_vm10, %v3685_v15, %v5016_v52  ;;  %v2430_v15 = vld [vmem:[#allocation2 + $0x68] sm:$0xff]  ;;  %v4912_v52 = vunpack.i.h.bf16 %v7601_v45  ;;  %v3592_v18 = vsel %vm1545_vm1, %v7424_v0, %v4832_v12  ;;  %v2484_v12 = vld [vmem:[#allocation2 + $0x171] sm:$0xff] }
 0x40f   : > { %v5021_v17 = vunpack.i.l.bf16 %v5020_v10  ;;  %v5022_v39 = vunpack.i.h.bf16 %v5020_v10  ;;  %v3817_v10 = vsel %vm1545_vm1, %v2502_v47, %v3508_v42  ;;  %v3623_v45 = vsel %vm1611_vm3, %v3591_v8, %v4911_v26 }
 0x410   : > { %3533 = vrot.lane.b32.xlu0 %v4559_v58, %s5393_s22  ;;  %5219 = vrot.lane.b32.xlu1 %v5218_v55, %s5403_s29 }
 0x411   : > { %v3751_v58 = vsel %vm3738_vm11, %v3718_v49, %v5021_v17  ;;  %v5253_v17 = vpack.i.bf16 %v7746_v9, %v2430_v15  ;;  %v2461_v49 = vld [vmem:[#allocation2 + $0x61] sm:$0xff] }
 0x412   : > { %v7741_v62 = vpop.permute.xlu0 %5044  ;;  %v5025_v48 = vpop.permute.xlu1 %5024  ;;  %v7784_v15 = vld [vmem:[#allocation2 + $0x15a] sm:$0xff] }
 0x413   : > { %v5026_v14 = vunpack.i.l.bf16 %v5025_v48  ;;  %v5027_v19 = vunpack.i.h.bf16 %v5025_v48  ;;  %v3719_v48 = vsel %vm3705_vm10, %v3686_v60, %v5017_v28  ;;  %v3624_v60 = vsel %vm1611_vm3, %v3592_v18, %v4912_v52 }
 0x414   : > { %5244 = vrot.lane.b32.xlu0 %v5218_v55, %s5399_s25  ;;  %5229 = vrot.lane.b32.xlu1 %v5228_v31, %s5404_s30  ;;  %v2483_v31 = vld [vmem:[#allocation2 + $0x169] sm:$0xff]  ;;  %v3752_v42 = vsel %vm3738_vm11, %v3719_v48, %v5022_v39 }
 0x415   : > { %v3784_v57 = vsel %vm3771_vm12, %v3751_v58, %v5026_v14  ;;  %v3785_v25 = vsel %vm3771_vm12, %v3752_v42, %v5027_v19  ;;  %v4560_v14 = vld [vmem:[%s5444_s20 + $0x159] sm:$0xff]  ;;  %v5036_v58 = vunpack.i.l.bf16 %v7726_v16  ;;  %v7781_v47 = vpack.i.bf16 %v2483_v31, %v2461_v49 }
 0x416   : > { %v7761_v22 = vpop.permute.xlu0 %5049  ;;  %v5030_v55 = vpop.permute.xlu1 %5029  ;;  %4081 = vmatmul.mubr.f32.gmra.mrb[4].mxu1 %v3784_v57  ;;  %v5037_v19 = vunpack.i.h.bf16 %v7726_v16  ;;  %v2503_v16 = vld [vmem:[#allocation2 + $0xda] sm:$0xff]  ;;  %v5047_v49 = vunpack.i.h.bf16 %v7741_v62 }
 0x417   : > { %v5032_v20 = vunpack.i.h.bf16 %v5030_v55  ;;  %v5031_v29 = vunpack.i.l.bf16 %v5030_v55  ;;  %4579 = vmatprep.mubr.msk.f32.mxu1 %vm1578_vm2, %v3817_v10  ;;  %v5051_v10 = vunpack.i.l.bf16 %v7761_v22  ;;  %v2462_v55 = vld [vmem:[#allocation2 + $0x69] sm:$0xff] }
 0x418   : > { %5254 = vrot.lane.b32.xlu0 %v5253_v17, %s5402_s23  ;;  %3489 = vrot.lane.b32.xlu1 %v4537_v1, %s5393_s22  ;;  %v5046_v1 = vunpack.i.l.bf16 %v7741_v62  ;;  %v7793_v17 = vld [vmem:[#allocation2 + $0x52] sm:$0xff]  ;;  %v7798_v48 = vpack.i.bf16 %v2484_v12, %v2462_v55  ;;  %v5052_v12 = vunpack.i.h.bf16 %v7761_v22  ;;  %v4539_v55 = vld [vmem:[%s5444_s20 + $0x61] sm:$0xff] }
 0x419   : > { %v3655_v7 = vsel %vm1677_vm5, %v3623_v45, %v5031_v29  ;;  %v3656_v39 = vsel %vm1677_vm5, %v3624_v60, %v5032_v20  ;;  %v5248_v31 = vpack.i.bf16 %v7784_v15, %v7793_v17  ;;  %v7814_v60 = vld [vmem:[#allocation2 + $0x62] sm:$0xff] }
 0x41a   : > { %v7779_v26 = vpop.permute.xlu0 %5054  ;;  %v5040_v28 = vpop.permute.xlu1 %5039  ;;  %4086 = vmatmul.mubr.f32.gmra.mrb[6].mxu1 %v3785_v25  ;;  %v3687_v52 = vsel %vm1743_vm7, %v3655_v7, %v5036_v58  ;;  %v3688_v42 = vsel %vm1743_vm7, %v3656_v39, %v5037_v19  ;;  %v7806_v25 = vld [vmem:[#allocation2 + $0x16a] sm:$0xff]  ;;  %v2504_v39 = vld [vmem:[#allocation2 + $0xe2] sm:$0xff] }
 0x41b   : > { %v5042_v57 = vunpack.i.h.bf16 %v5040_v28  ;;  %v5041_v0 = vunpack.i.l.bf16 %v5040_v28  ;;  %v4538_v58 = vld [vmem:[%s5444_s20 + $0x51] sm:$0xff] }
 0x41c   : > { %3535 = vrot.lane.b32.xlu0 %v4560_v14, %s5393_s22  ;;  %5239 = vrot.lane.b32.xlu1 %v7781_v47, %s5403_s29 }
 0x41d   : > { %v3720_v8 = vsel %vm3705_vm10, %v3687_v52, %v5041_v0  ;;  %v3721_v14 = vsel %vm3705_vm10, %v3688_v42, %v5042_v57  ;;  %v5273_v57 = vpack.i.bf16 %v7806_v25, %v7814_v60  ;;  %v2505_v52 = vld [vmem:[#allocation2 + $0xf2] sm:$0xff]  ;;  %v2485_v42 = vld [vmem:[#allocation2 + $0x181] sm:$0xff] }
 0x41e   : > { %v7796_v20 = vpop.permute.xlu0 %5064  ;;  %v3510_v29 = vpop.permute.xlu1 %3509  ;;  %v3753_v45 = vsel %vm3738_vm11, %v3720_v8, %v5046_v1  ;;  %v3754_v62 = vsel %vm3738_vm11, %v3721_v14, %v5047_v49  ;;  %v4836_v1 = vunpack.i.l.bf16 %v7522_v43  ;;  %v4916_v8 = vunpack.i.l.bf16 %v7584_v54  ;;  %v2463_v49 = vld [vmem:[#allocation2 + $0x79] sm:$0xff] }
 0x41f   : > { %v3818_v18 = vsel %vm1545_vm1, %v2503_v16, %v3510_v29  ;;  %v3786_v7 = vsel %vm3771_vm12, %v3753_v45, %v5051_v10  ;;  %v3787_v10 = vsel %vm3771_vm12, %v3754_v62, %v5052_v12  ;;  %v5056_v45 = vunpack.i.l.bf16 %v7779_v26  ;;  %v7847_v62 = vld [vmem:[#allocation2 + $0x172] sm:$0xff] }
 0x420   : > { %5264 = vrot.lane.b32.xlu0 %v7798_v48, %s5403_s29  ;;  %5249 = vrot.lane.b32.xlu1 %v5248_v31, %s5404_s30  ;;  %v5258_v31 = vpack.i.bf16 %v7746_v9, %v7702_v40  ;;  %v3593_v14 = vsel %vm1545_vm1, %v7467_v59, %v4836_v1  ;;  %v7857_v1 = vld [vmem:[#allocation2 + $0x6a] sm:$0xff] }
 0x421   : > { %4580 = vmatprep.mubr.msk.f32.mxu1 %vm1578_vm2, %v3818_v18  ;;  %v3625_v40 = vsel %vm1611_vm3, %v3593_v14, %v4916_v8 }
 0x422   : > { %4091 = vmatmul.mubr.f32.gmra.mrb[8].mxu1 %v3786_v7  ;;  %v3514_v28 = vpop.permute.xlu0 %3513  ;;  %v3512_v0 = vpop.permute.xlu1 %3511  ;;  %v4837_v7 = vunpack.i.h.bf16 %v7522_v43  ;;  %v2453_v43 = vld [vmem:[#allocation2 + $0x180] sm:$0xff] }
 0x423   : > { %v3819_v19 = vsel %vm1545_vm1, %v2504_v39, %v3512_v0  ;;  %v3820_v16 = vsel %vm1545_vm1, %v2505_v52, %v3514_v28  ;;  %v7843_v39 = vpack.i.bf16 %v2485_v42, %v2463_v49  ;;  %v5057_v0 = vunpack.i.h.bf16 %v7779_v26  ;;  %v2431_v52 = vld [vmem:[#allocation2 + $0x78] sm:$0xff] }
 0x424   : > { %5274 = vrot.lane.b32.xlu0 %v5273_v57, %s5404_s30  ;;  %3491 = vrot.lane.b32.xlu1 %v4538_v58, %s5393_s22  ;;  %v4917_v58 = vunpack.i.h.bf16 %v7584_v54  ;;  %v3657_v57 = vsel %vm1677_vm5, %v3625_v40, %v5056_v45  ;;  %v3594_v54 = vsel %vm1545_vm1, %v7469_v46, %v4837_v7  ;;  %v5066_v26 = vunpack.i.l.bf16 %v7796_v20  ;;  %v2506_v40 = vld [vmem:[#allocation2 + $0xfa] sm:$0xff] }
 0x425   : > { %4581 = vmatprep.mubr.msk.f32.mxu1 %vm1578_vm2, %v3819_v19  ;;  %v4921_v42 = vunpack.i.l.bf16 %v7611_v11  ;;  %v4842_v49 = vunpack.i.h.bf16 %v7546_v2 }
 0x426   : > { %4096 = vmatmul.mubr.f32.gmra.mrb[10].mxu1 %v3787_v10  ;;  %v3516_v22 = vpop.permute.xlu0 %3515  ;;  %v5060_v29 = vpop.permute.xlu1 %5059  ;;  %v3626_v10 = vsel %vm1611_vm3, %v3594_v54, %v4917_v58  ;;  %v5067_v58 = vunpack.i.h.bf16 %v7796_v20  ;;  %v4561_v54 = vld [vmem:[%s5444_s20 + $0x169] sm:$0xff] }
 0x427   : > { %4582 = vmatprep.mubr.msk.f32.mxu1 %vm1578_vm2, %v3820_v16  ;;  %v5061_v18 = vunpack.i.l.bf16 %v5060_v29  ;;  %v5062_v12 = vunpack.i.h.bf16 %v5060_v29  ;;  %v5293_v16 = vpack.i.bf16 %v7847_v62, %v7857_v1  ;;  %v5278_v29 = vpack.i.bf16 %v2453_v43, %v2431_v52 }
 0x428   : > { %3493 = vrot.lane.b32.xlu0 %v4539_v55, %s5393_s22  ;;  %5259 = vrot.lane.b32.xlu1 %v5258_v31, %s5397_s26  ;;  %v3658_v46 = vsel %vm1677_vm5, %v3626_v10, %v5057_v0 }
 0x429   : > { %v3689_v59 = vsel %vm1743_vm7, %v3657_v57, %v5061_v18  ;;  %v3690_v18 = vsel %vm1743_vm7, %v3658_v46, %v5062_v12 }
 0x42a   : > { %v7841_v9 = vpop.permute.xlu0 %5084  ;;  %v5070_v28 = vpop.permute.xlu1 %5069  ;;  %v3722_v45 = vsel %vm3705_vm10, %v3689_v59, %v5066_v26  ;;  %v4540_v59 = vld [vmem:[%s5444_s20 + $0x69] sm:$0xff]  ;;  %v4922_v26 = vunpack.i.h.bf16 %v7611_v11  ;;  %v3723_v20 = vsel %vm3705_vm10, %v3690_v18, %v5067_v58 }
 0x42b   : > { %v5071_v19 = vunpack.i.l.bf16 %v5070_v28  ;;  %v5072_v7 = vunpack.i.h.bf16 %v5070_v28  ;;  %v3821_v28 = vsel %vm1545_vm1, %v2506_v40, %v3516_v22  ;;  %v3596_v22 = vsel %vm1545_vm1, %v7478_v5, %v4842_v49 }
 0x42c   : > { %5284 = vrot.lane.b32.xlu0 %v7843_v39, %s5403_s29  ;;  %5269 = vrot.lane.b32.xlu1 %v7781_v47, %s5399_s25  ;;  %v4841_v47 = vunpack.i.l.bf16 %v7546_v2  ;;  %v5086_v46 = vunpack.i.l.bf16 %v7841_v9  ;;  %v5087_v58 = vunpack.i.h.bf16 %v7841_v9 }
 0x42d   : > { %v3755_v14 = vsel %vm3738_vm11, %v3722_v45, %v5071_v19  ;;  %v3756_v11 = vsel %vm3738_vm11, %v3723_v20, %v5072_v7 }
 0x42e   : > { %v7860_v55 = vpop.permute.xlu0 %5094  ;;  %v5075_v8 = vpop.permute.xlu1 %5074  ;;  %v3595_v19 = vsel %vm1545_vm1, %v7476_v6, %v4841_v47  ;;  %v3628_v47 = vsel %vm1611_vm3, %v3596_v22, %v4922_v26 }
 0x42f   : > { %v5076_v31 = vunpack.i.l.bf16 %v5075_v8  ;;  %v5077_v0 = vunpack.i.h.bf16 %v5075_v8  ;;  %v2359_v8 = vld [vmem:[#allocation2 + $0x188] sm:$0xff]  ;;  %v5096_v5 = vunpack.i.l.bf16 %v7860_v55  ;;  %v5097_v20 = vunpack.i.h.bf16 %v7860_v55 }
 0x430   : > { %5294 = vrot.lane.b32.xlu0 %v5293_v16, %s5404_s30  ;;  %5279 = vrot.lane.b32.xlu1 %v5278_v29, %s5402_s23  ;;  %v3627_v16 = vsel %vm1611_vm3, %v3595_v19, %v4921_v42  ;;  %v5303_v42 = vpack.i.bf16 %v2359_v8, %v2453_v43  ;;  %v2433_v19 = vld [vmem:[#allocation2 + $0x90] sm:$0xff] }
 0x431   : > { %v3788_v57 = vsel %vm3771_vm12, %v3755_v14, %v5076_v31  ;;  %v3789_v29 = vsel %vm3771_vm12, %v3756_v11, %v5077_v0  ;;  %v2432_v0 = vld [vmem:[#allocation2 + $0x80] sm:$0xff]  ;;  %v2508_v11 = vld [vmem:[#allocation2 + $0x112] sm:$0xff] }
 0x432   : > { %v7879_v12 = vpop.permute.xlu0 %5099  ;;  %v5080_v52 = vpop.permute.xlu1 %5079  ;;  %4101 = vmatmul.mubr.f32.gmra.mrb[12].mxu1 %v3788_v57  ;;  %v5298_v9 = vpack.i.bf16 %v2359_v8, %v2432_v0  ;;  %v4562_v8 = vld [vmem:[%s5444_s20 + $0x171] sm:$0xff]  ;;  %v7932_v0 = vld [vmem:[#allocation2 + $0x182] sm:$0xff] }
 0x433   : > { %v5082_v2 = vunpack.i.h.bf16 %v5080_v52  ;;  %v5081_v10 = vunpack.i.l.bf16 %v5080_v52  ;;  %4583 = vmatprep.mubr.msk.f32.mxu1 %vm1578_vm2, %v3821_v28  ;;  %v5101_v40 = vunpack.i.l.bf16 %v7879_v12 }
 0x434   : > { %3495 = vrot.lane.b32.xlu0 %v4540_v59, %s5393_s22  ;;  %3537 = vrot.lane.b32.xlu1 %v4561_v54, %s5393_s22  ;;  %v2507_v59 = vld [vmem:[#allocation2 + $0x10a] sm:$0xff] }
 0x435   : > { %v3659_v6 = vsel %vm1677_vm5, %v3627_v16, %v5081_v10  ;;  %v3660_v18 = vsel %vm1677_vm5, %v3628_v47, %v5082_v2  ;;  %v2455_v2 = vld [vmem:[#allocation2 + $0x198] sm:$0xff]  ;;  %v5102_v47 = vunpack.i.h.bf16 %v7879_v12 }
 0x436   : > { %v7895_v31 = vpop.permute.xlu0 %5104  ;;  %v5090_v45 = vpop.permute.xlu1 %5089  ;;  %4106 = vmatmul.mubr.f32.gmra.mrb[14].mxu1 %v3789_v29  ;;  %v3691_v49 = vsel %vm1743_vm7, %v3659_v6, %v5086_v46  ;;  %v3692_v28 = vsel %vm1743_vm7, %v3660_v18, %v5087_v58  ;;  %v5323_v6 = vpack.i.bf16 %v2455_v2, %v2433_v19  ;;  %v2486_v46 = vld [vmem:[#allocation2 + $0x189] sm:$0xff]  ;;  %v4563_v18 = vld [vmem:[%s5444_s20 + $0x181] sm:$0xff] }
 0x437   : > { %v5092_v14 = vunpack.i.h.bf16 %v5090_v45  ;;  %v5091_v7 = vunpack.i.l.bf16 %v5090_v45  ;;  %v2509_v45 = vld [vmem:[#allocation2 + $0x122] sm:$0xff]  ;;  %v5107_v2 = vunpack.i.h.bf16 %v7895_v31 }
 0x438   : > { %5304 = vrot.lane.b32.xlu0 %v5303_v42, %s5397_s26  ;;  %5289 = vrot.lane.b32.xlu1 %v7798_v48, %s5399_s25  ;;  %s4600_s26 = sshll.u32 %s8717_s16, 8 }
 0x439   : > { %v3724_v43 = vsel %vm3705_vm10, %v3691_v49, %v5091_v7  ;;  %v3725_v10 = vsel %vm3705_vm10, %v3692_v28, %v5092_v14  ;;  %v2464_v14 = vld [vmem:[#allocation2 + $0x81] sm:$0xff]  ;;  %v4926_v7 = vunpack.i.l.bf16 %v7593_v34  ;;  %s8295_s6 = scalar_lea.vmem %s8399_s4, %s4600_s26 }
 0x43a   : > { %v7906_v57 = vpop.permute.xlu0 %5114  ;;  %v3518_v54 = vpop.permute.xlu1 %3517  ;;  %v3757_v26 = vsel %vm3738_vm11, %v3724_v43, %v5096_v5  ;;  %v3758_v29 = vsel %vm3738_vm11, %v3725_v10, %v5097_v20  ;;  %v5308_v49 = vpack.i.bf16 %v2486_v46, %v2464_v14  ;;  %v2434_v10 = vld [vmem:[#allocation2 + $0x98] sm:$0xff]  ;;  %v2456_v20 = vld [vmem:[#allocation2 + $0x1a0] sm:$0xff] }
 0x43b   : > { %v3822_v52 = vsel %vm1545_vm1, %v2507_v59, %v3518_v54  ;;  %v3790_v48 = vsel %vm3771_vm12, %v3757_v26, %v5101_v40  ;;  %v3791_v42 = vsel %vm3771_vm12, %v3758_v29, %v5102_v47  ;;  %v5106_v40 = vunpack.i.l.bf16 %v7895_v31 }
 0x43c   : > { %5314 = vrot.lane.b32.xlu0 %v7843_v39, %s5399_s25  ;;  %5299 = vrot.lane.b32.xlu1 %v5298_v9, %s5402_s23  ;;  %v4846_v39 = vunpack.i.l.bf16 %v7533_v23  ;;  %v4847_v59 = vunpack.i.h.bf16 %v7533_v23  ;;  %v7939_v9 = vld [vmem:[#allocation2 + $0x7a] sm:$0xff]  ;;  %v4927_v26 = vunpack.i.h.bf16 %v7593_v34  ;;  %v5343_v47 = vpack.i.bf16 %v2456_v20, %v2434_v10 }
 0x43d   : > { %4584 = vmatprep.mubr.msk.f32.mxu1 %vm1578_vm2, %v3822_v52  ;;  %v5318_v19 = vpack.i.bf16 %v7932_v0, %v7939_v9 }
 0x43e   : > { %4111 = vmatmul.mubr.f32.gmra.mrb[16].mxu1 %v3790_v48  ;;  %v3522_v16 = vpop.permute.xlu0 %3521  ;;  %v3520_v22 = vpop.permute.xlu1 %3519  ;;  %v3597_v54 = vsel %vm1545_vm1, %v7513_v30, %v4846_v39  ;;  %v3598_v34 = vsel %vm1545_vm1, %v7515_v51, %v4847_v59 }
 0x43f   : > { %v3823_v55 = vsel %vm1545_vm1, %v2508_v11, %v3520_v22  ;;  %v3824_v12 = vsel %vm1545_vm1, %v2509_v45, %v3522_v16  ;;  %v3629_v28 = vsel %vm1611_vm3, %v3597_v54, %v4926_v7  ;;  %v5116_v11 = vunpack.i.l.bf16 %v7906_v57  ;;  %v4541_v22 = vld [vmem:[%s5444_s20 + $0x79] sm:$0xff]  ;;  %v2465_v45 = vld [vmem:[#allocation2 + $0x91] sm:$0xff] }
 0x440   : > { %5324 = vrot.lane.b32.xlu0 %v5323_v6, %s5402_s23  ;;  %3539 = vrot.lane.b32.xlu1 %v4562_v8, %s5393_s22  ;;  %v3661_v23 = vsel %vm1677_vm5, %v3629_v28, %v5106_v40  ;;  %v3630_v31 = vsel %vm1611_vm3, %v3598_v34, %v4927_v26  ;;  %v5117_v7 = vunpack.i.h.bf16 %v7906_v57  ;;  %v4564_v40 = vld [vmem:[%s5444_s20 + $0x189] sm:$0xff]  ;;  %v4851_v28 = vunpack.i.l.bf16 %v7554_v44 }
 0x441   : > { %4585 = vmatprep.mubr.msk.f32.mxu1 %vm1578_vm2, %v3823_v55  ;;  %v3662_v55 = vsel %vm1677_vm5, %v3630_v31, %v5107_v2  ;;  %v4931_v57 = vunpack.i.l.bf16 %v7619_v24 }
 0x442   : > { %4116 = vmatmul.mubr.f32.gmra.mrb[18].mxu1 %v3791_v42  ;;  %v3524_v58 = vpop.permute.xlu0 %3523  ;;  %v5110_v5 = vpop.permute.xlu1 %5109  ;;  %v2487_v42 = vld [vmem:[#allocation2 + $0x199] sm:$0xff] }
 0x443   : > { %4586 = vmatprep.mubr.msk.f32.mxu1 %vm1578_vm2, %v3824_v12  ;;  %v5111_v43 = vunpack.i.l.bf16 %v5110_v5  ;;  %v5112_v30 = vunpack.i.h.bf16 %v5110_v5  ;;  %v2510_v12 = vld [vmem:[#allocation2 + $0x12a] sm:$0xff]  ;;  %v5328_v26 = vpack.i.bf16 %v2487_v42, %v2465_v45 }
 0x444   : > { %3541 = vrot.lane.b32.xlu0 %v4563_v18, %s5393_s22  ;;  %5309 = vrot.lane.b32.xlu1 %v5308_v49, %s5403_s29 }
 0x445   : > { %v3693_v8 = vsel %vm1743_vm7, %v3661_v23, %v5111_v43  ;;  %v3694_v18 = vsel %vm1743_vm7, %v3662_v55, %v5112_v30  ;;  %v3825_v43 = vsel %vm1545_vm1, %v2510_v12, %v3524_v58  ;;  %v4796_v58 = vunpack.i.l.bf16 %v7488_v21  ;;  %v2511_v23 = vld [vmem:[#allocation2 + $0x13a] sm:$0xff]  ;;  %v7983_v30 = vld [vmem:[#allocation2 + $0x82] sm:$0xff]  ;;  %v2489_v12 = vld [vmem:[#allocation2 + $0x32] sm:$0xff] }
 0x446   : > { %v7943_v52 = vpop.permute.xlu0 %5134  ;;  %v5120_v48 = vpop.permute.xlu1 %5119  ;;  %v3726_v39 = vsel %vm3705_vm10, %v3693_v8, %v5116_v11  ;;  %v2232_v8 = vld [vmem:[#allocation2] sm:$0xff] }
 0x447   : > { %v5121_v16 = vunpack.i.l.bf16 %v5120_v48  ;;  %v5122_v51 = vunpack.i.h.bf16 %v5120_v48  ;;  %v3727_v48 = vsel %vm3705_vm10, %v3694_v18, %v5117_v7 }
 0x448   : > { %5334 = vrot.lane.b32.xlu0 %v5308_v49, %s5399_s25  ;;  %5319 = vrot.lane.b32.xlu1 %v5318_v19, %s5404_s30  ;;  %v7974_v19 = vld [vmem:[#allocation2 + $0x18a] sm:$0xff] }
 0x449   : > { %v3759_v14 = vsel %vm3738_vm11, %v3726_v39, %v5121_v16  ;;  %v3760_v2 = vsel %vm3738_vm11, %v3727_v48, %v5122_v51  ;;  %v4876_v16 = vunpack.i.l.bf16 %v7556_v33  ;;  %v5338_v31 = vpack.i.bf16 %v7974_v19, %v7983_v30  ;;  %v4542_v51 = vld [vmem:[%s5444_s20 + $0x81] sm:$0xff] }
 0x44a   : > { %v7957_v6 = vpop.permute.xlu0 %5144  ;;  %v5125_v29 = vpop.permute.xlu1 %5124  ;;  %v3577_v39 = vsel %vm1545_vm1, %v2232_v8, %v4796_v58  ;;  %v4852_v48 = vunpack.i.h.bf16 %v7554_v44 }
 0x44b   : > { %v5126_v46 = vunpack.i.l.bf16 %v5125_v29  ;;  %v5127_v5 = vunpack.i.h.bf16 %v5125_v29  ;;  %v3599_v29 = vsel %vm1545_vm1, %v7526_v13, %v4851_v28  ;;  %v5137_v13 = vunpack.i.h.bf16 %v7943_v52 }
 0x44c   : > { %5344 = vrot.lane.b32.xlu0 %v5343_v47, %s5402_s23  ;;  %3497 = vrot.lane.b32.xlu1 %v4541_v22, %s5393_s22  ;;  %v4956_v47 = vunpack.i.l.bf16 %v7617_v61  ;;  %v3631_v55 = vsel %vm1611_vm3, %v3599_v29, %v4931_v57  ;;  %v5146_v8 = vunpack.i.l.bf16 %v7957_v6 }
 0x44d   : > { %v3792_v49 = vsel %vm3771_vm12, %v3759_v14, %v5126_v46  ;;  %v3793_v20 = vsel %vm3771_vm12, %v3760_v2, %v5127_v5  ;;  %v5136_v46 = vunpack.i.l.bf16 %v7943_v52  ;;  %v3609_v14 = vsel %vm1611_vm3, %v3577_v39, %v4876_v16 }
 0x44e   : > { %v3526_v59 = vpop.permute.xlu0 %3525  ;;  %v7969_v54 = vpop.permute.xlu1 %5129  ;;  %4121 = vmatmul.mubr.f32.gmra.mrb[20].mxu1 %v3792_v49  ;;  %v2466_v49 = vld [vmem:[#allocation2 + $0x99] sm:$0xff] }
 0x44f   : > { %4587 = vmatprep.mubr.msk.f32.mxu1 %vm1578_vm2, %v3825_v43  ;;  %v5131_v10 = vunpack.i.l.bf16 %v7969_v54  ;;  %v3826_v34 = vsel %vm1545_vm1, %v2511_v23, %v3526_v59  ;;  %v3641_v43 = vsel %vm1677_vm5, %v3609_v14, %v4956_v47  ;;  %v2233_v23 = vld [vmem:[#allocation2 + $0x8] sm:$0xff]  ;;  %v5132_v44 = vunpack.i.h.bf16 %v7969_v54 }
 0x450   : > { %5329 = vrot.lane.b32.xlu1 %v5328_v26, %s5403_s29  ;;  %3543 = vrot.lane.b32.xlu0 %v4564_v40, %s5393_s22  ;;  %v2488_v40 = vld [vmem:[#allocation2 + $0x1a1] sm:$0xff]  ;;  %v4797_v26 = vunpack.i.h.bf16 %v7488_v21  ;;  %v3673_v28 = vsel %vm1743_vm7, %v3641_v43, %v5136_v46  ;;  %v4932_v21 = vunpack.i.h.bf16 %v7619_v24  ;;  %v5367_v46 = vld [vmem:[#allocation2 + $0x110] sm:$0xff] }
 0x451   : > { %v3663_v45 = vsel %vm1677_vm5, %v3631_v55, %v5131_v10  ;;  %v5348_v2 = vpack.i.bf16 %v2488_v40, %v2466_v49  ;;  %v4877_v10 = vunpack.i.h.bf16 %v7556_v33  ;;  %v3600_v39 = vsel %vm1545_vm1, %v5367_v46, %v4852_v48 }
 0x452   : > { %v7987_v11 = vpop.permute.xlu0 %5154  ;;  %v5140_v22 = vpop.permute.xlu1 %5139  ;;  %4126 = vmatmul.mubr.f32.gmra.mrb[22].mxu1 %v3793_v20  ;;  %v3695_v52 = vsel %vm1743_vm7, %v3663_v45, %v5137_v13  ;;  %v5147_v20 = vunpack.i.h.bf16 %v7957_v6  ;;  %v3578_v6 = vsel %vm1545_vm1, %v2233_v23, %v4797_v26 }
 0x453   : > { %4588 = vmatprep.mubr.msk.f32.mxu1 %vm1578_vm2, %v3826_v34  ;;  %v5142_v42 = vunpack.i.h.bf16 %v5140_v22  ;;  %v5141_v18 = vunpack.i.l.bf16 %v5140_v22  ;;  %v4957_v22 = vunpack.i.h.bf16 %v7617_v61  ;;  %v5157_v47 = vunpack.i.h.bf16 %v7987_v11  ;;  %v2512_v61 = vld [vmem:[#allocation2 + $0x142] sm:$0xff] }
 0x454   : > { %5339 = vrot.lane.b32.xlu1 %v5338_v31, %s5404_s30  ;;  %v5156_v55 = vunpack.i.l.bf16 %v7987_v11  ;;  %v3632_v11 = vsel %vm1611_vm3, %v3600_v39, %v4932_v21 }
 0x455   : > { %v3706_v57 = vsel %vm3705_vm10, %v3673_v28, %v5141_v18  ;;  %v3728_v58 = vsel %vm3705_vm10, %v3695_v52, %v5142_v42  ;;  %v3610_v42 = vsel %vm1611_vm3, %v3578_v6, %v4877_v10 }
 0x456   : > { %v8003_v7 = vpop.permute.xlu0 %5164  ;;  %v3482_v5 = vpop.permute.xlu1 %3481  ;;  %v3739_v33 = vsel %vm3738_vm11, %v3706_v57, %v5146_v8  ;;  %v3761_v24 = vsel %vm3738_vm11, %v3728_v58, %v5147_v20  ;;  %v3642_v13 = vsel %vm1677_vm5, %v3610_v42, %v4957_v22  ;;  %v4801_v8 = vunpack.i.l.bf16 %v7509_v4 }
 0x457   : > { %v3804_v59 = vsel %vm1545_vm1, %v2489_v12, %v3482_v5  ;;  %v3664_v12 = vsel %vm1677_vm5, %v3632_v11, %v5132_v44  ;;  %v3674_v40 = vsel %vm1743_vm7, %v3642_v13, %v5156_v55  ;;  %v5166_v26 = vunpack.i.l.bf16 %v8003_v7  ;;  %v5368_v55 = vld [vmem:[#allocation2 + $0x18] sm:$0xff] }
 0x458   : > { %3499 = vrot.lane.b32.xlu1 %v4542_v51, %s5393_s22  ;;  %4566 = vmatprep.mubr.msk.f32.mxu0 %vm1578_vm2, %v3804_v59  ;;  %v3696_v43 = vsel %vm1743_vm7, %v3664_v12, %v5157_v47  ;;  %v5167_v59 = vunpack.i.h.bf16 %v8003_v7  ;;  %v4881_v44 = vunpack.i.l.bf16 %v7579_v53 }
 0x45a   : > { %v3528_v16 = vpop.permute.xlu0 %3527  ;;  %v5150_v34 = vpop.permute.xlu1 %5149 }
 0x45b   : > { %v5152_v31 = vunpack.i.h.bf16 %v5150_v34  ;;  %v5151_v29 = vunpack.i.l.bf16 %v5150_v34  ;;  %v3827_v18 = vsel %vm1545_vm1, %v2512_v61, %v3528_v16  ;;  %v4856_v16 = vunpack.i.l.bf16 %v7541_v35 }
 0x45c   : > { %5349 = vrot.lane.b32.xlu1 %v5348_v2, %s5403_s29 }
 0x45d   : > { %v3772_v54 = vsel %vm3771_vm12, %v3739_v33, %v5151_v29  ;;  %v3794_v45 = vsel %vm3771_vm12, %v3761_v24, %v5152_v31  ;;  %v4936_v31 = vunpack.i.l.bf16 %v7599_v38  ;;  %v4961_v29 = vunpack.i.l.bf16 %v7646_v36  ;;  %v5369_v24 = vld [vmem:[#allocation2 + $0x120] sm:$0xff] }
 0x45e   : > { %v5175_v51 = vpop.permute.xlu0 %5174  ;;  %v5160_v14 = vpop.permute.xlu1 %5159  ;;  %4021 = vmatmul.mubr.f32.vlgmr.msra.gmra.mrb[32].mxu0 %v3772_v54  ;;  %4131 = vmatmul.mubr.f32.gmra.mrb[24].mxu1 %v3794_v45  ;;  %v3579_v33 = vsel %vm1545_vm1, %v5368_v55, %v4801_v8  ;;  %v3601_v6 = vsel %vm1545_vm1, %v5369_v24, %v4856_v16  ;;  %v4802_v8 = vunpack.i.h.bf16 %v7509_v4  ;;  %v4857_v16 = vunpack.i.h.bf16 %v7541_v35  ;;  %v5370_v55 = vld [vmem:[#allocation2 + $0x20] sm:$0xff]  ;;  %v5371_v24 = vld [vmem:[#allocation2 + $0x128] sm:$0xff] }
 0x45f   : > { %v5162_v5 = vunpack.i.h.bf16 %v5160_v14  ;;  %v5161_v49 = vunpack.i.l.bf16 %v5160_v14  ;;  %4589 = vmatprep.mubr.msk.f32.mxu1 %vm1578_vm2, %v3827_v18  ;;  %v5177_v28 = vunpack.i.h.bf16 %v5175_v51  ;;  %v5176_v57 = vunpack.i.l.bf16 %v5175_v51 }
 0x460   : > { %v3611_v61 = vsel %vm1611_vm3, %v3579_v33, %v4881_v44  ;;  %v3633_v54 = vsel %vm1611_vm3, %v3601_v6, %v4936_v31  ;;  %v4962_v31 = vunpack.i.h.bf16 %v7646_v36  ;;  %v3580_v33 = vsel %vm1545_vm1, %v5370_v55, %v4802_v8  ;;  %v5373_v8 = vld [vmem:[#allocation2 + $0x138] sm:$0xff] }
 0x461   : > { %v3729_v52 = vsel %vm3705_vm10, %v3696_v43, %v5162_v5  ;;  %v3707_v48 = vsel %vm3705_vm10, %v3674_v40, %v5161_v49  ;;  %v3643_v42 = vsel %vm1677_vm5, %v3611_v61, %v4961_v29  ;;  %v3602_v4 = vsel %vm1545_vm1, %v5371_v24, %v4857_v16 }
 0x462   : > { %v5185_v2 = vpop.permute.xlu0 %5184  ;;  %v3484_v58 = vpop.permute.xlu1 %3483  ;;  %v3762_v23 = vsel %vm3738_vm11, %v3729_v52, %v5167_v59  ;;  %v3740_v10 = vsel %vm3738_vm11, %v3707_v48, %v5166_v26  ;;  %v4807_v24 = vunpack.i.h.bf16 %v7497_v3 }
 0x463   : > { %v3805_v21 = vsel %vm1545_vm1, %v7662_v27, %v3484_v58  ;;  %v3795_v20 = vsel %vm3771_vm12, %v3762_v23, %v5177_v28  ;;  %v3773_v7 = vsel %vm3771_vm12, %v3740_v10, %v5176_v57  ;;  %v5187_v14 = vunpack.i.h.bf16 %v5185_v2 }
 0x464   : > { %4567 = vmatprep.mubr.msk.f32.mxu0 %vm1578_vm2, %v3805_v21  ;;  %4136 = vmatmul.mubr.f32.gmra.mrb[26].mxu1 %v3795_v20  ;;  %v5186_v13 = vunpack.i.l.bf16 %v5185_v2 }
 0x465   : > { %4026 = vmatmul.mubr.f32.gmra.mrb[34].mxu0 %v3773_v7 }
 0x466   : > { %v3486_v34 = vpop.permute.xlu0 %3485  ;;  %v8051_v22 = vpop.permute.xlu1 %5169 }
 0x467   : > { %v3806_v27 = vsel %vm1545_vm1, %v7738_v63, %v3486_v34  ;;  %v5171_v47 = vunpack.i.l.bf16 %v8051_v22  ;;  %v4937_v34 = vunpack.i.h.bf16 %v7599_v38 }
 0x468   : > { %4568 = vmatprep.mubr.msk.f32.mxu0 %vm1578_vm2, %v3806_v27  ;;  %v5172_v27 = vunpack.i.h.bf16 %v8051_v22 }
 0x469   : > { %v3665_v11 = vsel %vm1677_vm5, %v3633_v54, %v5171_v47 }
 0x46a   : > { %v5195_v46 = vpop.permute.xlu0 %5194  ;;  %v5180_v39 = vpop.permute.xlu1 %5179 }
 0x46b   : > { %v5182_v45 = vunpack.i.h.bf16 %v5180_v39  ;;  %v5181_v63 = vunpack.i.l.bf16 %v5180_v39  ;;  %v5196_v43 = vunpack.i.l.bf16 %v5195_v46  ;;  %v5197_v48 = vunpack.i.h.bf16 %v5195_v46 }
 0x46d   : > { %v3675_v18 = vsel %vm1743_vm7, %v3643_v42, %v5181_v63  ;;  %v3697_v51 = vsel %vm1743_vm7, %v3665_v11, %v5182_v45 }
 0x46e   : > { %v5205_v12 = vpop.permute.xlu0 %5204  ;;  %v5190_v5 = vpop.permute.xlu1 %5189  ;;  %v3708_v59 = vsel %vm3705_vm10, %v3675_v18, %v5186_v13  ;;  %v3730_v26 = vsel %vm3705_vm10, %v3697_v51, %v5187_v14 }
 0x46f   : > { %v5192_v49 = vunpack.i.h.bf16 %v5190_v5  ;;  %v5191_v40 = vunpack.i.l.bf16 %v5190_v5  ;;  %v5207_v63 = vunpack.i.h.bf16 %v5205_v12  ;;  %v5206_v42 = vunpack.i.l.bf16 %v5205_v12 }
 0x471   : > { %v3741_v28 = vsel %vm3738_vm11, %v3708_v59, %v5191_v40  ;;  %v3763_v52 = vsel %vm3738_vm11, %v3730_v26, %v5192_v49  ;;  %v4806_v40 = vunpack.i.l.bf16 %v7497_v3  ;;  %v4886_v26 = vunpack.i.l.bf16 %v7565_v41 }
 0x472   : > { %v3488_v57 = vpop.permute.xlu0 %3487  ;;  %v3530_v58 = vpop.permute.xlu1 %3529  ;;  %v3774_v23 = vsel %vm3771_vm12, %v3741_v28, %v5196_v43  ;;  %v3796_v21 = vsel %vm3771_vm12, %v3763_v52, %v5197_v48  ;;  %v4861_v43 = vunpack.i.l.bf16 %v7563_v32  ;;  %v4941_v28 = vunpack.i.l.bf16 %v7628_v50 }
 0x473   : > { %v3807_v2 = vsel %vm1545_vm1, %v7793_v17, %v3488_v57  ;;  %v3828_v10 = vsel %vm1545_vm1, %v7730_v37, %v3530_v58  ;;  %4031 = vmatmul.mubr.f32.gmra.mrb[36].mxu0 %v3774_v23  ;;  %v4882_v17 = vunpack.i.h.bf16 %v7579_v53  ;;  %v3634_v53 = vsel %vm1611_vm3, %v3602_v4, %v4937_v34 }
 0x474   : > { %4569 = vmatprep.mubr.msk.f32.mxu0 %vm1578_vm2, %v3807_v2  ;;  %4590 = vmatprep.mubr.msk.f32.mxu1 %vm1578_vm2, %v3828_v10  ;;  %v3666_v36 = vsel %vm1677_vm5, %v3634_v53, %v5172_v27  ;;  %v4966_v58 = vunpack.i.l.bf16 %v7626_v56  ;;  %v4862_v4 = vunpack.i.h.bf16 %v7563_v32 }
 0x475   : > { %4141 = vmatmul.mubr.f32.gmra.mrb[28].mxu1 %v3796_v21  ;;  %v3612_v35 = vsel %vm1611_vm3, %v3580_v33, %v4882_v17  ;;  %v5372_v21 = vld [vmem:[#allocation2 + $0x30] sm:$0xff] }
 0x476   : > { %v8080_v20 = vpop.permute.xlu0 %5214  ;;  %v5200_v7 = vpop.permute.xlu1 %5199  ;;  %v3644_v46 = vsel %vm1677_vm5, %v3612_v35, %v4962_v31 }
 0x477   : > { %v5202_v29 = vunpack.i.h.bf16 %v5200_v7  ;;  %v5201_v47 = vunpack.i.l.bf16 %v5200_v7  ;;  %v5216_v23 = vunpack.i.l.bf16 %v8080_v20  ;;  %v3581_v7 = vsel %vm1545_vm1, %v5372_v21, %v4806_v40 }
 0x478   : > { %v3613_v34 = vsel %vm1611_vm3, %v3581_v7, %v4886_v26  ;;  %v5217_v3 = vunpack.i.h.bf16 %v8080_v20 }
 0x479   : > { %v3676_v39 = vsel %vm1743_vm7, %v3644_v46, %v5201_v47  ;;  %v3698_v61 = vsel %vm1743_vm7, %v3666_v36, %v5202_v29  ;;  %v3645_v29 = vsel %vm1677_vm5, %v3613_v34, %v4966_v58  ;;  %v4942_v46 = vunpack.i.h.bf16 %v7628_v50  ;;  %v8707_v34 = vld [vmem:[#allocation43_spill] sm:$0xff] }
 0x47a   : > { %v8086_v37 = vpop.permute.xlu0 %5224  ;;  %v5210_v44 = vpop.permute.xlu1 %5209  ;;  %v3709_v13 = vsel %vm3705_vm10, %v3676_v39, %v5206_v42  ;;  %v3731_v5 = vsel %vm3705_vm10, %v3698_v61, %v5207_v63  ;;  %v4967_v61 = vunpack.i.h.bf16 %v7626_v56  ;;  %v5374_v42 = vld [vmem:[#allocation2 + $0x38] sm:$0xff] }
 0x47b   : > { %v5212_v54 = vunpack.i.h.bf16 %v5210_v44  ;;  %v5211_v45 = vunpack.i.l.bf16 %v5210_v44  ;;  %v5227_v2 = vunpack.i.h.bf16 %v8086_v37  ;;  %v5226_v10 = vunpack.i.l.bf16 %v8086_v37 }
 0x47d   : > { %v3764_v49 = vsel %vm3738_vm11, %v3731_v5, %v5212_v54  ;;  %v3677_v55 = vsel %vm1743_vm7, %v3645_v29, %v5226_v10  ;;  %v8708_v29 = vld [vmem:[#allocation50_spill] sm:$0xff] }
 0x47e   : > { %v8094_v38 = vpop.permute.xlu0 %5234  ;;  %v3532_v6 = vpop.permute.xlu1 %3531 }
 0x47f   : > { %v3829_v22 = vsel %vm1545_vm1, %v7784_v15, %v3532_v6  ;;  %v3742_v15 = vsel %vm3738_vm11, %v3709_v13, %v5211_v45  ;;  %v4887_v6 = vunpack.i.h.bf16 %v7565_v41  ;;  %v5236_v36 = vunpack.i.l.bf16 %v8094_v38 }
 0x480   : > { %4591 = vmatprep.mubr.msk.f32.mxu1 %vm1578_vm2, %v3829_v22 }
 0x482   : > { %v3534_v11 = vpop.permute.xlu0 %3533  ;;  %v5220_v18 = vpop.permute.xlu1 %5219 }
 0x483   : > { %v5222_v51 = vunpack.i.h.bf16 %v5220_v18  ;;  %v5221_v14 = vunpack.i.l.bf16 %v5220_v18  ;;  %v3830_v52 = vsel %vm1545_vm1, %v7806_v25, %v3534_v11  ;;  %v3603_v25 = vsel %vm1545_vm1, %v5373_v8, %v4861_v43 }
 0x484   : > { %v3635_v44 = vsel %vm1611_vm3, %v3603_v25, %v4941_v28  ;;  %v3582_v11 = vsel %vm1545_vm1, %v5374_v42, %v4807_v24 }
 0x485   : > { %v3775_v59 = vsel %vm3771_vm12, %v3742_v15, %v5221_v14  ;;  %v3797_v12 = vsel %vm3771_vm12, %v3764_v49, %v5222_v51  ;;  %v3667_v47 = vsel %vm1677_vm5, %v3635_v44, %v5216_v23  ;;  %v3614_v51 = vsel %vm1611_vm3, %v3582_v11, %v4887_v6  ;;  %v5377_v6 = vld [vmem:[#allocation2 + $0x150] sm:$0xff] }
 0x486   : > { %v8115_v48 = vpop.permute.xlu0 %5244  ;;  %v5230_v57 = vpop.permute.xlu1 %5229  ;;  %4036 = vmatmul.mubr.f32.gmra.mrb[38].mxu0 %v3775_v59  ;;  %4146 = vmatmul.mubr.f32.gmra.mrb[30].mxu1 %v3797_v12  ;;  %v3699_v33 = vsel %vm1743_vm7, %v3667_v47, %v5227_v2  ;;  %v3646_v49 = vsel %vm1677_vm5, %v3614_v51, %v4967_v61  ;;  %v4866_v44 = vunpack.i.l.bf16 %v8707_v34  ;;  %v4891_v47 = vunpack.i.l.bf16 %v8708_v29 }
 0x487   : > { %4592 = vmatprep.mubr.msk.f32.mxu1 %vm1578_vm2, %v3830_v52  ;;  %v5232_v16 = vunpack.i.h.bf16 %v5230_v57  ;;  %v5231_v17 = vunpack.i.l.bf16 %v5230_v57  ;;  %v5247_v45 = vunpack.i.h.bf16 %v8115_v48  ;;  %v5246_v63 = vunpack.i.l.bf16 %v8115_v48 }
 0x489   : > { %v3710_v35 = vsel %vm3705_vm10, %v3677_v55, %v5231_v17  ;;  %v3732_v53 = vsel %vm3705_vm10, %v3699_v33, %v5232_v16  ;;  %v3678_v12 = vsel %vm1743_vm7, %v3646_v49, %v5246_v63  ;;  %v8706_v16 = vld [vmem:[#allocation40_spill] sm:$0xff]  ;;  %v8710_v33 = vld [vmem:[#allocation57_spill] sm:$0xff] }
 0x48a   : > { %v5255_v31 = vpop.permute.xlu0 %5254  ;;  %v3490_v27 = vpop.permute.xlu1 %3489  ;;  %v3743_v41 = vsel %vm3738_vm11, %v3710_v35, %v5236_v36  ;;  %v4811_v17 = vunpack.i.l.bf16 %v8706_v16  ;;  %v4971_v24 = vunpack.i.l.bf16 %v8710_v33  ;;  %v5376_v35 = vld [vmem:[#allocation2 + $0x48] sm:$0xff] }
 0x48b   : > { %v3808_v37 = vsel %vm1545_vm1, %v7814_v60, %v3490_v27  ;;  %v5237_v60 = vunpack.i.h.bf16 %v8094_v38  ;;  %v5375_v38 = vld [vmem:[#allocation2 + $0x140] sm:$0xff]  ;;  %v5257_v28 = vunpack.i.h.bf16 %v5255_v31  ;;  %v5256_v52 = vunpack.i.l.bf16 %v5255_v31 }
 0x48c   : > { %4570 = vmatprep.mubr.msk.f32.mxu0 %vm1578_vm2, %v3808_v37  ;;  %v3604_v18 = vsel %vm1545_vm1, %v5375_v38, %v4862_v4  ;;  %v8709_v37 = vld [vmem:[#allocation53_spill] sm:$0xff] }
 0x48d   : > { %v3765_v50 = vsel %vm3738_vm11, %v3732_v53, %v5237_v60  ;;  %v3636_v14 = vsel %vm1611_vm3, %v3604_v18, %v4942_v46  ;;  %v4946_v55 = vunpack.i.l.bf16 %v8709_v37  ;;  %v3583_v53 = vsel %vm1545_vm1, %v5376_v35, %v4811_v17 }
 0x48e   : > { %v3536_v22 = vpop.permute.xlu0 %3535  ;;  %v5240_v39 = vpop.permute.xlu1 %5239  ;;  %v3668_v40 = vsel %vm1677_vm5, %v3636_v14, %v5217_v3  ;;  %v3605_v46 = vsel %vm1545_vm1, %v5377_v6, %v4866_v44 }
 0x48f   : > { %v5242_v54 = vunpack.i.h.bf16 %v5240_v39  ;;  %v5241_v32 = vunpack.i.l.bf16 %v5240_v39  ;;  %v3831_v13 = vsel %vm1545_vm1, %v7847_v62, %v3536_v22  ;;  %v3700_v26 = vsel %vm1743_vm7, %v3668_v40, %v5247_v45 }
 0x490   : > { %v3615_v22 = vsel %vm1611_vm3, %v3583_v53, %v4891_v47  ;;  %v3637_v39 = vsel %vm1611_vm3, %v3605_v46, %v4946_v55 }
 0x491   : > { %v3776_v56 = vsel %vm3771_vm12, %v3743_v41, %v5241_v32  ;;  %v3798_v20 = vsel %vm3771_vm12, %v3765_v50, %v5242_v54  ;;  %v3647_v3 = vsel %vm1677_vm5, %v3615_v22, %v4971_v24  ;;  %v2519_v24 = vld [vmem:[#allocation2 + $0x19a] sm:$0xff] }
 0x492   : > { %v5265_v5 = vpop.permute.xlu0 %5264  ;;  %v5250_v15 = vpop.permute.xlu1 %5249  ;;  %4041 = vmatmul.mubr.f32.gmra.mrb[40].mxu0 %v3776_v56  ;;  %4151 = vmatmul.mubr.f32.gmra.mrb[32].mxu1 %v3798_v20 }
 0x493   : > { %v5252_v43 = vunpack.i.h.bf16 %v5250_v15  ;;  %v5251_v59 = vunpack.i.l.bf16 %v5250_v15  ;;  %4593 = vmatprep.mubr.msk.f32.mxu1 %vm1578_vm2, %v3831_v13  ;;  %v5267_v48 = vunpack.i.h.bf16 %v5265_v5  ;;  %v5266_v58 = vunpack.i.l.bf16 %v5265_v5 }
 0x495   : > { %v3733_v62 = vsel %vm3705_vm10, %v3700_v26, %v5252_v43  ;;  %v3711_v57 = vsel %vm3705_vm10, %v3678_v12, %v5251_v59 }
 0x496   : > { %v5275_v23 = vpop.permute.xlu0 %5274  ;;  %v3492_v2 = vpop.permute.xlu1 %3491  ;;  %v3766_v10 = vsel %vm3738_vm11, %v3733_v62, %v5257_v28  ;;  %v3744_v21 = vsel %vm3738_vm11, %v3711_v57, %v5256_v52  ;;  %v4812_v28 = vunpack.i.h.bf16 %v8706_v16  ;;  %v4867_v52 = vunpack.i.h.bf16 %v8707_v34 }
 0x497   : > { %v3809_v7 = vsel %vm1545_vm1, %v7857_v1, %v3492_v2  ;;  %v3799_v8 = vsel %vm3771_vm12, %v3766_v10, %v5267_v48  ;;  %v3777_v25 = vsel %vm3771_vm12, %v3744_v21, %v5266_v58  ;;  %v5277_v63 = vunpack.i.h.bf16 %v5275_v23  ;;  %v5378_v10 = vld [vmem:[#allocation2 + $0x50] sm:$0xff] }
 0x498   : > { %4571 = vmatprep.mubr.msk.f32.mxu0 %vm1578_vm2, %v3809_v7  ;;  %4156 = vmatmul.mubr.f32.gmra.mrb[34].mxu1 %v3799_v8  ;;  %v5276_v41 = vunpack.i.l.bf16 %v5275_v23  ;;  %v4947_v48 = vunpack.i.h.bf16 %v8709_v37  ;;  %v4972_v57 = vunpack.i.h.bf16 %v8710_v33  ;;  %v3584_v21 = vsel %vm1545_vm1, %v5378_v10, %v4812_v28  ;;  %v5379_v7 = vld [vmem:[#allocation2 + $0x158] sm:$0xff] }
 0x499   : > { %4046 = vmatmul.mubr.f32.gmra.mrb[42].mxu0 %v3777_v25  ;;  %v3606_v8 = vsel %vm1545_vm1, %v5379_v7, %v4867_v52  ;;  %v2497_v28 = vld [vmem:[#allocation2 + $0x92] sm:$0xff] }
 0x49a   : > { %v3494_v31 = vpop.permute.xlu0 %3493  ;;  %v8171_v27 = vpop.permute.xlu1 %5259  ;;  %v3638_v16 = vsel %vm1611_vm3, %v3606_v8, %v4947_v48 }
 0x49b   : > { %v3810_v1 = vsel %vm1545_vm1, %v7939_v9, %v3494_v31  ;;  %v5261_v4 = vunpack.i.l.bf16 %v8171_v27  ;;  %v5262_v58 = vunpack.i.h.bf16 %v8171_v27 }
 0x49c   : > { %4572 = vmatprep.mubr.msk.f32.mxu0 %vm1578_vm2, %v3810_v1 }
 0x49d   : > { %v3669_v54 = vsel %vm1677_vm5, %v3637_v39, %v5261_v4  ;;  %v3670_v31 = vsel %vm1677_vm5, %v3638_v16, %v5262_v58  ;;  %v8711_v39 = vld [vmem:[#allocation39_spill] sm:$0xff] }
 0x49e   : > { %v5285_v60 = vpop.permute.xlu0 %5284  ;;  %v5270_v36 = vpop.permute.xlu1 %5269 }
 0x49f   : > { %v5272_v61 = vunpack.i.h.bf16 %v5270_v36  ;;  %v5271_v9 = vunpack.i.l.bf16 %v5270_v36  ;;  %v5286_v18 = vunpack.i.l.bf16 %v5285_v60  ;;  %v5287_v13 = vunpack.i.h.bf16 %v5285_v60 }
 0x4a1   : > { %v3679_v32 = vsel %vm1743_vm7, %v3647_v3, %v5271_v9  ;;  %v3701_v45 = vsel %vm1743_vm7, %v3669_v54, %v5272_v61  ;;  %v4816_v61 = vunpack.i.l.bf16 %v8711_v39  ;;  %v8712_v9 = vld [vmem:[#allocation47_spill] sm:$0xff] }
 0x4a2   : > { %v5295_v50 = vpop.permute.xlu0 %5294  ;;  %v5280_v42 = vpop.permute.xlu1 %5279  ;;  %v3712_v56 = vsel %vm3705_vm10, %v3679_v32, %v5276_v41  ;;  %v3734_v20 = vsel %vm3705_vm10, %v3701_v45, %v5277_v63  ;;  %v4871_v3 = vunpack.i.l.bf16 %v8712_v9  ;;  %v8713_v45 = vld [vmem:[#allocation44_spill] sm:$0xff] }
 0x4a3   : > { %v5282_v11 = vunpack.i.h.bf16 %v5280_v42  ;;  %v5281_v38 = vunpack.i.l.bf16 %v5280_v42  ;;  %v5297_v1 = vunpack.i.h.bf16 %v5295_v50  ;;  %v5296_v33 = vunpack.i.l.bf16 %v5295_v50  ;;  %v8714_v41 = vld [vmem:[#allocation56_spill] sm:$0xff] }
 0x4a4   : > { %v4896_v63 = vunpack.i.l.bf16 %v8713_v45  ;;  %v4951_v50 = vunpack.i.l.bf16 %v8714_v41 }
 0x4a5   : > { %v3745_v51 = vsel %vm3738_vm11, %v3712_v56, %v5281_v38  ;;  %v3767_v14 = vsel %vm3738_vm11, %v3734_v20, %v5282_v11  ;;  %v8715_v38 = vld [vmem:[#allocation54_spill] sm:$0xff] }
 0x4a6   : > { %v3496_v5 = vpop.permute.xlu0 %3495  ;;  %v3538_v15 = vpop.permute.xlu1 %3537  ;;  %v3778_v49 = vsel %vm3771_vm12, %v3745_v51, %v5286_v18  ;;  %v3800_v59 = vsel %vm3771_vm12, %v3767_v14, %v5287_v13  ;;  %v4976_v18 = vunpack.i.l.bf16 %v8715_v38  ;;  %v5380_v14 = vld [vmem:[#allocation2 + $0x60] sm:$0xff] }
 0x4a7   : > { %v3811_v40 = vsel %vm1545_vm1, %v7983_v30, %v3496_v5  ;;  %v3832_v43 = vsel %vm1545_vm1, %v7932_v0, %v3538_v15  ;;  %4051 = vmatmul.mubr.f32.gmra.mrb[44].mxu0 %v3778_v49  ;;  %v4892_v30 = vunpack.i.h.bf16 %v8708_v29  ;;  %v3585_v13 = vsel %vm1545_vm1, %v5380_v14, %v4816_v61  ;;  %v5381_v5 = vld [vmem:[#allocation2 + $0x168] sm:$0xff]  ;;  %v2498_v61 = vld [vmem:[#allocation2 + $0x9a] sm:$0xff] }
 0x4a8   : > { %4573 = vmatprep.mubr.msk.f32.mxu0 %vm1578_vm2, %v3811_v40  ;;  %4594 = vmatprep.mubr.msk.f32.mxu1 %vm1578_vm2, %v3832_v43  ;;  %v3607_v15 = vsel %vm1545_vm1, %v5381_v5, %v4871_v3  ;;  %v3617_v43 = vsel %vm1611_vm3, %v3585_v13, %v4896_v63  ;;  %v8288_v13 = vld [vmem:[%s8398_s3 + $0x1] ss:$0 sm:$0xff] }
 0x4a9   : > { %4161 = vmatmul.mubr.f32.gmra.mrb[36].mxu1 %v3800_v59  ;;  %v3616_v25 = vsel %vm1611_vm3, %v3584_v21, %v4892_v30  ;;  %v3639_v59 = vsel %vm1611_vm3, %v3607_v15, %v4951_v50  ;;  %v3649_v30 = vsel %vm1677_vm5, %v3617_v43, %v4976_v18 }
 0x4aa   : > { %v8200_v12 = vpop.permute.xlu0 %5304  ;;  %v5290_v26 = vpop.permute.xlu1 %5289  ;;  %v3648_v44 = vsel %vm1677_vm5, %v3616_v25, %v4972_v57 }
 0x4ab   : > { %v5292_v23 = vunpack.i.h.bf16 %v5290_v26  ;;  %v5291_v2 = vunpack.i.l.bf16 %v5290_v26  ;;  %v5306_v56 = vunpack.i.l.bf16 %v8200_v12 }
 0x4ad   : > { %v3680_v29 = vsel %vm1743_vm7, %v3648_v44, %v5291_v2  ;;  %v3702_v47 = vsel %vm1743_vm7, %v3670_v31, %v5292_v23  ;;  %v3671_v48 = vsel %vm1677_vm5, %v3639_v59, %v5306_v56  ;;  %v2520_v2 = vld [vmem:[#allocation2 + $0x1a2] sm:$0xff] }
 0x4ae   : > { %v8206_v0 = vpop.permute.xlu0 %5314  ;;  %v5300_v62 = vpop.permute.xlu1 %5299  ;;  %v3713_v46 = vsel %vm3705_vm10, %v3680_v29, %v5296_v33  ;;  %v3735_v60 = vsel %vm3705_vm10, %v3702_v47, %v5297_v1  ;;  %v4872_v29 = vunpack.i.h.bf16 %v8712_v9  ;;  %v4977_v33 = vunpack.i.h.bf16 %v8715_v38 }
 0x4af   : > { %v5302_v37 = vunpack.i.h.bf16 %v5300_v62  ;;  %v5301_v55 = vunpack.i.l.bf16 %v5300_v62  ;;  %v5317_v20 = vunpack.i.h.bf16 %v8206_v0  ;;  %v5316_v51 = vunpack.i.l.bf16 %v8206_v0 }
 0x4b1   : > { %v3746_v36 = vsel %vm3738_vm11, %v3713_v46, %v5301_v55  ;;  %v3768_v22 = vsel %vm3738_vm11, %v3735_v60, %v5302_v37  ;;  %v3681_v62 = vsel %vm1743_vm7, %v3649_v30, %v5316_v51  ;;  %v3703_v57 = vsel %vm1743_vm7, %v3671_v48, %v5317_v20  ;;  %v5383_v46 = vld [vmem:[#allocation2 + $0x170] sm:$0xff] }
 0x4b2   : > { %v8214_v17 = vpop.permute.xlu0 %5324  ;;  %v3540_v34 = vpop.permute.xlu1 %3539  ;;  %v4952_v55 = vunpack.i.h.bf16 %v8714_v41  ;;  %v3608_v60 = vsel %vm1545_vm1, %v5383_v46, %v4872_v29 }
 0x4b3   : > { %v3833_v27 = vsel %vm1545_vm1, %v7974_v19, %v3540_v34  ;;  %v5327_v10 = vunpack.i.h.bf16 %v8214_v17  ;;  %v5326_v21 = vunpack.i.l.bf16 %v8214_v17  ;;  %v4897_v17 = vunpack.i.h.bf16 %v8713_v45 }
 0x4b4   : > { %4595 = vmatprep.mubr.msk.f32.mxu1 %vm1578_vm2, %v3833_v27  ;;  %v4817_v27 = vunpack.i.h.bf16 %v8711_v39  ;;  %v3640_v39 = vsel %vm1611_vm3, %v3608_v60, %v4952_v55 }
 0x4b6   : > { %v3542_v4 = vpop.permute.xlu0 %3541  ;;  %v5310_v35 = vpop.permute.xlu1 %5309 }
 0x4b7   : > { %v5312_v53 = vunpack.i.h.bf16 %v5310_v35  ;;  %v5311_v6 = vunpack.i.l.bf16 %v5310_v35  ;;  %v3834_v19 = vsel %vm1545_vm1, %v2519_v24, %v3542_v4  ;;  %v5307_v24 = vunpack.i.h.bf16 %v8200_v12 }
 0x4b9   : > { %v3779_v54 = vsel %vm3771_vm12, %v3746_v36, %v5311_v6  ;;  %v3801_v32 = vsel %vm3771_vm12, %v3768_v22, %v5312_v53  ;;  %v5382_v53 = vld [vmem:[#allocation2 + $0x68] sm:$0xff]  ;;  %v3672_v3 = vsel %vm1677_vm5, %v3640_v39, %v5307_v24 }
 0x4ba   : > { %v8234_v42 = vpop.permute.xlu0 %5334  ;;  %v5320_v11 = vpop.permute.xlu1 %5319  ;;  %4056 = vmatmul.mubr.f32.gmra.mrb[46].mxu0 %v3779_v54  ;;  %4166 = vmatmul.mubr.f32.gmra.mrb[38].mxu1 %v3801_v32  ;;  %v3586_v6 = vsel %vm1545_vm1, %v5382_v53, %v4817_v27 }
 0x4bb   : > { %4596 = vmatprep.mubr.msk.f32.mxu1 %vm1578_vm2, %v3834_v19  ;;  %v5322_v49 = vunpack.i.h.bf16 %v5320_v11  ;;  %v5321_v40 = vunpack.i.l.bf16 %v5320_v11  ;;  %v5337_v4 = vunpack.i.h.bf16 %v8234_v42  ;;  %v5336_v35 = vunpack.i.l.bf16 %v8234_v42 }
 0x4bc   : > { %v3618_v22 = vsel %vm1611_vm3, %v3586_v6, %v4897_v17 }
 0x4bd   : > { %v3714_v58 = vsel %vm3705_vm10, %v3681_v62, %v5321_v40  ;;  %v3736_v23 = vsel %vm3705_vm10, %v3703_v57, %v5322_v49  ;;  %v3650_v9 = vsel %vm1677_vm5, %v3618_v22, %v4977_v33  ;;  %v3704_v45 = vsel %vm1743_vm7, %v3672_v3, %v5337_v4 }
 0x4be   : > { %v5345_v26 = vpop.permute.xlu0 %5344  ;;  %v3498_v52 = vpop.permute.xlu1 %3497  ;;  %v3747_v34 = vsel %vm3738_vm11, %v3714_v58, %v5326_v21  ;;  %v3769_v44 = vsel %vm3738_vm11, %v3736_v23, %v5327_v10  ;;  %v3682_v32 = vsel %vm1743_vm7, %v3650_v9, %v5336_v35 }
 0x4bf   : > { %v3812_v0 = vsel %vm1545_vm1, %v2497_v28, %v3498_v52  ;;  %v5347_v50 = vunpack.i.h.bf16 %v5345_v26  ;;  %v5346_v42 = vunpack.i.l.bf16 %v5345_v26 }
 0x4c0   : > { %4574 = vmatprep.mubr.msk.f32.mxu0 %vm1578_vm2, %v3812_v0 }
 0x4c2   : > { %v5330_v7 = vpop.permute.xlu1 %5329  ;;  %v3544_v8 = vpop.permute.xlu0 %3543 }
 0x4c3   : > { %v5332_v25 = vunpack.i.h.bf16 %v5330_v7  ;;  %v5331_v16 = vunpack.i.l.bf16 %v5330_v7  ;;  %v3835_v31 = vsel %vm1545_vm1, %v2520_v2, %v3544_v8 }
 0x4c5   : > { %v3780_v47 = vsel %vm3771_vm12, %v3747_v34, %v5331_v16  ;;  %v3802_v37 = vsel %vm3771_vm12, %v3769_v44, %v5332_v25 }
 0x4c6   : > { %v5340_v1 = vpop.permute.xlu1 %5339  ;;  %4061 = vmatmul.mubr.f32.gmra.mrb[48].mxu0 %v3780_v47  ;;  %4171 = vmatmul.mubr.f32.gmra.mrb[40].mxu1 %v3802_v37 }
 0x4c7   : > { %4597 = vmatprep.mubr.msk.f32.mxu1 %vm1578_vm2, %v3835_v31  ;;  %v5342_v19 = vunpack.i.h.bf16 %v5340_v1  ;;  %v5341_v36 = vunpack.i.l.bf16 %v5340_v1 }
 0x4c9   : > { %v3715_v63 = vsel %vm3705_vm10, %v3682_v32, %v5341_v36  ;;  %v3737_v41 = vsel %vm3705_vm10, %v3704_v45, %v5342_v19 }
 0x4ca   : > { %v3500_v12 = vpop.permute.xlu1 %3499  ;;  %v3748_v56 = vsel %vm3738_vm11, %v3715_v63, %v5346_v42  ;;  %v3770_v20 = vsel %vm3738_vm11, %v3737_v41, %v5347_v50 }
 0x4cb   : > { %v3813_v54 = vsel %vm1545_vm1, %v2498_v61, %v3500_v12 }
 0x4cc   : > { %4575 = vmatprep.mubr.msk.f32.mxu0 %vm1578_vm2, %v3813_v54 }
 0x4ce   : > { %v5350_v11 = vpop.permute.xlu1 %5349 }
 0x4cf   : > { %v5352_v38 = vunpack.i.h.bf16 %v5350_v11  ;;  %v5351_v18 = vunpack.i.l.bf16 %v5350_v11 }
 0x4d1   : > { %v3781_v51 = vsel %vm3771_vm12, %v3748_v56, %v5351_v18  ;;  %v3803_v14 = vsel %vm3771_vm12, %v3770_v20, %v5352_v38 }
 0x4d2   : > { %4066 = vmatmul.mubr.f32.gmra.mrb[50].mxu0 %v3781_v51  ;;  %4176 = vmatmul.mubr.f32.gmra.mrb[42].mxu1 %v3803_v14 }
 0x4d9   : > { %v4072_v5 = vpop.f32.mrb[0].mxu1 }
 0x4da   : > { %v4073_v15 = vadd.f32 %v8288_v13, %v4072_v5  ;;  %v4074_v49 = vpop.f32.mrb[1].mxu1 }
 0x4dc   : > { %v4191_v40 = vmax.f32 %v4073_v15, 0.0 }
 0x4dd   : > { %v4077_v43 = vpop.f32.mrb[2].mxu1 }
 0x4de   : > { %4223 = vst.msk [vmem:[%s8295_s6 + $0x50] sm:$0xff] %vm1545_vm1, %v4191_v40  ;;  %v4078_v59 = vadd.f32 %v8288_v13, %v4077_v43  ;;  %v4079_v26 = vpop.f32.mrb[3].mxu1 }
 0x4e0   : > { %v4192_v28 = vmax.f32 %v4078_v59, 0.0 }
 0x4e2   : > { %4224 = vst.msk [vmem:[%s8295_s6 + $0x58] sm:$0xff] %vm1545_vm1, %v4192_v28 }
 0x4e9   : > { %v4082_v52 = vpop.f32.mrb[4].mxu1 }
 0x4ea   : > { %v4083_v30 = vadd.f32 %v8288_v13, %v4082_v52  ;;  %v4084_v48 = vpop.f32.mrb[5].mxu1 }
 0x4ec   : > { %v4193_v0 = vmax.f32 %v4083_v30, 0.0 }
 0x4ed   : > { %v4087_v62 = vpop.f32.mrb[6].mxu1 }
 0x4ee   : > { %4225 = vst.msk [vmem:[%s8295_s6 + $0x60] sm:$0xff] %vm1545_vm1, %v4193_v0  ;;  %v4088_v57 = vadd.f32 %v8288_v13, %v4087_v62  ;;  %v4089_v58 = vpop.f32.mrb[7].mxu1 }
 0x4f0   : > { %v4194_v23 = vmax.f32 %v4088_v57, 0.0 }
 0x4f2   : > { %4226 = vst.msk [vmem:[%s8295_s6 + $0x68] sm:$0xff] %vm1545_vm1, %v4194_v23 }
 0x4f5   : > { %v4092_v2 = vpop.f32.mrb[8].mxu1 }
 0x4f6   : > { %v4093_v10 = vadd.f32 %v8288_v13, %v4092_v2  ;;  %v4094_v21 = vpop.f32.mrb[9].mxu1 }
 0x4f8   : > { %v4195_v7 = vmax.f32 %v4093_v10, 0.0 }
 0x4f9   : > { %v4097_v8 = vpop.f32.mrb[10].mxu1 }
 0x4fa   : > { %4227 = vst.msk [vmem:[%s8295_s6 + $0x70] sm:$0xff] %vm1545_vm1, %v4195_v7  ;;  %v4098_v25 = vadd.f32 %v8288_v13, %v4097_v8  ;;  %v4099_v16 = vpop.f32.mrb[11].mxu1 }
 0x4fc   : > { %v4196_v34 = vmax.f32 %v4098_v25, 0.0 }
 0x4fe   : > { %4228 = vst.msk [vmem:[%s8295_s6 + $0x78] sm:$0xff] %vm1545_vm1, %v4196_v34 }
 0x505   : > { %v4102_v44 = vpop.f32.mrb[12].mxu1 }
 0x506   : > { %v4103_v31 = vadd.f32 %v8288_v13, %v4102_v44  ;;  %v4104_v27 = vpop.f32.mrb[13].mxu1 }
 0x508   : > { %v4197_v29 = vmax.f32 %v4103_v31, 0.0 }
 0x509   : > { %v4107_v47 = vpop.f32.mrb[14].mxu1 }
 0x50a   : > { %4229 = vst.msk [vmem:[%s8295_s6 + $0x80] sm:$0xff] %vm1545_vm1, %v4197_v29  ;;  %v4108_v37 = vadd.f32 %v8288_v13, %v4107_v47  ;;  %v4109_v17 = vpop.f32.mrb[15].mxu1 }
 0x50c   : > { %v4198_v55 = vmax.f32 %v4108_v37, 0.0 }
 0x50e   : > { %4230 = vst.msk [vmem:[%s8295_s6 + $0x88] sm:$0xff] %vm1545_vm1, %v4198_v55 }
 0x511   : > { %v4112_v1 = vpop.f32.mrb[16].mxu1 }
 0x512   : > { %v4113_v33 = vadd.f32 %v8288_v13, %v4112_v1  ;;  %v4114_v24 = vpop.f32.mrb[17].mxu1 }
 0x514   : > { %v4199_v4 = vmax.f32 %v4113_v33, 0.0 }
 0x515   : > { %v4117_v35 = vpop.f32.mrb[18].mxu1 }
 0x516   : > { %4231 = vst.msk [vmem:[%s8295_s6 + $0x90] sm:$0xff] %vm1545_vm1, %v4199_v4  ;;  %v4118_v53 = vadd.f32 %v8288_v13, %v4117_v35  ;;  %v4119_v6 = vpop.f32.mrb[19].mxu1 }
 0x518   : > { %v4200_v46 = vmax.f32 %v4118_v53, 0.0 }
 0x51a   : > { %4232 = vst.msk [vmem:[%s8295_s6 + $0x98] sm:$0xff] %vm1545_vm1, %v4200_v46 }
 0x521   : > { %v4122_v60 = vpop.f32.mrb[20].mxu1 }
 0x522   : > { %v4123_v19 = vadd.f32 %v8288_v13, %v4122_v60  ;;  %v4124_v36 = vpop.f32.mrb[21].mxu1 }
 0x524   : > { %v4201_v22 = vmax.f32 %v4123_v19, 0.0 }
 0x525   : > { %v4127_v39 = vpop.f32.mrb[22].mxu1 }
 0x526   : > { %4233 = vst.msk [vmem:[%s8295_s6 + $0xa0] sm:$0xff] %vm1545_vm1, %v4201_v22  ;;  %v4128_v61 = vadd.f32 %v8288_v13, %v4127_v39  ;;  %v4129_v12 = vpop.f32.mrb[23].mxu1 }
 0x528   : > { %v4202_v9 = vmax.f32 %v4128_v61, 0.0 }
 0x52a   : > { %4234 = vst.msk [vmem:[%s8295_s6 + $0xa8] sm:$0xff] %vm1545_vm1, %v4202_v9 }
 0x531   : > { %v4022_v3 = vpop.f32.mrb[32].mxu0  ;;  %v4132_v54 = vpop.f32.mrb[24].mxu1 }
 0x532   : > { %v4023_v32 = vadd.f32 %v8288_v13, %v4022_v3  ;;  %v4133_v45 = vadd.f32 %v8288_v13, %v4132_v54  ;;  %v4024_v63 = vpop.f32.mrb[33].mxu0  ;;  %v4134_v41 = vpop.f32.mrb[25].mxu1 }
 0x534   : > { %v4181_v50 = vmax.f32 %v4023_v32, 0.0  ;;  %v4203_v42 = vmax.f32 %v4133_v45, 0.0 }
 0x536   : > { %4213 = vst.msk [vmem:[%s8295_s6] sm:$0xff] %vm1545_vm1, %v4181_v50  ;;  %4235 = vst.msk [vmem:[%s8295_s6 + $0xb0] sm:$0xff] %vm1545_vm1, %v4203_v42 }
 0x537   : > { %v4137_v11 = vpop.f32.mrb[26].mxu1 }
 0x538   : > { %v4138_v38 = vadd.f32 %v8288_v13, %v4137_v11  ;;  %v4027_v18 = vpop.f32.mrb[34].mxu0  ;;  %v4139_v56 = vpop.f32.mrb[27].mxu1 }
 0x539   : > { %v4028_v20 = vadd.f32 %v8288_v13, %v4027_v18  ;;  %v4029_v51 = vpop.f32.mrb[35].mxu0 }
 0x53a   : > { %v4204_v14 = vmax.f32 %v4138_v38, 0.0 }
 0x53b   : > { %v4182_v5 = vmax.f32 %v4028_v20, 0.0 }
 0x53c   : > { %4236 = vst.msk [vmem:[%s8295_s6 + $0xb8] sm:$0xff] %vm1545_vm1, %v4204_v14 }
 0x53d   : > { %4214 = vst.msk [vmem:[%s8295_s6 + $0x8] sm:$0xff] %vm1545_vm1, %v4182_v5 }
 0x546   : > { %v4032_v15 = vpop.f32.mrb[36].mxu0 }
 0x547   : > { %v4033_v49 = vadd.f32 %v8288_v13, %v4032_v15  ;;  %v4034_v40 = vpop.f32.mrb[37].mxu0 }
 0x548   : > { %v4142_v43 = vpop.f32.mrb[28].mxu1 }
 0x549   : > { %v4183_v59 = vmax.f32 %v4033_v49, 0.0  ;;  %v4143_v26 = vadd.f32 %v8288_v13, %v4142_v43  ;;  %v4144_v28 = vpop.f32.mrb[29].mxu1 }
 0x54b   : > { %4215 = vst.msk [vmem:[%s8295_s6 + $0x10] sm:$0xff] %vm1545_vm1, %v4183_v59  ;;  %v4205_v52 = vmax.f32 %v4143_v26, 0.0 }
 0x54d   : > { %4237 = vst.msk [vmem:[%s8295_s6 + $0xc0] sm:$0xff] %vm1545_vm1, %v4205_v52 }
 0x559   : > { %v4037_v30 = vpop.f32.mrb[38].mxu0  ;;  %v4147_v48 = vpop.f32.mrb[30].mxu1 }
 0x55a   : > { %v4038_v0 = vadd.f32 %v8288_v13, %v4037_v30  ;;  %v4148_v62 = vadd.f32 %v8288_v13, %v4147_v48  ;;  %v4039_v57 = vpop.f32.mrb[39].mxu0  ;;  %v4149_v58 = vpop.f32.mrb[31].mxu1 }
 0x55c   : > { %v4184_v23 = vmax.f32 %v4038_v0, 0.0  ;;  %v4206_v2 = vmax.f32 %v4148_v62, 0.0 }
 0x55e   : > { %4216 = vst.msk [vmem:[%s8295_s6 + $0x18] sm:$0xff] %vm1545_vm1, %v4184_v23  ;;  %4238 = vst.msk [vmem:[%s8295_s6 + $0xc8] sm:$0xff] %vm1545_vm1, %v4206_v2 }
 0x565   : > { %v4042_v10 = vpop.f32.mrb[40].mxu0  ;;  %v4152_v21 = vpop.f32.mrb[32].mxu1 }
 0x566   : > { %v4043_v7 = vadd.f32 %v8288_v13, %v4042_v10  ;;  %v4153_v8 = vadd.f32 %v8288_v13, %v4152_v21  ;;  %v4044_v25 = vpop.f32.mrb[41].mxu0  ;;  %v4154_v16 = vpop.f32.mrb[33].mxu1 }
 0x568   : > { %v4185_v34 = vmax.f32 %v4043_v7, 0.0  ;;  %v4207_v44 = vmax.f32 %v4153_v8, 0.0 }
 0x56a   : > { %4217 = vst.msk [vmem:[%s8295_s6 + $0x20] sm:$0xff] %vm1545_vm1, %v4185_v34  ;;  %4239 = vst.msk [vmem:[%s8295_s6 + $0xd0] sm:$0xff] %vm1545_vm1, %v4207_v44 }
 0x56b   : > { %v4157_v31 = vpop.f32.mrb[34].mxu1 }
 0x56c   : > { %v4158_v27 = vadd.f32 %v8288_v13, %v4157_v31  ;;  %v4047_v29 = vpop.f32.mrb[42].mxu0  ;;  %v4159_v47 = vpop.f32.mrb[35].mxu1 }
 0x56d   : > { %v4048_v37 = vadd.f32 %v8288_v13, %v4047_v29  ;;  %v4049_v17 = vpop.f32.mrb[43].mxu0 }
 0x56e   : > { %v4208_v55 = vmax.f32 %v4158_v27, 0.0 }
 0x56f   : > { %v4186_v1 = vmax.f32 %v4048_v37, 0.0 }
 0x570   : > { %4240 = vst.msk [vmem:[%s8295_s6 + $0xd8] sm:$0xff] %vm1545_vm1, %v4208_v55 }
 0x571   : > { %4218 = vst.msk [vmem:[%s8295_s6 + $0x28] sm:$0xff] %vm1545_vm1, %v4186_v1 }
 0x57a   : > { %v4052_v33 = vpop.f32.mrb[44].mxu0 }
 0x57b   : > { %v4053_v24 = vadd.f32 %v8288_v13, %v4052_v33  ;;  %v4054_v4 = vpop.f32.mrb[45].mxu0 }
 0x57c   : > { %v4162_v35 = vpop.f32.mrb[36].mxu1 }
 0x57d   : > { %v4187_v53 = vmax.f32 %v4053_v24, 0.0  ;;  %v4163_v6 = vadd.f32 %v8288_v13, %v4162_v35  ;;  %v4164_v46 = vpop.f32.mrb[37].mxu1 }
 0x57f   : > { %4219 = vst.msk [vmem:[%s8295_s6 + $0x30] sm:$0xff] %vm1545_vm1, %v4187_v53  ;;  %v4209_v60 = vmax.f32 %v4163_v6, 0.0 }
 0x581   : > { %4241 = vst.msk [vmem:[%s8295_s6 + $0xe0] sm:$0xff] %vm1545_vm1, %v4209_v60 }
 0x58d   : > { %v4057_v19 = vpop.f32.mrb[46].mxu0  ;;  %v4167_v36 = vpop.f32.mrb[38].mxu1 }
 0x58e   : > { %v4058_v22 = vadd.f32 %v8288_v13, %v4057_v19  ;;  %v4168_v39 = vadd.f32 %v8288_v13, %v4167_v36  ;;  %v4059_v61 = vpop.f32.mrb[47].mxu0  ;;  %v4169_v12 = vpop.f32.mrb[39].mxu1 }
 0x590   : > { %v4188_v9 = vmax.f32 %v4058_v22, 0.0  ;;  %v4210_v3 = vmax.f32 %v4168_v39, 0.0 }
 0x592   : > { %4220 = vst.msk [vmem:[%s8295_s6 + $0x38] sm:$0xff] %vm1545_vm1, %v4188_v9  ;;  %4242 = vst.msk [vmem:[%s8295_s6 + $0xe8] sm:$0xff] %vm1545_vm1, %v4210_v3 }
 0x599   : > { %v4062_v54 = vpop.f32.mrb[48].mxu0  ;;  %v4172_v32 = vpop.f32.mrb[40].mxu1 }
 0x59a   : > { %v4063_v45 = vadd.f32 %v8288_v13, %v4062_v54  ;;  %v4173_v63 = vadd.f32 %v8288_v13, %v4172_v32  ;;  %v4064_v41 = vpop.f32.mrb[49].mxu0  ;;  %v4174_v50 = vpop.f32.mrb[41].mxu1 }
 0x59c   : > { %v4189_v42 = vmax.f32 %v4063_v45, 0.0  ;;  %v4211_v11 = vmax.f32 %v4173_v63, 0.0 }
 0x59e   : > { %4221 = vst.msk [vmem:[%s8295_s6 + $0x40] sm:$0xff] %vm1545_vm1, %v4189_v42  ;;  %4243 = vst.msk [vmem:[%s8295_s6 + $0xf0] sm:$0xff] %vm1545_vm1, %v4211_v11 }
 0x5a5   : > { %v4067_v38 = vpop.f32.mrb[50].mxu0  ;;  %v4177_v18 = vpop.f32.mrb[42].mxu1 }
 0x5a6   : > { %v4068_v56 = vadd.f32 %v8288_v13, %v4067_v38  ;;  %v4178_v20 = vadd.f32 %v8288_v13, %v4177_v18  ;;  %v4069_v51 = vpop.f32.mrb[51].mxu0  ;;  %v4179_v14 = vpop.f32.mrb[43].mxu1 }
 0x5a8   : > { %v4190_v5 = vmax.f32 %v4068_v56, 0.0  ;;  %v4212_v15 = vmax.f32 %v4178_v20, 0.0 }
 0x5aa   : > { %4222 = vst.msk [vmem:[%s8295_s6 + $0x48] sm:$0xff] %vm1545_vm1, %v4190_v5  ;;  %4244 = vst.msk [vmem:[%s8295_s6 + $0xf8] sm:$0xff] %vm1545_vm1, %v4212_v15 }
 0x5ab PF: > { %s14_s15 = sadd.s32 1, %s5390_s15  }
 0x5ac   : > { %p11_p4 = scmp.ge.s32.totalorder %s14_s15, 4  }
 0x5ae   :  { %13 = sbr.rel (!%p11_p4) target bundleno = 1 (0x1), region = 70 }

</bundles_post_ra>
